<compile_context>
chip_gen: v7x
topology: tpu7x:2x2x1
jax: 0.10.0
libtpu: 0.0.40
codegen_flags: <defaults>
</compile_context>

<pallas_src>
import math

import jax
import jax.numpy as jnp
from jax.experimental import pallas as pl
from jax.experimental.pallas import tpu as pltpu

# ----------------------------- scaled-down DeBERTa config -----------------------------
B, S = 2, 8              # batch, sequence
H = 128                  # hidden size (multiple of 128 -> lane-dense tiles)
NH, HD = 4, 32           # attention heads, head dim (NH * HD == H)
G = B * NH               # merged (batch, head) leading dim for attention einsums
I = 512                  # FFN intermediate size (4 * H, like DeBERTa)
NLAYERS = 2
VOCAB = 100
K = S                    # max relative distance ("att_span"); 2*K relative buckets
EPS = 1e-7               # DeBERTa layer_norm_eps
MM_DTYPE = jnp.bfloat16  # matmul operand dtype (f32 accumulation); elementwise stays f32
M = B * S                # rows in the flattened (batch*seq) slab
INV_SCALE = 1.0 / math.sqrt(HD * 3.0)   # scale_factor = 1 + |{c2p, p2c}| = 3


# --------------------------------- in-kernel helpers ----------------------------------

def _layer_norm(x, g, b):
    mu = jnp.mean(x, axis=-1, keepdims=True)
    var = jnp.mean((x - mu) ** 2, axis=-1, keepdims=True)
    return (x - mu) * jax.lax.rsqrt(var + EPS) * g + b


# ------------------------------------ Pallas kernel ------------------------------------

def deberta_stack_kernel(h0_ref, mmask_ref, embg_ref, embb_ref, kbias_ref,
                         oh_ref, oht_ref, rel_ref,
                         wqkv_ref, bqkv_ref, wpos_ref, bpos_ref,
                         wo_ref, bo_ref, ln1g_ref, ln1b_ref,
                         w1_ref, b1_ref, w2_ref, b2_ref, ln2g_ref, ln2b_ref,
                         o_ref, h_sc):
    """One grid step == one DeBERTa encoder layer; hidden state carried in h_sc."""
    @pl.when(pl.program_id(0) == 0)
    def _():
        # Fused DebertaEmbeddings epilogue: LayerNorm, then zero the padded rows.
        h_sc[...] = _layer_norm(h0_ref[...], embg_ref[...], embb_ref[...]) * mmask_ref[...]

    h = h_sc[...]                                              # (M, H) f32 carried state
    hmm = h.astype(MM_DTYPE)

    # ---- fused projections: one (M,H)x(H,3H) and one (2K,H)x(H,2H) MXU matmul ---------
    # (scale 1/sqrt(3*HD) pre-folded into Wq/bq and pos_q_proj at pack time)
    qkv = jnp.dot(hmm, wqkv_ref[0], preferred_element_type=jnp.float32) + bqkv_ref[0]
    pos = jnp.dot(rel_ref[...], wpos_ref[0], preferred_element_type=jnp.float32) + bpos_ref[0]

    def split_heads(x):      # (M, H) -> (B*NH, S, HD), bf16
        return (x.reshape(B, S, NH, HD).transpose(0, 2, 1, 3)
                 .reshape(G, S, HD).astype(MM_DTYPE))

    def split_pos(x):        # (2K, H) -> (NH, 2K, HD), bf16
        return x.reshape(2 * K, NH, HD).transpose(1, 0, 2).astype(MM_DTYPE)

    qh = split_heads(qkv[:, :H])
    kh = split_heads(qkv[:, H:2 * H])                          # DeBERTa: no key bias
    vh = split_heads(qkv[:, 2 * H:])
    pos_k = split_pos(pos[:, :H])                              # pos_proj   (c2p keys)
    pos_q = split_pos(pos[:, H:])                              # pos_q_proj (p2c queries)
    pos_k_g = jnp.broadcast_to(pos_k[None], (B, NH, 2 * K, HD)).reshape(G, 2 * K, HD)
    pos_q_g = jnp.broadcast_to(pos_q[None], (B, NH, 2 * K, HD)).reshape(G, 2 * K, HD)

    # ---- disentangled attention scores (per batch element; no cross-batch waste) ------
    scores = jnp.einsum('gqd,gkd->gqk', qh, kh, preferred_element_type=jnp.float32)
    c2p_all = jnp.einsum('gqd,grd->gqr', qh, pos_k_g, preferred_element_type=jnp.float32)
    p2c_all = jnp.einsum('gkd,grd->gkr', kh, pos_q_g, preferred_element_type=jnp.float32)

    # relative-position gather as an MXU one-hot contraction (no VPU multiply-reduce):
    #   c2p[g,q,k] = c2p_all[g,q,bucket(q,k)],  p2c[g,q,k] = p2c_all[g,k,bucket(q,k)]
    c2p = jnp.einsum('gqr,qkr->gqk', c2p_all.astype(MM_DTYPE), oh_ref[...],
                     preferred_element_type=jnp.float32)
    p2c_t = jnp.einsum('gkr,kqr->gkq', p2c_all.astype(MM_DTYPE), oht_ref[...],
                       preferred_element_type=jnp.float32)
    scores = scores + c2p + jnp.swapaxes(p2c_t, -1, -2) + kbias_ref[...]

    scores = scores - jnp.max(scores, axis=-1, keepdims=True)
    p = jnp.exp(scores)
    p = p * pl.reciprocal(jnp.sum(p, axis=-1, keepdims=True), approx=True)

    ctx = jnp.einsum('gqk,gkd->gqd', p.astype(MM_DTYPE), vh,
                     preferred_element_type=jnp.float32)       # (G, S, HD)
    ctx = (ctx.reshape(B, NH, S, HD).transpose(0, 2, 1, 3)
              .reshape(M, H).astype(MM_DTYPE))
    # ---- output projection + head merge: one full-K (M,H)x(H,H) matmul ----------------
    attn = jnp.dot(ctx, wo_ref[0], preferred_element_type=jnp.float32) + bo_ref[0]
    h1 = _layer_norm(h + attn, ln1g_ref[0], ln1b_ref[0])

    f = jnp.dot(h1.astype(MM_DTYPE), w1_ref[0], preferred_element_type=jnp.float32) + b1_ref[0]
    # TODO(synk): HF DeBERTa uses exact (erf) GELU; the tanh approximation is used here
    # (and in the reference) to stay on transcendentals with guaranteed Mosaic lowering.
    f = jax.nn.gelu(f, approximate=True)
    f = jnp.dot(f.astype(MM_DTYPE), w2_ref[0], preferred_element_type=jnp.float32) + b2_ref[0]
    out = _layer_norm(h1 + f, ln2g_ref[0], ln2b_ref[0])

    h_sc[...] = out
    o_ref[...] = out


# ------------------------------- pallas_call wrapper -----------------------------------

def deberta_layers(h0, mmask, kbias, oh, oht, packed):
    invariant = [
        (h0,                  (M, H)),
        (mmask,               (M, 1)),
        (packed["emb_ln_g"],  (1, H)),
        (packed["emb_ln_b"],  (1, H)),
        (kbias,               (G, 1, S)),
        (oh,                  (S, S, 2 * K)),
        (oht,                 (S, S, 2 * K)),
        (packed["rel_emb"],   (2 * K, H)),
    ]
    per_layer = [
        (packed["wqkv"],  (H, 3 * H)), (packed["bqkv"],  (1, 3 * H)),
        (packed["wpos"],  (H, 2 * H)), (packed["bpos"],  (1, 2 * H)),
        (packed["wo"],    (H, H)),     (packed["bo"],    (1, H)),
        (packed["ln1_g"], (1, H)),     (packed["ln1_b"], (1, H)),
        (packed["w1"],    (H, I)),     (packed["b1"],    (1, I)),
        (packed["w2"],    (I, H)),     (packed["b2"],    (1, H)),
        (packed["ln2_g"], (1, H)),     (packed["ln2_b"], (1, H)),
    ]

    def const_spec(shape):           # layer-invariant: DMA'd once, resident across layers
        zero = (0,) * len(shape)
        return pl.BlockSpec(shape, lambda l: zero)

    def layer_spec(shape):           # stacked per-layer weights, pipelined over the grid
        zero = (0,) * len(shape)
        return pl.BlockSpec((1,) + shape, lambda l: (l,) + zero)

    in_specs = ([const_spec(s) for _, s in invariant]
                + [layer_spec(s) for _, s in per_layer])
    args = [a for a, _ in invariant] + [a for a, _ in per_layer]

    return pl.pallas_call(
        deberta_stack_kernel,
        out_shape=jax.ShapeDtypeStruct((M, H), jnp.float32),
        grid_spec=pltpu.PrefetchScalarGridSpec(
            num_scalar_prefetch=0,
            grid=(NLAYERS,),
            in_specs=in_specs,
            out_specs=pl.BlockSpec((M, H), lambda l: (0, 0)),
            scratch_shapes=[pltpu.VMEM((M, H), jnp.float32)],   # h carried across layers
        ),
        compiler_params=pltpu.CompilerParams(
            dimension_semantics=("arbitrary",)),                # sequential layer axis
    )(*args)


# --------------------------------- parameters / packing --------------------------------

def init_params(key):
    keys = jax.random.split(key, 256)
    it = iter(keys)

    def nrm(shape, scale=0.02):
        return (scale * jax.random.normal(next(it), shape)).astype(jnp.float32)

    params = {
        "word_emb": nrm((VOCAB, H)),
        "rel_emb": nrm((2 * K, H)),                 # shared relative-position embeddings
        "emb_ln_g": jnp.ones((1, H), jnp.float32),
        "emb_ln_b": nrm((1, H)),
        "layers": [],
    }
    for _ in range(NLAYERS):
        params["layers"].append({
            "wq": nrm((H, H)), "bq": nrm((1, H)),
            "wk": nrm((H, H)),                       # no key bias in DeBERTa
            "wv": nrm((H, H)), "bv": nrm((1, H)),
            "pos_kw": nrm((H, H)),                   # pos_proj (no bias)
            "pos_qw": nrm((H, H)), "pos_qb": nrm((1, H)),   # pos_q_proj (bias)
            "wo": nrm((H, H)), "bo": nrm((1, H)),
            "ln1_g": jnp.ones((1, H), jnp.float32), "ln1_b": nrm((1, H)),
            "w1": nrm((H, I)), "b1": nrm((1, I)),
            "w2": nrm((I, H)), "b2": nrm((1, H)),
            "ln2_g": jnp.ones((1, H), jnp.float32), "ln2_b": nrm((1, H)),
        })
    return params


def pack_params(p):
    """One-time layout plumbing (feedback: hoisted out of the forward pass):
    fuse Wq|Wk|Wv and pos_kw|pos_qw, fold the 1/sqrt(3*HD) scale into Wq/bq and
    pos_q_proj, stack per-layer weights along a leading layer axis, cast matmul
    weights (and rel_emb) to bf16 once."""
    def stack(fn):
        return jnp.stack([fn(lp) for lp in p["layers"]], axis=0)

    zeros_h = jnp.zeros((1, H), jnp.float32)
    return {
        "word_emb": p["word_emb"],
        "emb_ln_g": p["emb_ln_g"], "emb_ln_b": p["emb_ln_b"],
        "rel_emb": p["rel_emb"].astype(MM_DTYPE),
        "wqkv": stack(lambda lp: jnp.concatenate(
            [lp["wq"] * INV_SCALE, lp["wk"], lp["wv"]], axis=1)).astype(MM_DTYPE),
        "bqkv": stack(lambda lp: jnp.concatenate(
            [lp["bq"] * INV_SCALE, zeros_h, lp["bv"]], axis=1)),
        "wpos": stack(lambda lp: jnp.concatenate(
            [lp["pos_kw"], lp["pos_qw"] * INV_SCALE], axis=1)).astype(MM_DTYPE),
        "bpos": stack(lambda lp: jnp.concatenate(
            [zeros_h, lp["pos_qb"] * INV_SCALE], axis=1)),
        "wo": stack(lambda lp: lp["wo"]).astype(MM_DTYPE),
        "bo": stack(lambda lp: lp["bo"]),
        "ln1_g": stack(lambda lp: lp["ln1_g"]), "ln1_b": stack(lambda lp: lp["ln1_b"]),
        "w1": stack(lambda lp: lp["w1"]).astype(MM_DTYPE), "b1": stack(lambda lp: lp["b1"]),
        "w2": stack(lambda lp: lp["w2"]).astype(MM_DTYPE), "b2": stack(lambda lp: lp["b2"]),
        "ln2_g": stack(lambda lp: lp["ln2_g"]), "ln2_b": stack(lambda lp: lp["ln2_b"]),
    }


# --------------------------------- full model forward ----------------------------------

@jax.jit
def deberta_encoder_forward(packed, input_ids, attention_mask):
    """Pallas-backed DebertaLargeEncoder.forward (param.cls == 1 path): CLS feature."""
    mask_f = attention_mask.astype(jnp.float32)                     # (B, S)

    # Embedding lookup (gather) is plain-JAX glue.  DeBERTa adds no absolute-position
    # embedding to the input (position_biased_input=False) and has no token-type
    # embeddings (type_vocab_size=0); positions enter via the disentangled attention.
    h0 = packed["word_emb"][input_ids].reshape(M, H).astype(jnp.float32)
    mmask = mask_f.reshape(M, 1)                                    # zero pad rows after emb LN

    # Additive key-padding bias, replicated per head (g = b*NH + n).
    kbias = jnp.broadcast_to(((1.0 - mask_f) * -1e9)[:, None, :],
                             (B, NH, S)).reshape(G, 1, S)

    # Relative-position buckets + one-hot gather matrices (layer-invariant, bf16).
    pos = jnp.arange(S)
    rel_idx = jnp.clip(pos[:, None] - pos[None, :] + K, 0, 2 * K - 1)   # (S, S)
    oh = jax.nn.one_hot(rel_idx, 2 * K, dtype=MM_DTYPE)                 # oh[q,k,r]
    oht = jnp.swapaxes(oh, 0, 1)                                        # oht[k,q,r]

    h = deberta_layers(h0, mmask, kbias, oh, oht, packed)           # (M, H)
    return h.reshape(B, S, H)[:, 0, :]                              # feat = last_hidden[:, 0, :]


# ---------------------------------- pure-JAX reference ----------------------------------

def _layer_norm_ref(x, g, b):
    mu = jnp.mean(x, axis=-1, keepdims=True)
    var = jnp.mean((x - mu) ** 2, axis=-1, keepdims=True)
    return (x - mu) * jax.lax.rsqrt(var + EPS) * g + b


def _mm_ref(x, w):
    return jnp.dot(x.astype(MM_DTYPE), w.astype(MM_DTYPE),
                   preferred_element_type=jnp.float32)


def _layer_ref(h, mask_f, rel_emb, p):
    q = _mm_ref(h, p["wq"]) + p["bq"]
    k = _mm_ref(h, p["wk"])
    v = _mm_ref(h, p["wv"]) + p["bv"]
    pos_k = _mm_ref(rel_emb, p["pos_kw"])
    pos_q = _mm_ref(rel_emb, p["pos_qw"]) + p["pos_qb"]

    split = lambda x: x.reshape(B, S, NH, HD).transpose(0, 2, 1, 3)     # (B,NH,S,HD)
    qh = split(q) * INV_SCALE
    kh = split(k)
    vh = split(v)
    pos_kh = pos_k.reshape(2 * K, NH, HD).transpose(1, 0, 2)            # (NH,2K,HD)
    pos_qh = pos_q.reshape(2 * K, NH, HD).transpose(1, 0, 2) * INV_SCALE

    rel_idx = jnp.clip(jnp.arange(S)[:, None] - jnp.arange(S)[None, :] + K, 0, 2 * K - 1)
    pos_k_g = pos_kh[:, rel_idx, :]                                     # (NH,S,S,HD)
    pos_q_g = pos_qh[:, rel_idx, :]

    c = lambda x: x.astype(MM_DTYPE)
    scores = jnp.einsum('bhqd,bhkd->bhqk', c(qh), c(kh), preferred_element_type=jnp.float32)
    scores += jnp.einsum('bhqd,hqkd->bhqk', c(qh), c(pos_k_g), preferred_element_type=jnp.float32)
    scores += jnp.einsum('bhkd,hqkd->bhqk', c(kh), c(pos_q_g), preferred_element_type=jnp.float32)
    scores += ((1.0 - mask_f) * -1e9)[:, None, None, :]

    probs = jax.nn.softmax(scores, axis=-1)
    ctx = jnp.einsum('bhqk,bhkd->bhqd', c(probs), c(vh), preferred_element_type=jnp.float32)
    ctx = ctx.transpose(0, 2, 1, 3).reshape(B, S, H)

    h1 = _layer_norm_ref(h + _mm_ref(ctx, p["wo"]) + p["bo"], p["ln1_g"], p["ln1_b"])
    f = jax.nn.gelu(_mm_ref(h1, p["w1"]) + p["b1"], approximate=True)
    f = _mm_ref(f, p["w2"]) + p["b2"]
    return _layer_norm_ref(h1 + f, p["ln2_g"], p["ln2_b"])


def deberta_forward_ref(params, input_ids, attention_mask):
    mask_f = attention_mask.astype(jnp.float32)
    h = params["word_emb"][input_ids].astype(jnp.float32)
    h = _layer_norm_ref(h, params["emb_ln_g"], params["emb_ln_b"]) * mask_f[..., None]
    h = h.reshape(B, S, H)
    for lp in params["layers"]:
        h = _layer_ref(h.reshape(B, S, H), mask_f, params["rel_emb"], lp)
    return h[:, 0, :]


# --------------------------------------- main -------------------------------------------

if __name__ == "__main__":
    key = jax.random.PRNGKey(0)
    pkey, ikey = jax.random.split(key)
    params = init_params(pkey)
    packed = pack_params(params)        # one-time weight fusion / bf16 cast / stacking

    input_ids = jax.random.randint(ikey, (B, S), 3, VOCAB)
    attention_mask = jnp.array([[1.0] * S,
                                [1.0] * (S - 2) + [0.0] * 2], dtype=jnp.float32)

    feat = deberta_encoder_forward(packed, input_ids, attention_mask)
    feat = jax.block_until_ready(feat)
    assert feat.shape == (B, H), feat.shape

    ref = deberta_forward_ref(params, input_ids, attention_mask)
    max_err = float(jnp.max(jnp.abs(feat - ref)))
    assert max_err < 2e-2, f"mismatch vs reference: {max_err}"

    print("KERNEL_OK")
</pallas_src>

<mosaic_0001>
module attributes {stable_mosaic.version = 11 : i64} {
  func.func @deberta_stack_kernel(%arg0: i32, %arg1: memref<16x128xf32, #tpu.memory_space<vmem>>, %arg2: memref<16x1xf32, #tpu.memory_space<vmem>>, %arg3: memref<1x128xf32, #tpu.memory_space<vmem>>, %arg4: memref<1x128xf32, #tpu.memory_space<vmem>>, %arg5: memref<8x1x8xf32, #tpu.memory_space<vmem>>, %arg6: memref<8x8x16xbf16, #tpu.memory_space<vmem>>, %arg7: memref<8x8x16xbf16, #tpu.memory_space<vmem>>, %arg8: memref<16x128xbf16, #tpu.memory_space<vmem>>, %arg9: memref<1x128x384xbf16, #tpu.memory_space<vmem>>, %arg10: memref<1x1x384xf32, #tpu.memory_space<vmem>>, %arg11: memref<1x128x256xbf16, #tpu.memory_space<vmem>>, %arg12: memref<1x1x256xf32, #tpu.memory_space<vmem>>, %arg13: memref<1x128x128xbf16, #tpu.memory_space<vmem>>, %arg14: memref<1x1x128xf32, #tpu.memory_space<vmem>>, %arg15: memref<1x1x128xf32, #tpu.memory_space<vmem>>, %arg16: memref<1x1x128xf32, #tpu.memory_space<vmem>>, %arg17: memref<1x128x512xbf16, #tpu.memory_space<vmem>>, %arg18: memref<1x1x512xf32, #tpu.memory_space<vmem>>, %arg19: memref<1x512x128xbf16, #tpu.memory_space<vmem>>, %arg20: memref<1x1x128xf32, #tpu.memory_space<vmem>>, %arg21: memref<1x1x128xf32, #tpu.memory_space<vmem>>, %arg22: memref<1x1x128xf32, #tpu.memory_space<vmem>>, %arg23: memref<16x128xf32, #tpu.memory_space<vmem>>, %arg24: memref<16x128xf32, #tpu.memory_space<vmem>>) attributes {dimension_semantics = [#tpu.dimension_semantics<arbitrary>], iteration_bounds = array<i64: 2>, scalar_prefetch = 0 : i64, scratch_operands = 1 : i64, tpu.core_type = #tpu.core_type<tc>, window_params = [{pipeline_mode = #tpu.pipeline_mode<synchronous>, transform_indices = @transform_0, window_bounds = array<i64: 16, 128>}, {pipeline_mode = #tpu.pipeline_mode<synchronous>, transform_indices = @transform_1, window_bounds = array<i64: 16, 1>}, {pipeline_mode = #tpu.pipeline_mode<synchronous>, transform_indices = @transform_2, window_bounds = array<i64: 1, 128>}, {pipeline_mode = #tpu.pipeline_mode<synchronous>, transform_indices = @transform_3, window_bounds = array<i64: 1, 128>}, {pipeline_mode = #tpu.pipeline_mode<synchronous>, transform_indices = @transform_4, window_bounds = array<i64: 8, 1, 8>}, {pipeline_mode = #tpu.pipeline_mode<synchronous>, transform_indices = @transform_5, window_bounds = array<i64: 8, 8, 16>}, {pipeline_mode = #tpu.pipeline_mode<synchronous>, transform_indices = @transform_6, window_bounds = array<i64: 8, 8, 16>}, {pipeline_mode = #tpu.pipeline_mode<synchronous>, transform_indices = @transform_7, window_bounds = array<i64: 16, 128>}, {transform_indices = @transform_8, window_bounds = array<i64: 1, 128, 384>}, {transform_indices = @transform_9, window_bounds = array<i64: 1, 1, 384>}, {transform_indices = @transform_10, window_bounds = array<i64: 1, 128, 256>}, {transform_indices = @transform_11, window_bounds = array<i64: 1, 1, 256>}, {transform_indices = @transform_12, window_bounds = array<i64: 1, 128, 128>}, {transform_indices = @transform_13, window_bounds = array<i64: 1, 1, 128>}, {transform_indices = @transform_14, window_bounds = array<i64: 1, 1, 128>}, {transform_indices = @transform_15, window_bounds = array<i64: 1, 1, 128>}, {transform_indices = @transform_16, window_bounds = array<i64: 1, 128, 512>}, {transform_indices = @transform_17, window_bounds = array<i64: 1, 1, 512>}, {transform_indices = @transform_18, window_bounds = array<i64: 1, 512, 128>}, {transform_indices = @transform_19, window_bounds = array<i64: 1, 1, 128>}, {transform_indices = @transform_20, window_bounds = array<i64: 1, 1, 128>}, {transform_indices = @transform_21, window_bounds = array<i64: 1, 1, 128>}, {pipeline_mode = #tpu.pipeline_mode<synchronous>, transform_indices = @transform_22, window_bounds = array<i64: 16, 128>}]} {
    %c0_i32 = arith.constant 0 : i32
    %0 = arith.cmpi eq, %arg0, %c0_i32 : i32
    %1 = arith.extui %0 : i1 to i32
    %c0_i32_0 = arith.constant 0 : i32
    %2 = arith.cmpi ne, %1, %c0_i32_0 : i32
    scf.if %2 {
      %c0_85 = arith.constant 0 : index
      %c0_86 = arith.constant 0 : index
      %176 = vector.load %arg1[%c0_85, %c0_86] : memref<16x128xf32, #tpu.memory_space<vmem>>, vector<16x128xf32>
      %c0_87 = arith.constant 0 : index
      %c0_88 = arith.constant 0 : index
      %177 = vector.load %arg3[%c0_87, %c0_88] : memref<1x128xf32, #tpu.memory_space<vmem>>, vector<1x128xf32>
      %c0_89 = arith.constant 0 : index
      %c0_90 = arith.constant 0 : index
      %178 = vector.load %arg4[%c0_89, %c0_90] : memref<1x128xf32, #tpu.memory_space<vmem>>, vector<1x128xf32>
      %cst_91 = arith.constant dense<0.000000e+00> : vector<16xf32>
      %179 = vector.multi_reduction <add>, %176, %cst_91 [1] : vector<16x128xf32> to vector<16xf32>
      %180 = vector.shape_cast %179 : vector<16xf32> to vector<16x1xf32>
      %cst_92 = arith.constant 1.280000e+02 : f32
      %181 = vector.broadcast %cst_92 : f32 to vector<16x1xf32>
      %182 = arith.divf %180, %181 : vector<16x1xf32>
      %183 = vector.broadcast %182 : vector<16x1xf32> to vector<16x128xf32>
      %184 = arith.subf %176, %183 : vector<16x128xf32>
      %185 = arith.mulf %184, %184 : vector<16x128xf32>
      %cst_93 = arith.constant dense<0.000000e+00> : vector<16xf32>
      %186 = vector.multi_reduction <add>, %185, %cst_93 [1] : vector<16x128xf32> to vector<16xf32>
      %187 = vector.shape_cast %186 : vector<16xf32> to vector<16x1xf32>
      %cst_94 = arith.constant 1.280000e+02 : f32
      %188 = vector.broadcast %cst_94 : f32 to vector<16x1xf32>
      %189 = arith.divf %187, %188 : vector<16x1xf32>
      %190 = vector.broadcast %182 : vector<16x1xf32> to vector<16x128xf32>
      %191 = arith.subf %176, %190 : vector<16x128xf32>
      %cst_95 = arith.constant 1.000000e-07 : f32
      %192 = vector.broadcast %cst_95 : f32 to vector<16x1xf32>
      %193 = arith.addf %189, %192 : vector<16x1xf32>
      %194 = math.rsqrt %193 : vector<16x1xf32>
      %195 = vector.broadcast %194 : vector<16x1xf32> to vector<16x128xf32>
      %196 = arith.mulf %191, %195 : vector<16x128xf32>
      %197 = vector.broadcast %177 : vector<1x128xf32> to vector<16x128xf32>
      %198 = arith.mulf %196, %197 : vector<16x128xf32>
      %199 = vector.broadcast %178 : vector<1x128xf32> to vector<16x128xf32>
      %200 = arith.addf %198, %199 : vector<16x128xf32>
      %c0_96 = arith.constant 0 : index
      %c0_97 = arith.constant 0 : index
      %201 = vector.load %arg2[%c0_96, %c0_97] : memref<16x1xf32, #tpu.memory_space<vmem>>, vector<16x1xf32>
      %202 = vector.broadcast %201 : vector<16x1xf32> to vector<16x128xf32>
      %203 = arith.mulf %200, %202 : vector<16x128xf32>
      %c0_98 = arith.constant 0 : index
      %c0_99 = arith.constant 0 : index
      %204 = vector.load %arg24[%c0_98, %c0_99] : memref<16x128xf32, #tpu.memory_space<vmem>>, vector<16x128xf32>
      tpu.vector_store %arg24[%c0_98, %c0_99], %203 {strides = array<i32>} : memref<16x128xf32, #tpu.memory_space<vmem>>, vector<16x128xf32>,
    } else {
    }
    %c0 = arith.constant 0 : index
    %c0_1 = arith.constant 0 : index
    %3 = vector.load %arg24[%c0, %c0_1] : memref<16x128xf32, #tpu.memory_space<vmem>>, vector<16x128xf32>
    %4 = arith.truncf %3 : vector<16x128xf32> to vector<16x128xbf16>
    %c0_2 = arith.constant 0 : index
    %c0_3 = arith.constant 0 : index
    %c0_4 = arith.constant 0 : index
    %5 = vector.load %arg9[%c0_2, %c0_3, %c0_4] : memref<1x128x384xbf16, #tpu.memory_space<vmem>>, vector<1x128x384xbf16>
    %6 = vector.shape_cast %5 : vector<1x128x384xbf16> to vector<128x384xbf16>
    %cst = arith.constant dense<0.000000e+00> : vector<16x384xf32>
    %7 = tpu.matmul %4, %6, %cst {dimension_numbers = #tpu.dot_dimension_numbers<[1], [0], [0], [1], [0, 0, 1, 1], [], []>} : vector<16x128xbf16>, vector<128x384xbf16>, vector<16x384xf32> -> vector<16x384xf32>
    %c0_5 = arith.constant 0 : index
    %c0_6 = arith.constant 0 : index
    %c0_7 = arith.constant 0 : index
    %8 = vector.load %arg10[%c0_5, %c0_6, %c0_7] : memref<1x1x384xf32, #tpu.memory_space<vmem>>, vector<1x1x384xf32>
    %9 = vector.shape_cast %8 : vector<1x1x384xf32> to vector<1x384xf32>
    %10 = vector.broadcast %9 : vector<1x384xf32> to vector<16x384xf32>
    %11 = arith.addf %7, %10 : vector<16x384xf32>
    %c0_8 = arith.constant 0 : index
    %c0_9 = arith.constant 0 : index
    %12 = vector.load %arg8[%c0_8, %c0_9] : memref<16x128xbf16, #tpu.memory_space<vmem>>, vector<16x128xbf16>
    %c0_10 = arith.constant 0 : index
    %c0_11 = arith.constant 0 : index
    %c0_12 = arith.constant 0 : index
    %13 = vector.load %arg11[%c0_10, %c0_11, %c0_12] : memref<1x128x256xbf16, #tpu.memory_space<vmem>>, vector<1x128x256xbf16>
    %14 = vector.shape_cast %13 : vector<1x128x256xbf16> to vector<128x256xbf16>
    %cst_13 = arith.constant dense<0.000000e+00> : vector<16x256xf32>
    %15 = tpu.matmul %12, %14, %cst_13 {dimension_numbers = #tpu.dot_dimension_numbers<[1], [0], [0], [1], [0, 0, 1, 1], [], []>} : vector<16x128xbf16>, vector<128x256xbf16>, vector<16x256xf32> -> vector<16x256xf32>
    %c0_14 = arith.constant 0 : index
    %c0_15 = arith.constant 0 : index
    %c0_16 = arith.constant 0 : index
    %16 = vector.load %arg12[%c0_14, %c0_15, %c0_16] : memref<1x1x256xf32, #tpu.memory_space<vmem>>, vector<1x1x256xf32>
    %17 = vector.shape_cast %16 : vector<1x1x256xf32> to vector<1x256xf32>
    %18 = vector.broadcast %17 : vector<1x256xf32> to vector<16x256xf32>
    %19 = arith.addf %15, %18 : vector<16x256xf32>
    %20 = vector.extract_strided_slice %11 {offsets = [0, 0], sizes = [16, 128], strides = [1, 1]} : vector<16x384xf32> to vector<16x128xf32>
    %21 = vector.shape_cast %20 : vector<16x128xf32> to vector<2x8x4x32xf32>
    %22 = tpu.transpose %21, [0, 2, 1, 3] : vector<2x8x4x32xf32> -> vector<2x4x8x32xf32>
    %23 = vector.shape_cast %22 : vector<2x4x8x32xf32> to vector<8x8x32xf32>
    %24 = arith.truncf %23 : vector<8x8x32xf32> to vector<8x8x32xbf16>
    %25 = vector.extract_strided_slice %11 {offsets = [0, 128], sizes = [16, 128], strides = [1, 1]} : vector<16x384xf32> to vector<16x128xf32>
    %26 = vector.shape_cast %25 : vector<16x128xf32> to vector<2x8x4x32xf32>
    %27 = tpu.transpose %26, [0, 2, 1, 3] : vector<2x8x4x32xf32> -> vector<2x4x8x32xf32>
    %28 = vector.shape_cast %27 : vector<2x4x8x32xf32> to vector<8x8x32xf32>
    %29 = arith.truncf %28 : vector<8x8x32xf32> to vector<8x8x32xbf16>
    %30 = vector.extract_strided_slice %11 {offsets = [0, 256], sizes = [16, 128], strides = [1, 1]} : vector<16x384xf32> to vector<16x128xf32>
    %31 = vector.shape_cast %30 : vector<16x128xf32> to vector<2x8x4x32xf32>
    %32 = tpu.transpose %31, [0, 2, 1, 3] : vector<2x8x4x32xf32> -> vector<2x4x8x32xf32>
    %33 = vector.shape_cast %32 : vector<2x4x8x32xf32> to vector<8x8x32xf32>
    %34 = arith.truncf %33 : vector<8x8x32xf32> to vector<8x8x32xbf16>
    %35 = vector.extract_strided_slice %19 {offsets = [0, 0], sizes = [16, 128], strides = [1, 1]} : vector<16x256xf32> to vector<16x128xf32>
    %36 = vector.shape_cast %35 : vector<16x128xf32> to vector<16x4x32xf32>
    %37 = tpu.transpose %36, [1, 0, 2] : vector<16x4x32xf32> -> vector<4x16x32xf32>
    %38 = arith.truncf %37 : vector<4x16x32xf32> to vector<4x16x32xbf16>
    %39 = vector.extract_strided_slice %19 {offsets = [0, 128], sizes = [16, 128], strides = [1, 1]} : vector<16x256xf32> to vector<16x128xf32>
    %40 = vector.shape_cast %39 : vector<16x128xf32> to vector<16x4x32xf32>
    %41 = tpu.transpose %40, [1, 0, 2] : vector<16x4x32xf32> -> vector<4x16x32xf32>
    %42 = arith.truncf %41 : vector<4x16x32xf32> to vector<4x16x32xbf16>
    %43 = vector.shape_cast %38 : vector<4x16x32xbf16> to vector<1x4x16x32xbf16>
    %44 = vector.shape_cast %43 : vector<1x4x16x32xbf16> to vector<1x4x16x32xbf16>
    %45 = vector.broadcast %44 : vector<1x4x16x32xbf16> to vector<2x4x16x32xbf16>
    %46 = vector.shape_cast %45 : vector<2x4x16x32xbf16> to vector<8x16x32xbf16>
    %47 = vector.shape_cast %42 : vector<4x16x32xbf16> to vector<1x4x16x32xbf16>
    %48 = vector.shape_cast %47 : vector<1x4x16x32xbf16> to vector<1x4x16x32xbf16>
    %49 = vector.broadcast %48 : vector<1x4x16x32xbf16> to vector<2x4x16x32xbf16>
    %50 = vector.shape_cast %49 : vector<2x4x16x32xbf16> to vector<8x16x32xbf16>
    "tpu.trace_start"() <{level = 10 : i32, message = "gqd,gkd->gqk"}> : () -> ()
    %cst_17 = arith.constant dense<0.000000e+00> : vector<8x8x8xf32>
    %51 = tpu.matmul %24, %29, %cst_17 {dimension_numbers = #tpu.dot_dimension_numbers<[2], [2], [1], [1], [0, 0, 0, 1, 1, 1], [0], [0]>} : vector<8x8x32xbf16>, vector<8x8x32xbf16>, vector<8x8x8xf32> -> vector<8x8x8xf32>
    "tpu.trace_stop"() : () -> ()
    "tpu.trace_start"() <{level = 10 : i32, message = "gqd,grd->gqr"}> : () -> ()
    %cst_18 = arith.constant dense<0.000000e+00> : vector<8x8x16xf32>
    %52 = tpu.matmul %24, %46, %cst_18 {dimension_numbers = #tpu.dot_dimension_numbers<[2], [2], [1], [1], [0, 0, 0, 1, 1, 1], [0], [0]>} : vector<8x8x32xbf16>, vector<8x16x32xbf16>, vector<8x8x16xf32> -> vector<8x8x16xf32>
    "tpu.trace_stop"() : () -> ()
    "tpu.trace_start"() <{level = 10 : i32, message = "gkd,grd->gkr"}> : () -> ()
    %cst_19 = arith.constant dense<0.000000e+00> : vector<8x8x16xf32>
    %53 = tpu.matmul %29, %50, %cst_19 {dimension_numbers = #tpu.dot_dimension_numbers<[2], [2], [1], [1], [0, 0, 0, 1, 1, 1], [0], [0]>} : vector<8x8x32xbf16>, vector<8x16x32xbf16>, vector<8x8x16xf32> -> vector<8x8x16xf32>
    "tpu.trace_stop"() : () -> ()
    %54 = arith.truncf %52 : vector<8x8x16xf32> to vector<8x8x16xbf16>
    %c0_20 = arith.constant 0 : index
    %c0_21 = arith.constant 0 : index
    %c0_22 = arith.constant 0 : index
    %55 = vector.load %arg6[%c0_20, %c0_21, %c0_22] : memref<8x8x16xbf16, #tpu.memory_space<vmem>>, vector<8x8x16xbf16>
    "tpu.trace_start"() <{level = 10 : i32, message = "gqr,qkr->gqk"}> : () -> ()
    %cst_23 = arith.constant dense<0.000000e+00> : vector<8x8x8xf32>
    %56 = tpu.matmul %55, %54, %cst_23 {dimension_numbers = #tpu.dot_dimension_numbers<[2], [2], [1], [0], [0, 0, 0, 1, 1, 0], [0], [1]>} : vector<8x8x16xbf16>, vector<8x8x16xbf16>, vector<8x8x8xf32> -> vector<8x8x8xf32>
    %57 = tpu.transpose %56, [2, 0, 1] : vector<8x8x8xf32> -> vector<8x8x8xf32>
    "tpu.trace_stop"() : () -> ()
    %58 = arith.truncf %53 : vector<8x8x16xf32> to vector<8x8x16xbf16>
    %c0_24 = arith.constant 0 : index
    %c0_25 = arith.constant 0 : index
    %c0_26 = arith.constant 0 : index
    %59 = vector.load %arg7[%c0_24, %c0_25, %c0_26] : memref<8x8x16xbf16, #tpu.memory_space<vmem>>, vector<8x8x16xbf16>
    "tpu.trace_start"() <{level = 10 : i32, message = "gkr,kqr->gkq"}> : () -> ()
    %cst_27 = arith.constant dense<0.000000e+00> : vector<8x8x8xf32>
    %60 = tpu.matmul %59, %58, %cst_27 {dimension_numbers = #tpu.dot_dimension_numbers<[2], [2], [1], [0], [0, 0, 0, 1, 1, 0], [0], [1]>} : vector<8x8x16xbf16>, vector<8x8x16xbf16>, vector<8x8x8xf32> -> vector<8x8x8xf32>
    %61 = tpu.transpose %60, [2, 0, 1] : vector<8x8x8xf32> -> vector<8x8x8xf32>
    "tpu.trace_stop"() : () -> ()
    %62 = arith.addf %51, %57 : vector<8x8x8xf32>
    %63 = tpu.transpose %61, [0, 2, 1] : vector<8x8x8xf32> -> vector<8x8x8xf32>
    %64 = arith.addf %62, %63 : vector<8x8x8xf32>
    %c0_28 = arith.constant 0 : index
    %c0_29 = arith.constant 0 : index
    %c0_30 = arith.constant 0 : index
    %65 = vector.load %arg5[%c0_28, %c0_29, %c0_30] : memref<8x1x8xf32, #tpu.memory_space<vmem>>, vector<8x1x8xf32>
    %66 = vector.broadcast %65 : vector<8x1x8xf32> to vector<8x8x8xf32>
    %67 = arith.addf %64, %66 : vector<8x8x8xf32>
    %cst_31 = arith.constant dense<0xFF800000> : vector<8x8xf32>
    %68 = vector.multi_reduction <maximumf>, %67, %cst_31 [2] : vector<8x8x8xf32> to vector<8x8xf32>
    %69 = vector.shape_cast %68 : vector<8x8xf32> to vector<8x8x1xf32>
    %70 = vector.broadcast %69 : vector<8x8x1xf32> to vector<8x8x8xf32>
    %71 = arith.subf %67, %70 : vector<8x8x8xf32>
    %72 = math.exp %71 : vector<8x8x8xf32>
    %cst_32 = arith.constant dense<0.000000e+00> : vector<8x8xf32>
    %73 = vector.multi_reduction <add>, %72, %cst_32 [2] : vector<8x8x8xf32> to vector<8x8xf32>
    %74 = vector.shape_cast %73 : vector<8x8xf32> to vector<8x8x1xf32>
    %75 = tpu.reciprocal %74 {approx = true} : vector<8x8x1xf32> -> vector<8x8x1xf32>
    %76 = vector.broadcast %75 : vector<8x8x1xf32> to vector<8x8x8xf32>
    %77 = arith.mulf %72, %76 : vector<8x8x8xf32>
    %78 = arith.truncf %77 : vector<8x8x8xf32> to vector<8x8x8xbf16>
    "tpu.trace_start"() <{level = 10 : i32, message = "gqk,gkd->gqd"}> : () -> ()
    %cst_33 = arith.constant dense<0.000000e+00> : vector<8x8x32xf32>
    %79 = tpu.matmul %78, %34, %cst_33 {dimension_numbers = #tpu.dot_dimension_numbers<[2], [1], [1], [2], [0, 0, 0, 1, 1, 2], [0], [0]>} : vector<8x8x8xbf16>, vector<8x8x32xbf16>, vector<8x8x32xf32> -> vector<8x8x32xf32>
    "tpu.trace_stop"() : () -> ()
    %80 = vector.shape_cast %79 : vector<8x8x32xf32> to vector<2x4x8x32xf32>
    %81 = tpu.transpose %80, [0, 2, 1, 3] : vector<2x4x8x32xf32> -> vector<2x8x4x32xf32>
    %82 = vector.shape_cast %81 : vector<2x8x4x32xf32> to vector<16x128xf32>
    %83 = arith.truncf %82 : vector<16x128xf32> to vector<16x128xbf16>
    %c0_34 = arith.constant 0 : index
    %c0_35 = arith.constant 0 : index
    %c0_36 = arith.constant 0 : index
    %84 = vector.load %arg13[%c0_34, %c0_35, %c0_36] : memref<1x128x128xbf16, #tpu.memory_space<vmem>>, vector<1x128x128xbf16>
    %85 = vector.shape_cast %84 : vector<1x128x128xbf16> to vector<128x128xbf16>
    %cst_37 = arith.constant dense<0.000000e+00> : vector<16x128xf32>
    %86 = tpu.matmul %83, %85, %cst_37 {dimension_numbers = #tpu.dot_dimension_numbers<[1], [0], [0], [1], [0, 0, 1, 1], [], []>} : vector<16x128xbf16>, vector<128x128xbf16>, vector<16x128xf32> -> vector<16x128xf32>
    %c0_38 = arith.constant 0 : index
    %c0_39 = arith.constant 0 : index
    %c0_40 = arith.constant 0 : index
    %87 = vector.load %arg14[%c0_38, %c0_39, %c0_40] : memref<1x1x128xf32, #tpu.memory_space<vmem>>, vector<1x1x128xf32>
    %88 = vector.shape_cast %87 : vector<1x1x128xf32> to vector<1x128xf32>
    %89 = vector.broadcast %88 : vector<1x128xf32> to vector<16x128xf32>
    %90 = arith.addf %86, %89 : vector<16x128xf32>
    %91 = arith.addf %3, %90 : vector<16x128xf32>
    %c0_41 = arith.constant 0 : index
    %c0_42 = arith.constant 0 : index
    %c0_43 = arith.constant 0 : index
    %92 = vector.load %arg15[%c0_41, %c0_42, %c0_43] : memref<1x1x128xf32, #tpu.memory_space<vmem>>, vector<1x1x128xf32>
    %93 = vector.shape_cast %92 : vector<1x1x128xf32> to vector<1x128xf32>
    %c0_44 = arith.constant 0 : index
    %c0_45 = arith.constant 0 : index
    %c0_46 = arith.constant 0 : index
    %94 = vector.load %arg16[%c0_44, %c0_45, %c0_46] : memref<1x1x128xf32, #tpu.memory_space<vmem>>, vector<1x1x128xf32>
    %95 = vector.shape_cast %94 : vector<1x1x128xf32> to vector<1x128xf32>
    %cst_47 = arith.constant dense<0.000000e+00> : vector<16xf32>
    %96 = vector.multi_reduction <add>, %91, %cst_47 [1] : vector<16x128xf32> to vector<16xf32>
    %97 = vector.shape_cast %96 : vector<16xf32> to vector<16x1xf32>
    %cst_48 = arith.constant 1.280000e+02 : f32
    %98 = vector.broadcast %cst_48 : f32 to vector<16x1xf32>
    %99 = arith.divf %97, %98 : vector<16x1xf32>
    %100 = vector.broadcast %99 : vector<16x1xf32> to vector<16x128xf32>
    %101 = arith.subf %91, %100 : vector<16x128xf32>
    %102 = arith.mulf %101, %101 : vector<16x128xf32>
    %cst_49 = arith.constant dense<0.000000e+00> : vector<16xf32>
    %103 = vector.multi_reduction <add>, %102, %cst_49 [1] : vector<16x128xf32> to vector<16xf32>
    %104 = vector.shape_cast %103 : vector<16xf32> to vector<16x1xf32>
    %cst_50 = arith.constant 1.280000e+02 : f32
    %105 = vector.broadcast %cst_50 : f32 to vector<16x1xf32>
    %106 = arith.divf %104, %105 : vector<16x1xf32>
    %107 = vector.broadcast %99 : vector<16x1xf32> to vector<16x128xf32>
    %108 = arith.subf %91, %107 : vector<16x128xf32>
    %cst_51 = arith.constant 1.000000e-07 : f32
    %109 = vector.broadcast %cst_51 : f32 to vector<16x1xf32>
    %110 = arith.addf %106, %109 : vector<16x1xf32>
    %111 = math.rsqrt %110 : vector<16x1xf32>
    %112 = vector.broadcast %111 : vector<16x1xf32> to vector<16x128xf32>
    %113 = arith.mulf %108, %112 : vector<16x128xf32>
    %114 = vector.broadcast %93 : vector<1x128xf32> to vector<16x128xf32>
    %115 = arith.mulf %113, %114 : vector<16x128xf32>
    %116 = vector.broadcast %95 : vector<1x128xf32> to vector<16x128xf32>
    %117 = arith.addf %115, %116 : vector<16x128xf32>
    %118 = arith.truncf %117 : vector<16x128xf32> to vector<16x128xbf16>
    %c0_52 = arith.constant 0 : index
    %c0_53 = arith.constant 0 : index
    %c0_54 = arith.constant 0 : index
    %119 = vector.load %arg17[%c0_52, %c0_53, %c0_54] : memref<1x128x512xbf16, #tpu.memory_space<vmem>>, vector<1x128x512xbf16>
    %120 = vector.shape_cast %119 : vector<1x128x512xbf16> to vector<128x512xbf16>
    %cst_55 = arith.constant dense<0.000000e+00> : vector<16x512xf32>
    %121 = tpu.matmul %118, %120, %cst_55 {dimension_numbers = #tpu.dot_dimension_numbers<[1], [0], [0], [1], [0, 0, 1, 1], [], []>} : vector<16x128xbf16>, vector<128x512xbf16>, vector<16x512xf32> -> vector<16x512xf32>
    %c0_56 = arith.constant 0 : index
    %c0_57 = arith.constant 0 : index
    %c0_58 = arith.constant 0 : index
    %122 = vector.load %arg18[%c0_56, %c0_57, %c0_58] : memref<1x1x512xf32, #tpu.memory_space<vmem>>, vector<1x1x512xf32>
    %123 = vector.shape_cast %122 : vector<1x1x512xf32> to vector<1x512xf32>
    %124 = vector.broadcast %123 : vector<1x512xf32> to vector<16x512xf32>
    %125 = arith.addf %121, %124 : vector<16x512xf32>
    %126 = arith.mulf %125, %125 : vector<16x512xf32>
    %127 = arith.mulf %125, %126 : vector<16x512xf32>
    %cst_59 = arith.constant 4.471500e-02 : f32
    %128 = vector.broadcast %cst_59 : f32 to vector<16x512xf32>
    %129 = arith.mulf %128, %127 : vector<16x512xf32>
    %130 = arith.addf %125, %129 : vector<16x512xf32>
    %cst_60 = arith.constant 0.797884583 : f32
    %131 = vector.broadcast %cst_60 : f32 to vector<16x512xf32>
    %132 = arith.mulf %131, %130 : vector<16x512xf32>
    %133 = math.tanh %132 : vector<16x512xf32>
    %cst_61 = arith.constant 1.000000e+00 : f32
    %134 = vector.broadcast %cst_61 : f32 to vector<16x512xf32>
    %135 = arith.addf %134, %133 : vector<16x512xf32>
    %cst_62 = arith.constant 5.000000e-01 : f32
    %136 = vector.broadcast %cst_62 : f32 to vector<16x512xf32>
    %137 = arith.mulf %136, %135 : vector<16x512xf32>
    %138 = arith.mulf %125, %137 : vector<16x512xf32>
    %139 = arith.truncf %138 : vector<16x512xf32> to vector<16x512xbf16>
    %c0_63 = arith.constant 0 : index
    %c0_64 = arith.constant 0 : index
    %c0_65 = arith.constant 0 : index
    %140 = vector.load %arg19[%c0_63, %c0_64, %c0_65] : memref<1x512x128xbf16, #tpu.memory_space<vmem>>, vector<1x512x128xbf16>
    %141 = vector.shape_cast %140 : vector<1x512x128xbf16> to vector<512x128xbf16>
    %cst_66 = arith.constant dense<0.000000e+00> : vector<16x128xf32>
    %142 = tpu.matmul %139, %141, %cst_66 {dimension_numbers = #tpu.dot_dimension_numbers<[1], [0], [0], [1], [0, 0, 1, 1], [], []>} : vector<16x512xbf16>, vector<512x128xbf16>, vector<16x128xf32> -> vector<16x128xf32>
    %c0_67 = arith.constant 0 : index
    %c0_68 = arith.constant 0 : index
    %c0_69 = arith.constant 0 : index
    %143 = vector.load %arg20[%c0_67, %c0_68, %c0_69] : memref<1x1x128xf32, #tpu.memory_space<vmem>>, vector<1x1x128xf32>
    %144 = vector.shape_cast %143 : vector<1x1x128xf32> to vector<1x128xf32>
    %145 = vector.broadcast %144 : vector<1x128xf32> to vector<16x128xf32>
    %146 = arith.addf %142, %145 : vector<16x128xf32>
    %147 = arith.addf %117, %146 : vector<16x128xf32>
    %c0_70 = arith.constant 0 : index
    %c0_71 = arith.constant 0 : index
    %c0_72 = arith.constant 0 : index
    %148 = vector.load %arg21[%c0_70, %c0_71, %c0_72] : memref<1x1x128xf32, #tpu.memory_space<vmem>>, vector<1x1x128xf32>
    %149 = vector.shape_cast %148 : vector<1x1x128xf32> to vector<1x128xf32>
    %c0_73 = arith.constant 0 : index
    %c0_74 = arith.constant 0 : index
    %c0_75 = arith.constant 0 : index
    %150 = vector.load %arg22[%c0_73, %c0_74, %c0_75] : memref<1x1x128xf32, #tpu.memory_space<vmem>>, vector<1x1x128xf32>
    %151 = vector.shape_cast %150 : vector<1x1x128xf32> to vector<1x128xf32>
    %cst_76 = arith.constant dense<0.000000e+00> : vector<16xf32>
    %152 = vector.multi_reduction <add>, %147, %cst_76 [1] : vector<16x128xf32> to vector<16xf32>
    %153 = vector.shape_cast %152 : vector<16xf32> to vector<16x1xf32>
    %cst_77 = arith.constant 1.280000e+02 : f32
    %154 = vector.broadcast %cst_77 : f32 to vector<16x1xf32>
    %155 = arith.divf %153, %154 : vector<16x1xf32>
    %156 = vector.broadcast %155 : vector<16x1xf32> to vector<16x128xf32>
    %157 = arith.subf %147, %156 : vector<16x128xf32>
    %158 = arith.mulf %157, %157 : vector<16x128xf32>
    %cst_78 = arith.constant dense<0.000000e+00> : vector<16xf32>
    %159 = vector.multi_reduction <add>, %158, %cst_78 [1] : vector<16x128xf32> to vector<16xf32>
    %160 = vector.shape_cast %159 : vector<16xf32> to vector<16x1xf32>
    %cst_79 = arith.constant 1.280000e+02 : f32
    %161 = vector.broadcast %cst_79 : f32 to vector<16x1xf32>
    %162 = arith.divf %160, %161 : vector<16x1xf32>
    %163 = vector.broadcast %155 : vector<16x1xf32> to vector<16x128xf32>
    %164 = arith.subf %147, %163 : vector<16x128xf32>
    %cst_80 = arith.constant 1.000000e-07 : f32
    %165 = vector.broadcast %cst_80 : f32 to vector<16x1xf32>
    %166 = arith.addf %162, %165 : vector<16x1xf32>
    %167 = math.rsqrt %166 : vector<16x1xf32>
    %168 = vector.broadcast %167 : vector<16x1xf32> to vector<16x128xf32>
    %169 = arith.mulf %164, %168 : vector<16x128xf32>
    %170 = vector.broadcast %149 : vector<1x128xf32> to vector<16x128xf32>
    %171 = arith.mulf %169, %170 : vector<16x128xf32>
    %172 = vector.broadcast %151 : vector<1x128xf32> to vector<16x128xf32>
    %173 = arith.addf %171, %172 : vector<16x128xf32>
    %c0_81 = arith.constant 0 : index
    %c0_82 = arith.constant 0 : index
    %174 = vector.load %arg24[%c0_81, %c0_82] : memref<16x128xf32, #tpu.memory_space<vmem>>, vector<16x128xf32>
    tpu.vector_store %arg24[%c0_81, %c0_82], %173 {strides = array<i32>} : memref<16x128xf32, #tpu.memory_space<vmem>>, vector<16x128xf32>,
    %c0_83 = arith.constant 0 : index
    %c0_84 = arith.constant 0 : index
    %175 = vector.load %arg23[%c0_83, %c0_84] : memref<16x128xf32, #tpu.memory_space<vmem>>, vector<16x128xf32>
    tpu.vector_store %arg23[%c0_83, %c0_84], %173 {strides = array<i32>} : memref<16x128xf32, #tpu.memory_space<vmem>>, vector<16x128xf32>,
    return
  }
  func.func @transform_0(%arg0: i32) -> (i32, i32) {
    %c0_i32 = arith.constant 0 : i32
    %c0_i32_0 = arith.constant 0 : i32
    %c0_i32_1 = arith.constant 0 : i32
    return %c0_i32, %c0_i32_0 : i32, i32
  }
  func.func @transform_1(%arg0: i32) -> (i32, i32) {
    %c0_i32 = arith.constant 0 : i32
    %c0_i32_0 = arith.constant 0 : i32
    %c0_i32_1 = arith.constant 0 : i32
    return %c0_i32, %c0_i32_0 : i32, i32
  }
  func.func @transform_2(%arg0: i32) -> (i32, i32) {
    %c0_i32 = arith.constant 0 : i32
    %c0_i32_0 = arith.constant 0 : i32
    %c0_i32_1 = arith.constant 0 : i32
    return %c0_i32, %c0_i32_0 : i32, i32
  }
  func.func @transform_3(%arg0: i32) -> (i32, i32) {
    %c0_i32 = arith.constant 0 : i32
    %c0_i32_0 = arith.constant 0 : i32
    %c0_i32_1 = arith.constant 0 : i32
    return %c0_i32, %c0_i32_0 : i32, i32
  }
  func.func @transform_4(%arg0: i32) -> (i32, i32, i32) {
    %c0_i32 = arith.constant 0 : i32
    %c0_i32_0 = arith.constant 0 : i32
    %c0_i32_1 = arith.constant 0 : i32
    %c0_i32_2 = arith.constant 0 : i32
    return %c0_i32, %c0_i32_0, %c0_i32_1 : i32, i32, i32
  }
  func.func @transform_5(%arg0: i32) -> (i32, i32, i32) {
    %c0_i32 = arith.constant 0 : i32
    %c0_i32_0 = arith.constant 0 : i32
    %c0_i32_1 = arith.constant 0 : i32
    %c0_i32_2 = arith.constant 0 : i32
    return %c0_i32, %c0_i32_0, %c0_i32_1 : i32, i32, i32
  }
  func.func @transform_6(%arg0: i32) -> (i32, i32, i32) {
    %c0_i32 = arith.constant 0 : i32
    %c0_i32_0 = arith.constant 0 : i32
    %c0_i32_1 = arith.constant 0 : i32
    %c0_i32_2 = arith.constant 0 : i32
    return %c0_i32, %c0_i32_0, %c0_i32_1 : i32, i32, i32
  }
  func.func @transform_7(%arg0: i32) -> (i32, i32) {
    %c0_i32 = arith.constant 0 : i32
    %c0_i32_0 = arith.constant 0 : i32
    %c0_i32_1 = arith.constant 0 : i32
    return %c0_i32, %c0_i32_0 : i32, i32
  }
  func.func @transform_8(%arg0: i32) -> (i32, i32, i32) {
    %c0_i32 = arith.constant 0 : i32
    %c0_i32_0 = arith.constant 0 : i32
    %c0_i32_1 = arith.constant 0 : i32
    return %arg0, %c0_i32, %c0_i32_0 : i32, i32, i32
  }
  func.func @transform_9(%arg0: i32) -> (i32, i32, i32) {
    %c0_i32 = arith.constant 0 : i32
    %c0_i32_0 = arith.constant 0 : i32
    %c0_i32_1 = arith.constant 0 : i32
    return %arg0, %c0_i32, %c0_i32_0 : i32, i32, i32
  }
  func.func @transform_10(%arg0: i32) -> (i32, i32, i32) {
    %c0_i32 = arith.constant 0 : i32
    %c0_i32_0 = arith.constant 0 : i32
    %c0_i32_1 = arith.constant 0 : i32
    return %arg0, %c0_i32, %c0_i32_0 : i32, i32, i32
  }
  func.func @transform_11(%arg0: i32) -> (i32, i32, i32) {
    %c0_i32 = arith.constant 0 : i32
    %c0_i32_0 = arith.constant 0 : i32
    %c0_i32_1 = arith.constant 0 : i32
    return %arg0, %c0_i32, %c0_i32_0 : i32, i32, i32
  }
  func.func @transform_12(%arg0: i32) -> (i32, i32, i32) {
    %c0_i32 = arith.constant 0 : i32
    %c0_i32_0 = arith.constant 0 : i32
    %c0_i32_1 = arith.constant 0 : i32
    return %arg0, %c0_i32, %c0_i32_0 : i32, i32, i32
  }
  func.func @transform_13(%arg0: i32) -> (i32, i32, i32) {
    %c0_i32 = arith.constant 0 : i32
    %c0_i32_0 = arith.constant 0 : i32
    %c0_i32_1 = arith.constant 0 : i32
    return %arg0, %c0_i32, %c0_i32_0 : i32, i32, i32
  }
  func.func @transform_14(%arg0: i32) -> (i32, i32, i32) {
    %c0_i32 = arith.constant 0 : i32
    %c0_i32_0 = arith.constant 0 : i32
    %c0_i32_1 = arith.constant 0 : i32
    return %arg0, %c0_i32, %c0_i32_0 : i32, i32, i32
  }
  func.func @transform_15(%arg0: i32) -> (i32, i32, i32) {
    %c0_i32 = arith.constant 0 : i32
    %c0_i32_0 = arith.constant 0 : i32
    %c0_i32_1 = arith.constant 0 : i32
    return %arg0, %c0_i32, %c0_i32_0 : i32, i32, i32
  }
  func.func @transform_16(%arg0: i32) -> (i32, i32, i32) {
    %c0_i32 = arith.constant 0 : i32
    %c0_i32_0 = arith.constant 0 : i32
    %c0_i32_1 = arith.constant 0 : i32
    return %arg0, %c0_i32, %c0_i32_0 : i32, i32, i32
  }
  func.func @transform_17(%arg0: i32) -> (i32, i32, i32) {
    %c0_i32 = arith.constant 0 : i32
    %c0_i32_0 = arith.constant 0 : i32
    %c0_i32_1 = arith.constant 0 : i32
    return %arg0, %c0_i32, %c0_i32_0 : i32, i32, i32
  }
  func.func @transform_18(%arg0: i32) -> (i32, i32, i32) {
    %c0_i32 = arith.constant 0 : i32
    %c0_i32_0 = arith.constant 0 : i32
    %c0_i32_1 = arith.constant 0 : i32
    return %arg0, %c0_i32, %c0_i32_0 : i32, i32, i32
  }
  func.func @transform_19(%arg0: i32) -> (i32, i32, i32) {
    %c0_i32 = arith.constant 0 : i32
    %c0_i32_0 = arith.constant 0 : i32
    %c0_i32_1 = arith.constant 0 : i32
    return %arg0, %c0_i32, %c0_i32_0 : i32, i32, i32
  }
  func.func @transform_20(%arg0: i32) -> (i32, i32, i32) {
    %c0_i32 = arith.constant 0 : i32
    %c0_i32_0 = arith.constant 0 : i32
    %c0_i32_1 = arith.constant 0 : i32
    return %arg0, %c0_i32, %c0_i32_0 : i32, i32, i32
  }
  func.func @transform_21(%arg0: i32) -> (i32, i32, i32) {
    %c0_i32 = arith.constant 0 : i32
    %c0_i32_0 = arith.constant 0 : i32
    %c0_i32_1 = arith.constant 0 : i32
    return %arg0, %c0_i32, %c0_i32_0 : i32, i32, i32
  }
  func.func @transform_22(%arg0: i32) -> (i32, i32) {
    %c0_i32 = arith.constant 0 : i32
    %c0_i32_0 = arith.constant 0 : i32
    %c0_i32_1 = arith.constant 0 : i32
    return %c0_i32, %c0_i32_0 : i32, i32
  }
}

</mosaic_0001>

<bundles_post_ra>
// kernel: deberta_encoder_forward.1
= control target key start
LH: loop header
LB: loop body
LE: loop exit
PB: predicated region body
PF: predicated region fallthrough
CT: control target
= control target key end

     0   :  { %s12230_s0 = inlined_call_operand.vmem [shape: f32[16,128], index: 0, kind: input, shape index: {}]   ;;  %s12231_s1 = inlined_call_operand.vmem [shape: f32[16,1], index: 1, kind: input, shape index: {}]   ;;  %s12232_s2 = inlined_call_operand.vmem [shape: f32[1,128], index: 2, kind: input, shape index: {}]   ;;  %s12233_s3 = inlined_call_operand.vmem [shape: f32[1,128], index: 3, kind: input, shape index: {}]   ;;  %s12234_s4 = inlined_call_operand.vmem [shape: f32[8,1,8], index: 4, kind: input, shape index: {}]   ;;  %s12235_s5 = inlined_call_operand.vmem [shape: bf16[8,8,16], index: 5, kind: input, shape index: {}]   ;;  %s12236_s6 = inlined_call_operand.vmem [shape: bf16[8,8,16], index: 6, kind: input, shape index: {}]   ;;  %s12237_s7 = inlined_call_operand.vmem [shape: bf16[16,128], index: 7, kind: input, shape index: {}]   ;;  %s12238_s8 = inlined_call_operand.hbm [shape: bf16[2,128,384], index: 8, kind: input, shape index: {}]   ;;  %s12239_s9 = inlined_call_operand.vmem [shape: f32[2,1,384], index: 9, kind: input, shape index: {}]   ;;  %s12240_s10 = inlined_call_operand.vmem [shape: bf16[2,128,256], index: 10, kind: input, shape index: {}]   ;;  %s12241_s11 = inlined_call_operand.vmem [shape: f32[2,1,256], index: 11, kind: input, shape index: {}]   ;;  %s12242_s12 = inlined_call_operand.hbm [shape: bf16[2,128,128], index: 12, kind: input, shape index: {}]   ;;  %s12243_s13 = inlined_call_operand.vmem [shape: f32[2,1,128], index: 13, kind: input, shape index: {}]   ;;  %s12244_s14 = inlined_call_operand.vmem [shape: f32[2,1,128], index: 14, kind: input, shape index: {}]   ;;  %s12245_s15 = inlined_call_operand.vmem [shape: f32[2,1,128], index: 15, kind: input, shape index: {}]   ;;  %s12246_s16 = inlined_call_operand.hbm [shape: bf16[2,128,512], index: 16, kind: input, shape index: {}]   ;;  %s12247_s17 = inlined_call_operand.vmem [shape: f32[2,1,512], index: 17, kind: input, shape index: {}]   ;;  %s12248_s18 = inlined_call_operand.hbm [shape: bf16[2,512,128], index: 18, kind: input, shape index: {}]   ;;  %s12249_s19 = inlined_call_operand.vmem [shape: f32[2,1,128], index: 19, kind: input, shape index: {}]   ;;  %s12250_s20 = inlined_call_operand.vmem [shape: f32[2,1,128], index: 20, kind: input, shape index: {}]   ;;  %s12251_s21 = inlined_call_operand.vmem [shape: f32[2,1,128], index: 21, kind: input, shape index: {}]   ;;  %s12252_s22 = inlined_call_operand.vmem [shape: f32[16,128], index: 22, kind: output, shape index: {}]  }
   0x1   :  { %12268 = sst [smem:[#allocation17_spill]] %s12230_s0 }
   0x2   :  { %12269 = sst [smem:[#allocation18_spill]] %s12231_s1 }
   0x3   :  { %12270 = sst [smem:[#allocation19_spill]] %s12232_s2 }
   0x4   :  { %12271 = sst [smem:[#allocation20_spill]] %s12233_s3 }
   0x5   :  { %12272 = sst [smem:[#allocation21_spill]] %s12234_s4 }
   0x6   :  { %12273 = sst [smem:[#allocation22_spill]] %s12235_s5 }
   0x7   :  { %12274 = sst [smem:[#allocation23_spill]] %s12236_s6 }
   0x8   :  { %12275 = sst [smem:[#allocation24_spill]] %s12237_s7 }
   0x9   :  { %12276 = sst [smem:[#allocation25_spill]] %s12238_s8 }
   0xa   :  { %12277 = sst [smem:[#allocation26_spill]] %s12239_s9 }
   0xb   :  { %12278 = sst [smem:[#allocation27_spill]] %s12240_s10 }
   0xc   :  { %12279 = sst [smem:[#allocation28_spill]] %s12241_s11 }
   0xd   :  { %12280 = sst [smem:[#allocation29_spill]] %s12242_s12 }
   0xe   :  { %12281 = sst [smem:[#allocation30_spill]] %s12244_s14 }
   0xf   :  { %12282 = sst [smem:[#allocation31_spill]] %s12246_s16 }
  0x10   :  { %12283 = sst [smem:[#allocation32_spill]] %s12248_s18 }
  0x11   :  { %12284 = sst [smem:[#allocation33_spill]] %s12249_s19 }
  0x12   :  { %12285 = sst [smem:[#allocation34_spill]] %s12250_s20 }
  0x13   :  { %12286 = sst [smem:[#allocation35_spill]] %s12251_s21 }
  0x14   :  { %12287 = sst [smem:[#allocation36_spill]] %s12252_s22 }
  0x15   :  { %27 = vsyncpa [#allocation4], 0 }
  0x16   :  { %29 = vsyncpa [#allocation4 + $0x1], 0 }
  0x17   :  { %30 = vsyncpa [#allocation6], 0 }
  0x18   :  { %32 = vsyncpa [#allocation6 + $0x1], 0 }
  0x19   :  { %33 = vsyncpa [#allocation9], 0 }
  0x1a   :  { %35 = vsyncpa [#allocation9 + $0x1], 0  ;;  %s10457_s3 = smov 0   ;;  %s10459_s28 = smov 0  }
  0x1b   :  { %s10461_s29 = smov 0   ;;  %s10463_s30 = smov 0  }
  0x1c LB: > { %12288 = sst [smem:[#allocation13_spill]] %s10313_s28  ;;  %s10476_s4 = sadd.s32 4294967295, %s10321_s30   ;;  %s10321_s30 = sphi %s10463_s30, %s12332_s30   ;;  %s10317_s29 = sphi %s10461_s29, %s12335_s29   ;;  %s10313_s28 = sphi %s10459_s28, %s12334_s28   ;;  %s10309_s3 = sphi %s10457_s3, %s12333_s3  }
  0x1d   : > { %12289 = sst [smem:[#allocation14_spill]] %s10317_s29  ;;  %s10479_s0 = sadd.s32 1, %s10321_s30  }
  0x1e   : > { %12290 = sst [smem:[#allocation15_spill]] %s10479_s0  ;;  %s213_s23 = ssub.s32 %s10321_s30, %s10479_s0 }
  0x1f   : > { %s216_s1 = sadd.s32 1, %s10317_s29  ;;  %p214_p0 = scmp.eq.s32.totalorder %s213_s23, 0 }
  0x20   : > { %p223_p1 = scmp.ne.s32.totalorder %s10317_s29, %s10313_s28  ;;  %p224_p2 = scmp.eq.s32.totalorder %s10321_s30, 0 }
  0x21   : > { %p229_p3 = scmp.ne.s32.totalorder %s10313_s28, %s10309_s3  ;;  %p230_p5 = scmp.eq.s32.totalorder %s10476_s4, 0 }
  0x22   : > { %s10489_s5 = scalar_select %p214_p0, %s10317_s29, %s216_s1  }
  0x23   : > { %p225_p4 = por %p224_p2, %p223_p1  ;;  %p9887_p6 = scmp.lt.s32.totalorder %s10321_s30, 2 }
  0x24   : > { %12291 = sst [smem:[#allocation16_spill]] %s10489_s5  ;;  %p10493_p7 = por %p230_p5, %p229_p3 }
  0x25   : > { %s10498_s6 = sand.u32 1, %s10317_s29   ;;  %p10500_p8 = pnand %p9887_p6, %p225_p4 }
  0x26   : > { %s12292_s24 = scalar_select %p10493_p7, 1, 0 }
  0x27   : > { %s679_s26 = sand.u32 1, %s10321_s30   ;;  %s9151_s2 = sshll.u32 %s10498_s6, 6 }
  0x28   : > { %s9372_s27 = sshll.u32 %s10321_s30, 10  ;;  %s683_s3 = scalar_lea.vmem [#allocation5], %s9151_s2 }
  0x29   : > { %s690_s23 = sshll.u32 %s683_s3, 4  ;;  %s12294_s12 = sld [smem:[#allocation29_spill]]  ;;  %s10512_s23 = int_to_ptr.vmem [resolvable:$true] %s690_s23 }
  0x2a   : > { %s10514_s29 = scalar_lea.sflag [#allocation6], %s679_s26  ;;  %p10520_p10 = pneg %p10500_p8 }
  0x2f   : > { %s10510_s0 = scalar_lea.hbm %s12294_s12, %s9372_s27  ;;  %s10164_s27 = scalar_lea.hbm %s12294_s12, 2048 }
  0x30   : > { %s10159_s22 = scalar_lea.hbm %s10510_s0, 1024  ;;  %p10165_p13 = scmp.lt.u32.totalorder %s10510_s0, %s12294_s12 }
  0x31   : > { %p10160_p9 = scmp.ne.s32.totalorder %s10510_s0, %s10159_s22  ;;  %p10166_p0 = scmp.lt.u32.totalorder %s10164_s27, %s10159_s22 }
  0x32   : > { %p10168_p2 = scmp.lt.u32.totalorder %s10159_s22, %s10510_s0 }
  0x33   : > { %p10162_p11 = pnand %p10520_p10, %p10160_p9  ;;  %p10167_p1 = por %p10166_p0, %p10165_p13 }
  0x35   : > { %p10163_p12 = pneg %p10162_p11  ;;  %p10169_p3 = por %p10168_p2, %p10167_p1 }
  0x37   : > { %p10170_p4 = pnand %p10169_p3, %p10163_p12 }
  0x39   : > { %10173 = shalt.err (!%p10170_p4)
}
  0x3a   : > { %s10174_s26 = scalar_lea.vmem %s10512_s23, 1024  ;;  %s10323_s5 = smov [#allocation5]  }
  0x3b   : > { %p10175_p5 = scmp.ne.s32.totalorder %s10512_s23, %s10174_s26  ;;  %s10179_s2 = sshll.u32 %s10323_s5, 4  ;;  %s10180_s2 = int_to_ptr.vmem [resolvable:$false] %s10179_s2 }
  0x3c   : > { %s10181_s3 = scalar_lea.vmem %s10180_s2, 2048  ;;  %p10182_p11 = scmp.lt.s32.totalorder %s10512_s23, %s10180_s2 }
  0x3d   : > { %p10177_p6 = pnand %p10175_p5, %p10520_p10  ;;  %p10183_p7 = scmp.lt.s32.totalorder %s10181_s3, %s10174_s26 }
  0x3f   : > { %p10178_p9 = pneg %p10177_p6  ;;  %p10184_p13 = por %p10183_p7, %p10182_p11 }
  0x41   : > { %p10185_p0 = pnand %p10184_p13, %p10178_p9 }
  0x43   : > { %10188 = shalt.err (!%p10185_p0)
}
  0x44   : > { %s12263_s22 = smov 64   ;;  %s12264_s27 = smov 4  }
  0x45   : > { %9880 = dma.hbm_to_vmem [thread:$0]  (!%p10500_p8), %s10510_s0, 1024, %s10512_s23, %s10514_s29, %s12263_s22, %s12263_s22, %s12264_s27  }
  0x46   : > { %p9160_p7 = scmp.ge.s32.totalorder %s10321_s30, 1  ;;  %p783_p12 = scmp.lt.s32.totalorder %s10321_s30, 3 }
  0x47   : > { %s9862_s1 = smul.u32 192, %s10498_s6  ;;  %s12297_s8 = sld [smem:[#allocation25_spill]] }
  0x48   : > { %p10550_p1 = pnand %p9160_p7, %p783_p12  ;;  %s9863_s5 = smul.u32 3072, %s10321_s30 }
  0x49   : > { %s640_s21 = scalar_lea.vmem [#allocation3], %s9862_s1  ;;  %s637_s0 = scalar_lea.sflag [#allocation4], %s10498_s6 }
  0x4a   : > { %s12296_s26 = scalar_select %p10550_p1, 1, 0 }
  0x4b   : > { %s647_s20 = sshll.u32 %s640_s21, 4  ;;  %s10560_s20 = int_to_ptr.vmem [resolvable:$true] %s647_s20 }
  0x4d   : > { %s10558_s12 = scalar_lea.hbm %s12297_s8, %s9863_s5  ;;  %s10194_s2 = scalar_lea.hbm %s12297_s8, 6144 }
  0x4e   : > { %s10189_s23 = scalar_lea.hbm %s10558_s12, 3072  ;;  %p10195_p5 = scmp.lt.u32.totalorder %s10558_s12, %s12297_s8 }
  0x4f   : > { %p10190_p2 = scmp.ne.s32.totalorder %s10558_s12, %s10189_s23  ;;  %p10196_p6 = scmp.lt.u32.totalorder %s10194_s2, %s10189_s23 }
  0x50   : > { %p10198_p11 = scmp.lt.u32.totalorder %s10189_s23, %s10558_s12 }
  0x51   : > { %p10192_p3 = pnand %p10190_p2, %p10520_p10  ;;  %p10197_p9 = por %p10196_p6, %p10195_p5 }
  0x53   : > { %p10193_p4 = pneg %p10192_p3  ;;  %p10199_p13 = por %p10198_p11, %p10197_p9 }
  0x55   : > { %p10200_p0 = pnand %p10199_p13, %p10193_p4 }
  0x57   : > { %10203 = shalt.err (!%p10200_p0)
}
  0x58   : > { %s10204_s21 = scalar_lea.vmem %s10560_s20, 3072  ;;  %s10326_s22 = smov [#allocation3]  }
  0x59   : > { %p10205_p7 = scmp.ne.s32.totalorder %s10560_s20, %s10204_s21  ;;  %s10209_s27 = sshll.u32 %s10326_s22, 4  ;;  %s10210_s27 = int_to_ptr.vmem [resolvable:$false] %s10209_s27 }
  0x5a   : > { %s10211_s1 = scalar_lea.vmem %s10210_s27, 6144  ;;  %p10212_p3 = scmp.lt.s32.totalorder %s10560_s20, %s10210_s27 }
  0x5b   : > { %p10207_p12 = pnand %p10205_p7, %p10520_p10  ;;  %p10213_p1 = scmp.lt.s32.totalorder %s10211_s1, %s10204_s21 }
  0x5d   : > { %p10208_p2 = pneg %p10207_p12  ;;  %p10214_p5 = por %p10213_p1, %p10212_p3 }
  0x5f   : > { %p10215_p6 = pnand %p10214_p5, %p10208_p2 }
  0x61   : > { %10218 = shalt.err (!%p10215_p6)
}
  0x62   : > { %s10327_s23 = smov 192   ;;  %s10328_s2 = smov 12  }
  0x63   : > { %9877 = dma.hbm_to_vmem [thread:$0]  (!%p10500_p8), %s10558_s12, 3072, %s10560_s20, %s637_s0, %s10327_s23, %s10327_s23, %s10328_s2  }
  0x64   : > { %s9154_s5 = sshll.u32 %s10498_s6, 8  ;;  %s9373_s3 = sshll.u32 %s10321_s30, 12 }
  0x65   : > { %s12298_s16 = sld [smem:[#allocation31_spill]]  ;;  %s722_s1 = scalar_lea.vmem [#allocation7], %s9154_s5 }
  0x66   : > { %s729_s8 = sshll.u32 %s722_s1, 4  ;;  %s10597_s8 = int_to_ptr.vmem [resolvable:$true] %s729_s8 }
  0x6b   : > { %s10593_s27 = scalar_lea.hbm %s12298_s16, %s9373_s3  ;;  %s10224_s0 = scalar_lea.hbm %s12298_s16, 8192 }
  0x6c   : > { %s10219_s19 = scalar_lea.hbm %s10593_s27, 4096  ;;  %p10225_p11 = scmp.lt.u32.totalorder %s10593_s27, %s12298_s16 }
  0x6d   : > { %p10220_p1 = scmp.ne.s32.totalorder %s10593_s27, %s10219_s19  ;;  %p10226_p13 = scmp.lt.u32.totalorder %s10224_s0, %s10219_s19 }
  0x6e   : > { %p10228_p7 = scmp.lt.u32.totalorder %s10219_s19, %s10593_s27 }
  0x6f   : > { %p10222_p4 = pnand %p10220_p1, %p10520_p10  ;;  %p10227_p0 = por %p10226_p13, %p10225_p11 }
  0x71   : > { %p10223_p9 = pneg %p10222_p4  ;;  %p10229_p12 = por %p10228_p7, %p10227_p0 }
  0x73   : > { %p10230_p2 = pnand %p10229_p12, %p10223_p9 }
  0x75   : > { %10233 = shalt.err (!%p10230_p2)
}
  0x76   : > { %s10234_s21 = scalar_lea.vmem %s10597_s8, 4096  ;;  %s10329_s22 = smov [#allocation7]  }
  0x77   : > { %p10235_p3 = scmp.ne.s32.totalorder %s10597_s8, %s10234_s21  ;;  %s10239_s1 = sshll.u32 %s10329_s22, 4  ;;  %s10240_s1 = int_to_ptr.vmem [resolvable:$false] %s10239_s1 }
  0x78   : > { %s10241_s12 = scalar_lea.vmem %s10240_s1, 8192  ;;  %p10242_p1 = scmp.lt.s32.totalorder %s10597_s8, %s10240_s1 }
  0x79   : > { %p10237_p5 = pnand %p10235_p3, %p10520_p10  ;;  %p10243_p4 = scmp.lt.s32.totalorder %s10241_s12, %s10234_s21 }
  0x7b   : > { %p10238_p6 = pneg %p10237_p5  ;;  %p10244_p11 = por %p10243_p4, %p10242_p1 }
  0x7d   : > { %p10245_p13 = pnand %p10244_p11, %p10238_p6 }
  0x7f   : > { %10248 = shalt.err (!%p10245_p13)
}
  0x80   : > { %s10330_s19 = smov 256   ;;  %s10331_s20 = smov 16  }
  0x81   : > { %9883 = dma.hbm_to_vmem [thread:$0]  (!%p10500_p8), %s10593_s27, 4096, %s10597_s8, %s10514_s29, %s10330_s19, %s10330_s19, %s10331_s20  }
  0x82   : > { %s12299_s18 = sld [smem:[#allocation32_spill]]  ;;  %s750_s21 = scalar_lea.vmem [#allocation8], %s9154_s5 }
  0x83   : > { %s757_s22 = sshll.u32 %s750_s21, 4  ;;  %s747_s1 = scalar_lea.sflag [#allocation9], %s10498_s6  ;;  %s10630_s22 = int_to_ptr.vmem [resolvable:$true] %s757_s22 }
  0x88   : > { %s10626_s2 = scalar_lea.hbm %s12299_s18, %s9373_s3  ;;  %s10254_s30 = scalar_lea.hbm %s12299_s18, 8192 }
  0x89   : > { %s10249_s12 = scalar_lea.hbm %s10626_s2, 4096  ;;  %p10255_p12 = scmp.lt.u32.totalorder %s10626_s2, %s12299_s18 }
  0x8a   : > { %p10250_p9 = scmp.ne.s32.totalorder %s10626_s2, %s10249_s12  ;;  %p10256_p2 = scmp.lt.u32.totalorder %s10254_s30, %s10249_s12 }
  0x8b   : > { %p10258_p5 = scmp.lt.u32.totalorder %s10249_s12, %s10626_s2 }
  0x8c   : > { %p10252_p0 = pnand %p10250_p9, %p10520_p10  ;;  %p10257_p3 = por %p10256_p2, %p10255_p12 }
  0x8e   : > { %p10253_p7 = pneg %p10252_p0  ;;  %p10259_p6 = por %p10258_p5, %p10257_p3 }
  0x90   : > { %p10260_p1 = pnand %p10259_p6, %p10253_p7 }
  0x92   : > { %10263 = shalt.err (!%p10260_p1)
}
  0x93   : > { %s10264_s5 = scalar_lea.vmem %s10630_s22, 4096  ;;  %s10332_s19 = smov [#allocation8]  }
  0x94   : > { %p10265_p4 = scmp.ne.s32.totalorder %s10630_s22, %s10264_s5  ;;  %s10269_s20 = sshll.u32 %s10332_s19, 4  ;;  %s10270_s20 = int_to_ptr.vmem [resolvable:$false] %s10269_s20 }
  0x95   : > { %s10271_s0 = scalar_lea.vmem %s10270_s20, 8192  ;;  %p10272_p9 = scmp.lt.s32.totalorder %s10630_s22, %s10270_s20 }
  0x96   : > { %p10267_p11 = pnand %p10265_p4, %p10520_p10  ;;  %p10273_p0 = scmp.lt.s32.totalorder %s10271_s0, %s10264_s5 }
  0x98   : > { %p10268_p13 = pneg %p10267_p11  ;;  %p10274_p12 = por %p10273_p0, %p10272_p9 }
  0x9a   : > { %p10275_p2 = pnand %p10274_p12, %p10268_p13 }
  0x9c   : > { %10278 = shalt.err (!%p10275_p2)
}
  0x9d   : > { %s12300_s23 = smov 4   ;;  %s12301_s21 = smov 64  }
  0x9e   : > { %9886 = dma.hbm_to_vmem [thread:$0]  (!%p10500_p8), %s10626_s2, 4096, %s10630_s22, %s747_s1, %s12301_s21, %s12301_s21, %s12300_s23  }
  0x9f   : > { %p12302_p10 = scmp.ne.s32.totalorder %s12296_s26, 0 }
  0xa0   : > { %s789_s7 = sand.u32 (!%p12302_p10), 1, %s10313_s28   ;;  %p12303_p7 = scmp.ne.s32.totalorder (!%p12302_p10), %s12292_s24, 0 }
  0xa1   : > { %787 = sbr.rel (%p12302_p10) target bundleno = 4147 (0x1033), region = 108  ;;  %s790_s8 = scalar_lea.sflag (!%p12302_p10), [#allocation4], %s789_s7 }
  0xa2   : > { %s9864_s12 = smul.u32 (!%p12302_p10), 192, %s789_s7 }
  0xa4   : > { %s10662_s29 = scalar_lea.vmem (!%p12302_p10), [#allocation3], %s9864_s12 }
  0xa8   : > { %10296 = dma.done.wait (%p12303_p7), %s790_s8, 3072  }
  0xa9   : > { %10298 = vsyncadd (%p12303_p7), %s790_s8, 4294964224  ;;  %s798_s6 = sand.u32 1, %s10476_s4   ;;  %s9161_s25 = sshll.u32 %s789_s7, 6 }
  0xaa   : > { %s799_s2 = scalar_lea.sflag [#allocation6], %s798_s6  ;;  %s10669_s22 = scalar_lea.vmem [#allocation5], %s9161_s25 }
  0xab   : > { %10300 = dma.done.wait (%p12303_p7), %s799_s2, 5120  }
  0xac   : > { %10302 = vsyncadd (%p12303_p7), %s799_s2, 4294962176  ;;  %s9162_s26 = sshll.u32 %s789_s7, 8  ;;  %s817_s30 = scalar_lea.sflag [#allocation9], %s789_s7 }
  0xad   : > { %s10675_s1 = scalar_lea.vmem [#allocation7], %s9162_s26  ;;  %s10677_s3 = scalar_lea.vmem [#allocation8], %s9162_s26 }
  0xae   : > { %10304 = dma.done.wait (%p12303_p7), %s817_s30, 4096  }
  0xaf   : > { %10306 = vsyncadd (%p12303_p7), %s817_s30, 4294963200  ;;  %p926_p8 = scmp.lt.s32.totalorder %s10476_s4, 1  ;;  %s12304_s10 = sld [smem:[#allocation27_spill]] }
  0xb0   : > { %s12305_s9 = sld [smem:[#allocation26_spill]]  ;;  %s12306_s11 = sld [smem:[#allocation28_spill]] }
  0xb1   : > { %s10685_s27 = scalar_select %p926_p8, %s10476_s4, 1 }
  0xb2   : > { %s12308_s6 = sld [smem:[#allocation33_spill]]  ;;  %s12309_s30 = sld [smem:[#allocation34_spill]] }
  0xb3   : > { %s9865_s5 = smul.u32 3, %s10685_s27  ;;  %s9375_s19 = sshll.u32 %s10685_s27, 7 }
  0xb4   : > { %s9166_s23 = sshll.u32 %s10685_s27, 1  ;;  %s9167_s21 = sshll.u32 %s10685_s27, 2 }
  0xb5   : > { %s10692_s0 = scalar_lea.vmem %s12304_s10, %s9375_s19  ;;  %s947_s10 = scalar_lea.vmem %s12245_s15, %s10685_s27 }
  0xb6   : > { %s10698_s12 = scalar_lea.vmem %s12305_s9, %s9865_s5  ;;  %s10703_s25 = scalar_lea.vmem %s12306_s11, %s9166_s23 }
  0xb7   : > { %s10721_s9 = scalar_lea.vmem %s12247_s17, %s9167_s21  ;;  %s12310_s19 = sld [smem:[#allocation35_spill]] }
  0xb8   : > { %s954_s11 = scalar_lea.vmem %s12308_s6, %s10685_s27  ;;  %s957_s28 = scalar_lea.vmem %s12309_s30, %s10685_s27 }
  0xb9   : > { %p9168_p3 = scmp.ne.s32.totalorder %s10476_s4, 0 }
  0xba   : > { %s12311_s5 = sld [smem:[#allocation17_spill]] (!%p9168_p3)  ;;  %s12312_s30 = sld [smem:[#allocation18_spill]] (!%p9168_p3)  ;;  %v10333_v3 = vmov (!%p9168_p3), 0  }
  0xbb   : > { %965 = sbr.rel (%p9168_p3) target bundleno = 511 (0x1ff), region = 128  ;;  %9935 = vset.pattern.permute.xlu0 (!%p9168_p3), %v10333_v3  ;;  %9936 = vset.pattern.permute.xlu1 (!%p9168_p3), %v10333_v3  ;;  %s12314_s16 = sld [smem:[#allocation19_spill]] (!%p9168_p3) }
  0xbc   : > { %s12315_s24 = sld [smem:[#allocation20_spill]] (!%p9168_p3) }
  0xbd   : > { %s960_s14 = scalar_lea.vmem %s12310_s19, %s10685_s27 }
  0xc0   : > { %v966_v0 = vld [vmem:[%s12311_s5] sm:$0xff] (!%p9168_p3)  ;;  %v967_v1 = vld [vmem:[%s12311_s5 + $0x8] sm:$0xff] (!%p9168_p3)  ;;  %s12313_s6 = smov (!%p9168_p3), %s12312_s30 }
  0xc1   : > { %970 = vadd.xlane.f32.xlu0 (!%p9168_p3), %v966_v0  ;;  %v1009_v2 = vld [vmem:[%s12312_s30] sm:$0xff] (!%p9168_p3)  ;;  %v1010_v12 = vld [vmem:[%s12313_s6 + $0x8] sm:$0xff] (!%p9168_p3) }
  0xc2   : > { %v9169_v20 = vld [vmem:[%s12314_s16] ss:$0 sm:$0xff] }
  0xc3   : > { %v9170_v22 = vld [vmem:[%s12315_s24] ss:$0 sm:$0xff] }
  0xc5   : > { %972 = vadd.xlane.f32.xlu0 %v967_v1 }
  0xdb   : > { %1013 = vperm.xlu0 %9935, %v1009_v2  }
 0x14e   : > { %v971_v4 = vpop.xlane.xlu0 %970 }
 0x14f   : > { %v975_v5 = vmul.f32 0.0078125, %v971_v4 }
 0x151   : > { %v977_v6 = vsub.f32 %v966_v0, %v975_v5 }
 0x152   : > { %v973_v7 = vpop.xlane.xlu0 %972 }
 0x153   : > { %v976_v8 = vmul.f32 0.0078125, %v973_v7  ;;  %v979_v9 = vmul.f32 %v977_v6, %v977_v6 }
 0x155   : > { %v978_v10 = vsub.f32 %v967_v1, %v976_v8  ;;  %981 = vadd.xlane.f32.xlu1 %v979_v9 }
 0x157   : > { %v980_v11 = vmul.f32 %v978_v10, %v978_v10 }
 0x159   : > { %983 = vadd.xlane.f32.xlu1 %v980_v11 }
 0x15a   : > { %v1014_v25 = vpop.permute.xlu0 %1013 }
 0x16a   : > { %1018 = vperm.xlu1 %9936, %v1010_v12  }
 0x1e2   : > { %v982_v13 = vpop.xlane.xlu1 %981 }
 0x1e3   : > { %v985_v14 = vmul.f32 0.0078125, %v982_v13 }
 0x1e5   : > { %v987_v15 = vadd.f32 1e-07, %v985_v14 }
 0x1e6   : > { %v984_v16 = vpop.xlane.xlu1 %983 }
 0x1e7   : > { %9937 = vrsqrt.f32 %v987_v15  ;;  %v986_v17 = vmul.f32 0.0078125, %v984_v16 }
 0x1e9   : > { %v988_v18 = vadd.f32 1e-07, %v986_v17 }
 0x1ea   : > { %v1019_v30 = vpop.permute.xlu1 %1018 }
 0x1eb   : > { %9939 = vrsqrt.f32 %v988_v18 }
 0x1f1   : > { %v9938_v19 = vpop.eup %9937 }
 0x1f2   : > { %v991_v21 = vmul.f32 %v9938_v19, %v977_v6 }
 0x1f4   : > { %v999_v23 = vmul.f32 %v9169_v20, %v991_v21 }
 0x1f5   : > { %v9940_v24 = vpop.eup %9939 }
 0x1f6   : > { %v1007_v26 = vadd.f32 %v9170_v22, %v999_v23  ;;  %v992_v27 = vmul.f32 %v9940_v24, %v978_v10 }
 0x1f8   : > { %v1021_v28 = vmul.f32 %v1014_v25, %v1007_v26  ;;  %v1000_v29 = vmul.f32 %v9169_v20, %v992_v27 }
 0x1fa   : > { %1023 = vst [vmem:[#allocation2] sm:$0xff] %v1021_v28  ;;  %v1008_v31 = vadd.f32 %v9170_v22, %v1000_v29 }
 0x1fc   : > { %v1022_v32 = vmul.f32 %v1019_v30, %v1008_v31 }
 0x1fe   : > { %1024 = vst [vmem:[#allocation2 + $0x8] sm:$0xff] %v1022_v32 }
 0x1ff PF: > { %v9956_v33 = vld [vmem:[%s10662_s29 + $0x4] ss:$12 sps:$4 sm:$0xff]   ;;  %v9958_v34 = vld [vmem:[%s10662_s29] ss:$12 sps:$4 sm:$0xff]   ;;  %v12266_v35 = vmov 0   ;;  %s12316_s23 = sld [smem:[#allocation24_spill]]  ;;  %v1062_v13 = vlaneseq }
 0x200   : > { %1237 = vmatprep.mubr.bf16.mxu0 %v12266_v35  ;;  %1205 = vmatprep.subr.bf16.mxu0 %v9956_v33  ;;  %v9959_v36 = vld [vmem:[%s10662_s29 + $0x1c] ss:$12 sps:$4 sm:$0xff]   ;;  %v9961_v37 = vld [vmem:[%s10662_s29 + $0x18] ss:$12 sps:$4 sm:$0xff]   ;;  %v9962_v38 = vld [vmem:[%s10662_s29 + $0x34] ss:$12 sps:$4 sm:$0xff]  }
 0x201   : > { %1206 = vmatpush1.bf16.msra.mxu0 %v9958_v34  ;;  %v9964_v39 = vld [vmem:[%s10662_s29 + $0x30] ss:$12 sps:$4 sm:$0xff]   ;;  %v9965_v40 = vld [vmem:[%s10662_s29 + $0x4c] ss:$12 sps:$4 sm:$0xff]   ;;  %v9967_v41 = vld [vmem:[%s10662_s29 + $0x48] ss:$12 sps:$4 sm:$0xff]  }
 0x202   : > { %1207 = vmatprep.subr.bf16.mxu0 %v9959_v36  ;;  %v9968_v42 = vld [vmem:[%s10662_s29 + $0x64] ss:$12 sps:$4 sm:$0xff]   ;;  %v9970_v43 = vld [vmem:[%s10662_s29 + $0x60] ss:$12 sps:$4 sm:$0xff]   ;;  %v9971_v44 = vld [vmem:[%s10662_s29 + $0x7c] ss:$12 sps:$4 sm:$0xff]  }
 0x203   : > { %v9973_v45 = vld [vmem:[%s10662_s29 + $0x78] ss:$12 sps:$4 sm:$0xff]   ;;  %v9974_v46 = vld [vmem:[%s10662_s29 + $0x94] ss:$12 sps:$4 sm:$0xff]   ;;  %v9976_v47 = vld [vmem:[%s10662_s29 + $0x90] ss:$12 sps:$4 sm:$0xff]  }
 0x204   : > { %v9977_v48 = vld [vmem:[%s10662_s29 + $0xac] ss:$12 sps:$4 sm:$0xff]   ;;  %v9979_v49 = vld [vmem:[%s10662_s29 + $0xa8] ss:$12 sps:$4 sm:$0xff]   ;;  %v10335_v7 = vmov 0.0   ;;  %v10805_v15 = vshrl.u32 %v1062_v13, 7 }
 0x205   : > { %1208 = vmatpush1.bf16.msra.mxu0 %v9961_v37  ;;  %v1025_v50 = vld [vmem:[#allocation2] sm:$0xff]  ;;  %v1026_v51 = vld [vmem:[#allocation2 + $0x8] sm:$0xff]  ;;  %v9985_v55 = vld [vmem:[%s10692_s0 + $0x14] ss:$8 sps:$4 sm:$0xff]   ;;  %9534 = vmatprep.subr.bf16.mxu1 %v10335_v7  ;;  %s10338_s8 = smov 32   ;;  %vm10339_vm0 = vmmov 0  }
 0x206   : > { %1209 = vmatprep.subr.bf16.mxu0 %v9962_v38  ;;  %v9982_v52 = vld [vmem:[%s10692_s0 + $0x4] ss:$8 sps:$4 sm:$0xff]   ;;  %v9980_v53 = vld [vmem:[%s10692_s0] ss:$8 sps:$4 sm:$0xff]   ;;  %v10773_v54 = vpack.c.bf16 %v1026_v51, %v1025_v50  ;;  %v9983_v56 = vld [vmem:[%s10692_s0 + $0x10] ss:$8 sps:$4 sm:$0xff]   ;;  %9550 = vmatprep.mubr.msk.bf16.mxu1 %vm10339_vm0, %v10335_v7 }
 0x207   : > { %v9988_v57 = vld [vmem:[%s10692_s0 + $0x24] ss:$8 sps:$4 sm:$0xff]   ;;  %v9986_v58 = vld [vmem:[%s10692_s0 + $0x20] ss:$8 sps:$4 sm:$0xff]   ;;  %v9991_v59 = vld [vmem:[%s10692_s0 + $0x34] ss:$8 sps:$4 sm:$0xff]  }
 0x208   : > { %v9989_v60 = vld [vmem:[%s10692_s0 + $0x30] ss:$8 sps:$4 sm:$0xff]   ;;  %v9994_v61 = vld [vmem:[%s10692_s0 + $0x44] ss:$8 sps:$4 sm:$0xff]   ;;  %v9992_v62 = vld [vmem:[%s10692_s0 + $0x40] ss:$8 sps:$4 sm:$0xff]  }
 0x209   : > { %1210 = vmatpush1.bf16.msra.mxu0 %v9964_v39  ;;  %v9997_v63 = vld [vmem:[%s10692_s0 + $0x54] ss:$8 sps:$4 sm:$0xff]   ;;  %v9995_v0 = vld [vmem:[%s10692_s0 + $0x50] ss:$8 sps:$4 sm:$0xff]   ;;  %v10000_v1 = vld [vmem:[%s10692_s0 + $0x64] ss:$8 sps:$4 sm:$0xff]  }
 0x20a   : > { %1211 = vmatprep.subr.bf16.mxu0 %v9965_v40  ;;  %v9998_v2 = vld [vmem:[%s10692_s0 + $0x60] ss:$8 sps:$4 sm:$0xff]   ;;  %v10003_v3 = vld [vmem:[%s10692_s0 + $0x74] ss:$8 sps:$4 sm:$0xff]   ;;  %v10001_v4 = vld [vmem:[%s10692_s0 + $0x70] ss:$8 sps:$4 sm:$0xff]  }
 0x20b   : > { %v10004_v5 = vld [vmem:[%s12316_s23] sm:$0xff]   ;;  %v10006_v8 = vld [vmem:[%s10662_s29 + $0x20] ss:$12 sps:$4 sm:$0xff]   ;;  %v10007_v14 = vld [vmem:[%s10662_s29 + $0x38] ss:$12 sps:$4 sm:$0xff]   ;;  %v10811_v18 = vsub.s32 0, %v10805_v15 }
 0x20c   : > { %v10005_v6 = vld [vmem:[%s10662_s29 + $0x8] ss:$12 sps:$4 sm:$0xff]   ;;  %v10008_v16 = vld [vmem:[%s10662_s29 + $0x50] ss:$12 sps:$4 sm:$0xff]   ;;  %v10010_v25 = vld [vmem:[%s10662_s29 + $0x80] ss:$12 sps:$4 sm:$0xff]  }
 0x20d   : > { %1212 = vmatpush1.bf16.msra.mxu0 %v9967_v41  ;;  %9535 = vmatpush3.bf16.msra.mxu1 %v10005_v6  ;;  %v1307_v17 = vld [vmem:[%s10703_s25] sm:$0x3]  ;;  %v10009_v20 = vld [vmem:[%s10662_s29 + $0x68] ss:$12 sps:$4 sm:$0xff]   ;;  %s10336_s0 = smov 64   ;;  %s10337_s25 = smov 96  }
 0x20e   : > { %1213 = vmatprep.subr.bf16.mxu0 %v9968_v42  ;;  %9536 = vmatprep.subr.bf16.mxu1 %v10335_v7  ;;  %v1312_v19 = vrot.slane %v1307_v17, %v10811_v18  ;;  %v10828_v28 = vld [vmem:[%s10698_s12] sm:$0x7]  ;;  %v10011_v29 = vld [vmem:[%s10662_s29 + $0x98] ss:$12 sps:$4 sm:$0xff]   ;;  %v10860_v34 = vsub.s32 1, %v10805_v15  ;;  %vm2940_vm1 = vcmask 261120  }
 0x20f   : > { %v1065_v30 = vrot.slane %v10828_v28, %v10811_v18  ;;  %v10012_v31 = vld [vmem:[%s10662_s29 + $0xb0] ss:$12 sps:$4 sm:$0xff]   ;;  %v10340_v42 = vmov 1983009808   ;;  %vm4389_vm2 = vcmask 130048   ;;  %s12321_s30 = sld [smem:[#allocation22_spill]] }
 0x210   : > { %v1316_v36 = vrot.slane %v1307_v17, %v10860_v34  ;;  %v1069_v39 = vrot.slane %v10828_v28, %v10860_v34  ;;  %s12323_s16 = sld [smem:[#allocation23_spill]]  ;;  %s12324_s7 = sld [smem:[#allocation21_spill]]  ;;  %vm7246_vm3 = vcmask 64512   ;;  %vm7346_vm4 = vcmask 1043456  }
 0x211   : > { %1214 = vmatpush1.bf16.msra.mxu0 %v9970_v43  ;;  %9537 = vmatpush3.bf16.msra.mxu1 %v10006_v8  ;;  %v1471_v43 = vunpack.c.l.s4 %v10340_v42  ;;  %vm8010_vm5 = vcmask 523264   ;;  %vm8013_vm6 = vcmask 785408  }
 0x212   : > { %1215 = vmatprep.subr.bf16.mxu0 %v9971_v44  ;;  %9538 = vmatprep.subr.bf16.mxu1 %v10335_v7 }
 0x215   : > { %1216 = vmatpush1.bf16.msra.mxu0 %v9973_v45  ;;  %9539 = vmatpush3.bf16.msra.mxu1 %v10007_v14  ;;  %s12322_s4 = smov %s12321_s30 }
 0x216   : > { %1217 = vmatprep.subr.bf16.mxu0 %v9974_v46  ;;  %9540 = vmatprep.subr.bf16.mxu1 %v10335_v7  ;;  %v1472_v46 = vunpack.c.0.s8 %v1471_v43 }
 0x219   : > { %1218 = vmatpush1.bf16.msra.mxu0 %v9976_v47  ;;  %9541 = vmatpush3.bf16.msra.mxu1 %v10008_v16 }
 0x21a   : > { %1219 = vmatprep.subr.bf16.mxu0 %v9977_v48  ;;  %9542 = vmatprep.subr.bf16.mxu1 %v10335_v7 }
 0x21d   : > { %1220 = vmatpush1.bf16.msra.mxu0 %v9979_v49  ;;  %9543 = vmatpush3.bf16.msra.mxu1 %v10009_v20  ;;  %v10341_v49 = vmov 1934713408  }
 0x21e   : > { %1405 = vmatprep.subr.bf16.mxu0 %v9982_v52  ;;  %9544 = vmatprep.subr.bf16.mxu1 %v10335_v7  ;;  %v1503_v50 = vunpack.c.l.s4 %v10341_v49  ;;  %v10908_v52 = vsub.s32 %v1472_v46, %v10805_v15 }
 0x220   : > { %1238 = vmatmul.mubr.bf16.vlgmr.msra.gmra.mrb[0].mxu0 %v10773_v54 }
 0x221   : > { %1406 = vmatpush1.bf16.msra.mxu0 %v9980_v53  ;;  %1437 = vmatprep.mubr.bf16.mxu0 %v12266_v35 }
 0x222   : > { %1407 = vmatprep.subr.bf16.mxu0 %v9985_v55  ;;  %9545 = vmatpush3.bf16.msra.mxu1 %v10010_v25 }
 0x223   : > { %9546 = vmatprep.subr.bf16.mxu1 %v10335_v7 }
 0x225   : > { %1408 = vmatpush1.bf16.msra.mxu0 %v9983_v56 }
 0x226   : > { %1409 = vmatprep.subr.bf16.mxu0 %v9988_v57  ;;  %9547 = vmatpush3.bf16.msra.mxu1 %v10011_v29  ;;  %v1504_v57 = vunpack.c.0.s8 %v1503_v50 }
 0x227   : > { %9548 = vmatprep.subr.bf16.mxu1 %v10335_v7 }
 0x229   : > { %1410 = vmatpush1.bf16.msra.mxu0 %v9986_v58 }
 0x22a   : > { %1411 = vmatprep.subr.bf16.mxu0 %v9991_v59  ;;  %9549 = vmatpush3.bf16.msra.mxu1 %v10012_v31 }
 0x22b   : > { %9554 = vmatprep.subr.bf16.mxu1 %v10335_v7 }
 0x22d   : > { %1412 = vmatpush1.bf16.msra.mxu0 %v9989_v60  ;;  %9551 = vmatmul.mubr.bf16.vlgmr.msra.gmra.mrb[0].mxu1 %v10773_v54 }
 0x22e   : > { %1413 = vmatprep.subr.bf16.mxu0 %v9994_v61  ;;  %9556 = vmatprep.mubr.msk.bf16.mxu1 %vm10339_vm0, %v10335_v7 }
 0x231   : > { %1414 = vmatpush1.bf16.msra.mxu0 %v9992_v62 }
 0x232   : > { %1415 = vmatprep.subr.bf16.mxu0 %v9997_v63 }
 0x235   : > { %1416 = vmatpush1.bf16.msra.mxu0 %v9995_v0 }
 0x236   : > { %1417 = vmatprep.subr.bf16.mxu0 %v10000_v1 }
 0x239   : > { %1418 = vmatpush1.bf16.msra.mxu0 %v9998_v2  ;;  %v10917_v2 = vsub.s32 %v1504_v57, %v10805_v15 }
 0x23a   : > { %1419 = vmatprep.subr.bf16.mxu0 %v10003_v3 }
 0x23d   : > { %1420 = vmatpush1.bf16.msra.mxu0 %v10001_v4 }
 0x23e   : > { %9602 = vmatprep.subr.bf16.mxu0 %v10335_v7 }
 0x240   : > { %1438 = vmatmul.mubr.bf16.vlgmr.msra.gmra.mrb[4].mxu0 %v10004_v5 }
 0x241   : > { %9604 = vmatprep.mubr.msk.bf16.mxu0 %vm10339_vm0, %v10335_v7 }
 0x2f3   : > { %v1239_v9 = vpop.f32.mrb[0].mxu0 }
 0x2f4   : > { %v10800_v10 = vpop.f32.mrb[1].mxu0  ;;  %v10843_v32 = vadd.f32 %v1239_v9, %v1065_v30 }
 0x2f5   : > { %v1243_v11 = vpop.f32.mrb[2].mxu0  ;;  %v10890_v40 = vadd.f32 %v10800_v10, %v1069_v39 }
 0x2f6   : > { %v10802_v12 = vpop.f32.mrb[3].mxu0  ;;  %v10854_v33 = vadd.f32 %v1243_v11, %v1065_v30 }
 0x2f7   : > { %v10897_v41 = vadd.f32 %v10802_v12, %v1069_v39 }
 0x313   : > { %v1439_v21 = vpop.f32.mrb[4].mxu0 }
 0x314   : > { %v10817_v22 = vadd.f32 %v1439_v21, %v1312_v19  ;;  %v1441_v23 = vpop.f32.mrb[5].mxu0 }
 0x315   : > { %v1443_v24 = vpop.f32.mrb[6].mxu0  ;;  %v10871_v37 = vadd.f32 %v1441_v23, %v1316_v36 }
 0x316   : > { %v1445_v26 = vpop.f32.mrb[7].mxu0  ;;  %2356 = vrot.lane.b32.xlu1 %v10817_v22, %s10336_s0  ;;  %2350 = vrot.lane.b32.xlu0 %v10817_v22, %s10337_s25  ;;  %v10824_v27 = vadd.f32 %v1443_v24, %v1312_v19 }
 0x317   : > { %v10873_v38 = vadd.f32 %v1445_v26, %v1316_v36 }
 0x31a   : > { %2358 = vrot.lane.b32.xlu1 %v10824_v27, %s10336_s0  ;;  %2362 = vrot.lane.b32.xlu0 %v10817_v22, %s10338_s8 }
 0x31e   : > { %2364 = vrot.lane.b32.xlu1 %v10824_v27, %s10338_s8  ;;  %2352 = vrot.lane.b32.xlu0 %v10824_v27, %s10337_s25 }
 0x322   : > { %1456 = vrot.lane.b32.xlu1 %v10843_v32, %s10336_s0  ;;  %1450 = vrot.lane.b32.xlu0 %v10843_v32, %s10337_s25 }
 0x326   : > { %1452 = vrot.lane.b32.xlu1 %v10854_v33, %s10337_s25  ;;  %1462 = vrot.lane.b32.xlu0 %v10843_v32, %s10338_s8 }
 0x32a   : > { %1464 = vrot.lane.b32.xlu1 %v10854_v33, %s10338_s8  ;;  %1458 = vrot.lane.b32.xlu0 %v10854_v33, %s10336_s0 }
 0x32e   : > { %2648 = vrot.lane.b32.xlu1 %v10873_v38, %s10337_s25  ;;  %2646 = vrot.lane.b32.xlu0 %v10871_v37, %s10337_s25 }
 0x332   : > { %2654 = vrot.lane.b32.xlu1 %v10873_v38, %s10336_s0  ;;  %2652 = vrot.lane.b32.xlu0 %v10871_v37, %s10336_s0 }
 0x336   : > { %2660 = vrot.lane.b32.xlu1 %v10873_v38, %s10338_s8  ;;  %2658 = vrot.lane.b32.xlu0 %v10871_v37, %s10338_s8 }
 0x33a   : > { %1756 = vrot.lane.b32.xlu1 %v10890_v40, %s10336_s0  ;;  %1750 = vrot.lane.b32.xlu0 %v10890_v40, %s10337_s25 }
 0x33e   : > { %1752 = vrot.lane.b32.xlu1 %v10897_v41, %s10337_s25  ;;  %1762 = vrot.lane.b32.xlu0 %v10890_v40, %s10338_s8 }
 0x342   : > { %1764 = vrot.lane.b32.xlu1 %v10897_v41, %s10338_s8  ;;  %1758 = vrot.lane.b32.xlu0 %v10897_v41, %s10336_s0 }
 0x388   : > { %v2357_v44 = vpop.permute.xlu1 %2356  ;;  %v2351_v45 = vpop.permute.xlu0 %2350 }
 0x389   : > { %v2368_v53 = vcombine.low %v10817_v22, %v2357_v44  ;;  %v2369_v58 = vcombine.high %v10817_v22, %v2357_v44 }
 0x38b   : > { %v2376_v61 = vrot.slane %v2368_v53, %v10908_v52  ;;  %v2383_v4 = vrot.slane %v2369_v58, %v10908_v52 }
 0x38c   : > { %v2359_v47 = vpop.permute.xlu1 %2358  ;;  %v2363_v48 = vpop.permute.xlu0 %2362 }
 0x38d   : > { %v2384_v51 = vcombine.low %v2351_v45, %v2363_v48  ;;  %v2385_v54 = vcombine.high %v2351_v45, %v2363_v48  ;;  %v2436_v62 = vcombine.low %v10824_v27, %v2359_v47  ;;  %v2437_v5 = vcombine.high %v10824_v27, %v2359_v47 }
 0x38f   : > { %v2392_v59 = vrot.slane %v2384_v51, %v10908_v52  ;;  %v2399_v63 = vrot.slane %v2385_v54, %v10908_v52  ;;  %v2444_v10 = vrot.slane %v2436_v62, %v10908_v52  ;;  %v2451_v22 = vrot.slane %v2437_v5, %v10908_v52 }
 0x390   : > { %v2365_v55 = vpop.permute.xlu1 %2364  ;;  %v2353_v56 = vpop.permute.xlu0 %2352 }
 0x391   : > { %v2452_v60 = vcombine.low %v2353_v56, %v2365_v55  ;;  %v2453_v3 = vcombine.high %v2353_v56, %v2365_v55  ;;  %v2400_v6 = vcombine.low %v2376_v61, %v2392_v59  ;;  %v2401_v8 = vcombine.high %v2376_v61, %v2392_v59 }
 0x392   : > { %v2416_v11 = vcombine.low %v2383_v4, %v2399_v63  ;;  %v2417_v17 = vcombine.high %v2383_v4, %v2399_v63 }
 0x393   : > { %v2460_v9 = vrot.slane %v2452_v60, %v10908_v52  ;;  %v2467_v19 = vrot.slane %v2453_v3, %v10908_v52  ;;  %v2408_v23 = vrot.slane %v2400_v6, %v10917_v2  ;;  %v2415_v24 = vrot.slane %v2401_v8, %v10917_v2 }
 0x394   : > { %v1457_v0 = vpop.permute.xlu1 %1456  ;;  %v1451_v1 = vpop.permute.xlu0 %1450  ;;  %v2424_v39 = vrot.slane %v2416_v11, %v10917_v2  ;;  %v2431_v42 = vrot.slane %v2417_v17, %v10917_v2 }
 0x395   : > { %v1468_v12 = vcombine.low %v10843_v32, %v1457_v0  ;;  %v1469_v13 = vcombine.high %v10843_v32, %v1457_v0  ;;  %v2468_v25 = vcombine.low %v2444_v10, %v2460_v9  ;;  %v2469_v26 = vcombine.high %v2444_v10, %v2460_v9 }
 0x396   : > { %v2484_v43 = vcombine.low %v2451_v22, %v2467_v19  ;;  %v2485_v44 = vcombine.high %v2451_v22, %v2467_v19  ;;  %v2504_v49 = vcombine.low %v2408_v23, %v2415_v24  ;;  %v9224_v59 = vcombine.high %v2408_v23, %v2415_v24 }
 0x397   : > { %v1476_v30 = vrot.slane %v1468_v12, %v10908_v52  ;;  %v1483_v31 = vrot.slane %v1469_v13, %v10908_v52  ;;  %v2476_v50 = vrot.slane %v2468_v25, %v10917_v2  ;;  %v2483_v51 = vrot.slane %v2469_v26, %v10917_v2 }
 0x398   : > { %v1453_v14 = vpop.permute.xlu1 %1452  ;;  %v1463_v16 = vpop.permute.xlu0 %1462  ;;  %v2520_v60 = vcombine.low %v2424_v39, %v2431_v42  ;;  %v2492_v61 = vrot.slane %v2484_v43, %v10917_v2  ;;  %v2499_v62 = vrot.slane %v2485_v44, %v10917_v2  ;;  %v9225_v4 = vcombine.high %v2424_v39, %v2431_v42 }
 0x399   : > { %v1484_v20 = vcombine.low %v1451_v1, %v1463_v16  ;;  %v1485_v21 = vcombine.high %v1451_v1, %v1463_v16  ;;  %v9226_v5 = vcombine.high %v2476_v50, %v2483_v51  ;;  %v10958_v16 = vrot.slane %v2504_v49, %v10908_v52 }
 0x39a   : > { %v2588_v13 = vcombine.low %v2492_v61, %v2499_v62  ;;  %v10961_v17 = vrot.slane %v9224_v59, %v10908_v52  ;;  %v10964_v22 = vrot.slane %v2520_v60, %v10908_v52  ;;  %v10967_v24 = vrot.slane %v9225_v4, %v10908_v52 }
 0x39b   : > { %v1492_v27 = vrot.slane %v1484_v20, %v10908_v52  ;;  %v1499_v29 = vrot.slane %v1485_v21, %v10908_v52  ;;  %v10973_v26 = vrot.slane %v9226_v5, %v10908_v52 }
 0x39c   : > { %v1465_v32 = vpop.permute.xlu1 %1464  ;;  %v1459_v36 = vpop.permute.xlu0 %1458  ;;  %v10978_v39 = vrot.slane %v2588_v13, %v10908_v52 }
 0x39d   : > { %v1500_v45 = vcombine.low %v1476_v30, %v1492_v27  ;;  %v1501_v46 = vcombine.high %v1476_v30, %v1492_v27  ;;  %v1516_v47 = vcombine.low %v1483_v31, %v1499_v29  ;;  %v1517_v48 = vcombine.high %v1483_v31, %v1499_v29 }
 0x39e   : > { %v1552_v53 = vcombine.low %v1453_v14, %v1465_v32  ;;  %v1553_v54 = vcombine.high %v1453_v14, %v1465_v32  ;;  %v1536_v55 = vcombine.low %v10854_v33, %v1459_v36  ;;  %v1537_v56 = vcombine.high %v10854_v33, %v1459_v36 }
 0x39f   : > { %v1508_v63 = vrot.slane %v1500_v45, %v10917_v2  ;;  %v1515_v0 = vrot.slane %v1501_v46, %v10917_v2  ;;  %v1524_v1 = vrot.slane %v1516_v47, %v10917_v2  ;;  %v1531_v3 = vrot.slane %v1517_v48, %v10917_v2 }
 0x3a0   : > { %v10939_v57 = vpop.permute.xlu1 %2648  ;;  %v10941_v58 = vpop.permute.xlu0 %2646  ;;  %v2572_v33 = vcombine.low %v2476_v50, %v2483_v51  ;;  %v1560_v6 = vrot.slane %v1552_v53, %v10908_v52  ;;  %v1567_v8 = vrot.slane %v1553_v54, %v10908_v52  ;;  %v1544_v9 = vrot.slane %v1536_v55, %v10908_v52 }
 0x3a1   : > { %v1551_v10 = vrot.slane %v1537_v56, %v10908_v52  ;;  %v9227_v14 = vcombine.high %v2492_v61, %v2499_v62  ;;  %v1604_v19 = vcombine.low %v1508_v63, %v1515_v0  ;;  %v9212_v20 = vcombine.high %v1508_v63, %v1515_v0 }
 0x3a2   : > { %v1620_v21 = vcombine.low %v1524_v1, %v1531_v3  ;;  %v9213_v23 = vcombine.high %v1524_v1, %v1531_v3  ;;  %v10970_v25 = vrot.slane %v2572_v33, %v10908_v52  ;;  %v1568_v27 = vcombine.low %v1544_v9, %v1560_v6 }
 0x3a3   : > { %v1569_v29 = vcombine.high %v1544_v9, %v1560_v6  ;;  %v1584_v30 = vcombine.low %v1551_v10, %v1567_v8  ;;  %v2536_v36 = vcombine.low %v10958_v16, %v10961_v17  ;;  %v10981_v42 = vrot.slane %v1604_v19, %v10908_v52 }
 0x3a4   : > { %v10953_v11 = vpop.permute.xlu1 %2654  ;;  %v10955_v12 = vpop.permute.xlu0 %2652  ;;  %v10984_v43 = vrot.slane %v9212_v20, %v10908_v52  ;;  %v10987_v44 = vrot.slane %v1620_v21, %v10908_v52  ;;  %v1585_v45 = vcombine.high %v1551_v10, %v1567_v8  ;;  %v10990_v46 = vrot.slane %v9213_v23, %v10908_v52 }
 0x3a5   : > { %v2552_v47 = vcombine.low %v10964_v22, %v10967_v24  ;;  %v10995_v48 = vrot.slane %v9227_v14, %v10908_v52  ;;  %v2604_v49 = vcombine.low %v10970_v25, %v10973_v26  ;;  %v11000_v50 = vrot.slane %v1568_v27, %v10917_v2 }
 0x3a6   : > { %v11003_v51 = vrot.slane %v1569_v29, %v10917_v2  ;;  %v11006_v53 = vrot.slane %v1584_v30, %v10917_v2  ;;  %v2544_v56 = vrot.slane %v2536_v36, %v10917_v2  ;;  %v1636_v62 = vcombine.low %v10981_v42, %v10984_v43 }
 0x3a7   : > { %v2560_v59 = vrot.slane %v2552_v47, %v10917_v2  ;;  %v2612_v60 = vrot.slane %v2604_v49, %v10917_v2  ;;  %v2620_v61 = vcombine.low %v10978_v39, %v10995_v48  ;;  %v1637_v63 = vcombine.high %v10981_v42, %v10984_v43 }
 0x3a8   : > { %v2661_v31 = vpop.permute.xlu1 %2660  ;;  %v2659_v32 = vpop.permute.xlu0 %2658  ;;  %v11022_v0 = vrot.slane %v1585_v45, %v10917_v2  ;;  %v1652_v3 = vcombine.low %v10987_v44, %v10990_v46  ;;  %v1653_v4 = vcombine.high %v10987_v44, %v10990_v46  ;;  %v2732_v6 = vcombine.low %v10873_v38, %v10953_v11 }
 0x3a9   : > { %v2748_v1 = vcombine.low %v10939_v57, %v2661_v31  ;;  %v2628_v33 = vrot.slane %v2620_v61, %v10917_v2  ;;  %v2749_v5 = vcombine.high %v10939_v57, %v2661_v31  ;;  %v2733_v8 = vcombine.high %v10873_v38, %v10953_v11 }
 0x3aa   : > { %v2664_v9 = vcombine.low %v10871_v37, %v10955_v12  ;;  %v2665_v10 = vcombine.high %v10871_v37, %v10955_v12  ;;  %v2568_v19 = vcombine.low %v2544_v56, %v2560_v59  ;;  %v2680_v21 = vcombine.low %v10941_v58, %v2659_v32 }
 0x3ab   : > { %v2636_v20 = vcombine.low %v2612_v60, %v2628_v33  ;;  %v2681_v57 = vcombine.high %v10941_v58, %v2659_v32  ;;  %v1672_v23 = vcombine.low %v11000_v50, %v11003_v51  ;;  %v2756_v11 = vrot.slane %v2748_v1, %v10908_v52 }
 0x3ac   : > { %v11008_v54 = vpop.permute.xlu1 %1756  ;;  %v11010_v55 = vpop.permute.xlu0 %1750  ;;  %v2763_v58 = vrot.slane %v2749_v5, %v10908_v52  ;;  %v2740_v30 = vrot.slane %v2732_v6, %v10908_v52  ;;  %v2747_v31 = vrot.slane %v2733_v8, %v10908_v52  ;;  %v2672_v32 = vrot.slane %v2664_v9, %v10908_v52 }
 0x3ad   : > { %v1768_v37 = vcombine.low %v10890_v40, %v11008_v54  ;;  %v2640_v29 = vpack.c.bf16 %v2636_v20, %v2568_v19  ;;  %v2679_v36 = vrot.slane %v2665_v10, %v10908_v52  ;;  %v2688_v47 = vrot.slane %v2680_v21, %v10908_v52 }
 0x3ae   : > { %v2695_v49 = vrot.slane %v2681_v57, %v10908_v52  ;;  %v1769_v61 = vcombine.high %v10890_v40, %v11008_v54  ;;  %v2764_v5 = vcombine.low %v2740_v30, %v2756_v11  ;;  %v11069_v8 = vrot.slane %v1636_v62, %v10917_v2 }
 0x3af   : > { %v11060_v45 = vsel %vm2940_vm1, %v2640_v29, 0  ;;  %v1776_v6 = vrot.slane %v1768_v37, %v10908_v52  ;;  %v11072_v9 = vrot.slane %v1652_v3, %v10917_v2  ;;  %v2765_v19 = vcombine.high %v2740_v30, %v2756_v11 }
 0x3b0   : > { %v11039_v13 = vpop.permute.xlu1 %1752  ;;  %v1763_v14 = vpop.permute.xlu0 %1762  ;;  %9555 = vmatpush3.bf16.xpose.msra.mxu1 %v11060_v45  ;;  %v2780_v20 = vcombine.low %v2747_v31, %v2763_v58  ;;  %v2569_v21 = vcombine.high %v2544_v56, %v2560_v59  ;;  %v2637_v57 = vcombine.high %v2612_v60, %v2628_v33  ;;  %v2781_v29 = vcombine.high %v2747_v31, %v2763_v58 }
 0x3b1   : > { %9560 = vmatprep.subr.bf16.mxu1 %v10335_v7  ;;  %v1668_v40 = vcombine.low %v11069_v8, %v11072_v9  ;;  %v1784_v54 = vcombine.low %v11010_v55, %v1763_v14  ;;  %v1785_v37 = vcombine.high %v11010_v55, %v1763_v14  ;;  %v2696_v35 = vcombine.low %v2672_v32, %v2688_v47 }
 0x3b2   : > { %v2641_v3 = vpack.c.bf16 %v2637_v57, %v2569_v21  ;;  %v2697_v11 = vcombine.high %v2672_v32, %v2688_v47  ;;  %v2712_v60 = vcombine.low %v2679_v36, %v2695_v49  ;;  %v2713_v33 = vcombine.high %v2679_v36, %v2695_v49 }
 0x3b3   : > { %v11081_v30 = vpack.c.bf16 %v1668_v40, %v1668_v40  ;;  %v1792_v56 = vrot.slane %v1784_v54, %v10908_v52  ;;  %v1799_v59 = vrot.slane %v1785_v37, %v10908_v52  ;;  %v1783_v12 = vrot.slane %v1769_v61, %v10908_v52 }
 0x3b4   : > { %v1765_v1 = vpop.permute.xlu1 %1764  ;;  %v1759_v10 = vpop.permute.xlu0 %1758  ;;  %v11092_v32 = vsel %vm2940_vm1, %v2641_v3, 0  ;;  %v11096_v49 = vrot.slane %v2764_v5, %v10917_v2  ;;  %v11100_v61 = vrot.slane %v2780_v20, %v10917_v2  ;;  %v2720_v5 = vrot.slane %v2712_v60, %v10917_v2 }
 0x3b5   : > { %v1852_v62 = vcombine.low %v11039_v13, %v1765_v1  ;;  %v1836_v27 = vcombine.low %v10897_v41, %v1759_v10  ;;  %v1853_v55 = vcombine.high %v11039_v13, %v1765_v1  ;;  %v1800_v14 = vcombine.low %v1776_v6, %v1792_v56 }
 0x3b6   : > { %v1801_v38 = vcombine.high %v1776_v6, %v1792_v56  ;;  %v1837_v31 = vcombine.high %v10897_v41, %v1759_v10  ;;  %v1816_v47 = vcombine.low %v1783_v12, %v1799_v59  ;;  %v1817_v21 = vcombine.high %v1783_v12, %v1799_v59 }
 0x3b7   : > { %v1860_v58 = vrot.slane %v1852_v62, %v10908_v52  ;;  %9557 = vmatmul.mubr.msk.bf16.vlgmr.msra.gmra.mrb[4].mxu1 %vm2940_vm1, %v11081_v30  ;;  %v1844_v36 = vrot.slane %v1836_v27, %v10908_v52  ;;  %v2779_v13 = vrot.slane %v2765_v19, %v10917_v2  ;;  %v2795_v41 = vrot.slane %v2781_v29, %v10917_v2 }
 0x3b8   : > { %9561 = vmatpush3.bf16.xpose.msra.mxu1 %v11092_v32  ;;  %v2704_v1 = vrot.slane %v2696_v35, %v10917_v2  ;;  %v2711_v6 = vrot.slane %v2697_v11, %v10917_v2  ;;  %v1808_v12 = vrot.slane %v1800_v14, %v10917_v2  ;;  %v1815_v27 = vrot.slane %v1801_v38, %v10917_v2 }
 0x3b9   : > { %9562 = vmatprep.mubr.msk.bf16.mxu1 %vm10339_vm0, %v10335_v7  ;;  %v2727_v10 = vrot.slane %v2713_v33, %v10917_v2  ;;  %v1867_v19 = vrot.slane %v1853_v55, %v10908_v52  ;;  %v1851_v20 = vrot.slane %v1837_v31, %v10908_v52  ;;  %9566 = vmatprep.subr.bf16.mxu1 %v10335_v7 }
 0x3ba   : > { %v1824_v35 = vrot.slane %v1816_v47, %v10917_v2  ;;  %v1831_v57 = vrot.slane %v1817_v21, %v10917_v2  ;;  %v1868_v40 = vcombine.low %v1844_v36, %v1860_v58  ;;  %v1869_v54 = vcombine.high %v1844_v36, %v1860_v58 }
 0x3bb   : > { %v2868_v38 = vcombine.low %v11096_v49, %v2779_v13  ;;  %v9230_v37 = vcombine.high %v11096_v49, %v2779_v13  ;;  %v2884_v62 = vcombine.low %v11100_v61, %v2795_v41  ;;  %v9231_v29 = vcombine.high %v11100_v61, %v2795_v41 }
 0x3bc   : > { %v2800_v3 = vcombine.low %v2704_v1, %v2711_v6  ;;  %v9228_v11 = vcombine.high %v2704_v1, %v2711_v6  ;;  %v1904_v56 = vcombine.low %v1808_v12, %v1815_v27  ;;  %v9216_v59 = vcombine.high %v1808_v12, %v1815_v27 }
 0x3bd   : > { %v2816_v60 = vcombine.low %v2720_v5, %v2727_v10  ;;  %v9229_v33 = vcombine.high %v2720_v5, %v2727_v10  ;;  %v1884_v55 = vcombine.low %v1851_v20, %v1867_v19  ;;  %v1885_v14 = vcombine.high %v1851_v20, %v1867_v19 }
 0x3be   : > { %v1920_v31 = vcombine.low %v1824_v35, %v1831_v57  ;;  %v9217_v47 = vcombine.high %v1824_v35, %v1831_v57  ;;  %v11122_v58 = vrot.slane %v1868_v40, %v10917_v2  ;;  %v11125_v21 = vrot.slane %v1869_v54, %v10917_v2 }
 0x3bf   : > { %v1669_v36 = vcombine.high %v11069_v8, %v11072_v9  ;;  %v2537_v49 = vcombine.high %v10958_v16, %v10961_v17  ;;  %v2553_v13 = vcombine.high %v10964_v22, %v10967_v24  ;;  %v2605_v61 = vcombine.high %v10970_v25, %v10973_v26 }
 0x3c0   : > { %v11136_v41 = vrot.slane %v1904_v56, %v10908_v52  ;;  %v11139_v1 = vrot.slane %v9216_v59, %v10908_v52  ;;  %v2621_v6 = vcombine.high %v10978_v39, %v10995_v48  ;;  %v2807_v8 = vrot.slane %v2800_v3, %v10908_v52 }
 0x3c1   : > { %v11144_v9 = vpack.c.bf16 %v1669_v36, %v1669_v36  ;;  %v2551_v16 = vrot.slane %v2537_v49, %v10917_v2  ;;  %v2567_v17 = vrot.slane %v2553_v13, %v10917_v2  ;;  %v2619_v22 = vrot.slane %v2605_v61, %v10917_v2 }
 0x3c2   : > { %v11150_v24 = vrot.slane %v1920_v31, %v10908_v52  ;;  %v2635_v25 = vrot.slane %v2621_v6, %v10917_v2  ;;  %v2815_v26 = vrot.slane %v9228_v11, %v10908_v52  ;;  %v2823_v12 = vrot.slane %v2816_v60, %v10908_v52 }
 0x3c3   : > { %v11156_v39 = vrot.slane %v9217_v47, %v10908_v52  ;;  %9563 = vmatmul.mubr.msk.bf16.vlgmr.msra.gmra.mrb[8].mxu1 %vm2940_vm1, %v11144_v9  ;;  %v11164_v48 = vrot.slane %v1637_v63, %v10917_v2  ;;  %v2831_v27 = vrot.slane %v9229_v33, %v10908_v52  ;;  %v2875_v5 = vrot.slane %v2868_v38, %v10908_v52 }
 0x3c4   : > { %v2570_v10 = vcombine.low %v2551_v16, %v2567_v17  ;;  %v2638_v19 = vcombine.low %v2619_v22, %v2635_v25  ;;  %9568 = vmatprep.mubr.msk.bf16.mxu1 %vm10339_vm0, %v10335_v7  ;;  %v1667_v20 = vrot.slane %v1653_v4, %v10917_v2  ;;  %v2832_v35 = vcombine.low %v2807_v8, %v2815_v26 }
 0x3c5   : > { %v2848_v57 = vcombine.low %v2823_v12, %v2831_v27  ;;  %v2883_v42 = vrot.slane %v9230_v37, %v10908_v52  ;;  %v2891_v43 = vrot.slane %v2884_v62, %v10908_v52  ;;  %v2899_v63 = vrot.slane %v9231_v29, %v10908_v52 }
 0x3c6   : > { %v1936_v40 = vcombine.low %v11136_v41, %v11139_v1  ;;  %v1892_v54 = vrot.slane %v1884_v55, %v10917_v2  ;;  %v2642_v38 = vpack.c.bf16 %v2638_v19, %v2570_v10  ;;  %v11181_v3 = vrot.slane %v2832_v35, %v10917_v2 }
 0x3c7   : > { %v1952_v44 = vcombine.low %v11150_v24, %v11156_v39  ;;  %v11186_v46 = vrot.slane %v2848_v57, %v10917_v2  ;;  %v2900_v4 = vcombine.low %v2875_v5, %v2883_v42  ;;  %v2916_v37 = vcombine.low %v2891_v43, %v2899_v63 }
 0x3c8   : > { %v1899_v62 = vrot.slane %v1885_v14, %v10917_v2  ;;  %v11190_v29 = vsel %vm2940_vm1, %v2642_v38, 0  ;;  %v1670_v11 = vcombine.low %v11164_v48, %v1667_v20  ;;  %v2639_v56 = vcombine.high %v2619_v22, %v2635_v25 }
 0x3c9   : > { %9567 = vmatpush3.bf16.xpose.msra.mxu1 %v11190_v29  ;;  %v2864_v59 = vcombine.low %v11181_v3, %v11186_v46  ;;  %v11197_v60 = vrot.slane %v2900_v4, %v10917_v2  ;;  %v11200_v33 = vrot.slane %v2916_v37, %v10917_v2  ;;  %v2833_v55 = vcombine.high %v2807_v8, %v2815_v26 }
 0x3ca   : > { %9572 = vmatprep.subr.bf16.mxu1 %v10335_v7  ;;  %v2571_v14 = vcombine.high %v2551_v16, %v2567_v17  ;;  %v2849_v31 = vcombine.high %v2823_v12, %v2831_v27  ;;  %v2901_v47 = vcombine.high %v2875_v5, %v2883_v42  ;;  %v2917_v36 = vcombine.high %v2891_v43, %v2899_v63 }
 0x3cb   : > { %v2932_v49 = vcombine.low %v11197_v60, %v11200_v33  ;;  %v11206_v13 = vrot.slane %v1936_v40, %v10917_v2  ;;  %v11209_v61 = vrot.slane %v1952_v44, %v10917_v2  ;;  %v11212_v6 = vrot.slane %v2833_v55, %v10917_v2 }
 0x3cc   : > { %v2643_v22 = vpack.c.bf16 %v2639_v56, %v2571_v14  ;;  %v11215_v8 = vrot.slane %v2849_v31, %v10917_v2  ;;  %v11218_v16 = vrot.slane %v2901_v47, %v10917_v2  ;;  %v11221_v17 = vrot.slane %v2917_v36, %v10917_v2 }
 0x3cd   : > { %v11227_v25 = vrot.slane %v1672_v23, %v10908_v52  ;;  %v2936_v26 = vpack.c.bf16 %v2932_v49, %v2864_v59  ;;  %v12317_v12 = vcombine.high %v11000_v50, %v11003_v51  ;;  %v12318_v5 = vcombine.low %v11006_v53, %v11022_v0 }
 0x3ce   : > { %v12319_v19 = vcombine.high %v11006_v53, %v11022_v0  ;;  %v11247_v23 = vpack.c.bf16 %v1670_v11, %v1670_v11  ;;  %v1968_v50 = vcombine.low %v11206_v13, %v11209_v61  ;;  %v2866_v51 = vcombine.low %v11212_v6, %v11215_v8 }
 0x3cf   : > { %v11233_v27 = vrot.slane %v12317_v12, %v10908_v52  ;;  %v11239_v10 = vrot.slane %v12318_v5, %v10908_v52  ;;  %v3301_v57 = vsel %vm2940_vm1, %v2936_v26, 0  ;;  %v2934_v42 = vcombine.low %v11218_v16, %v11221_v17 }
 0x3d0   : > { %v11245_v35 = vrot.slane %v12319_v19, %v10908_v52  ;;  %v1972_v43 = vcombine.low %v11122_v58, %v11125_v21  ;;  %v9218_v53 = vcombine.high %v11122_v58, %v11125_v21  ;;  %v1988_v0 = vcombine.low %v1892_v54, %v1899_v62  ;;  %9569 = vmatmul.mubr.msk.bf16.vlgmr.msra.gmra.mrb[12].mxu1 %vm2940_vm1, %v11247_v23 }
 0x3d1   : > { %v11263_v63 = vsel %vm2940_vm1, %v2643_v22, 0  ;;  %9603 = vmatpush3.bf16.xpose.msra.mxu0 %v3301_v57  ;;  %v1937_v40 = vcombine.high %v11136_v41, %v11139_v1  ;;  %v1953_v38 = vcombine.high %v11150_v24, %v11156_v39  ;;  %v9219_v44 = vcombine.high %v1892_v54, %v1899_v62  ;;  %9574 = vmatprep.mubr.msk.bf16.mxu1 %vm10339_vm0, %v10335_v7 }
 0x3d2   : > { %9573 = vmatpush3.bf16.xpose.msra.mxu1 %v11263_v63  ;;  %v1704_v58 = vcombine.low %v11227_v25, %v11233_v27  ;;  %v1720_v21 = vcombine.low %v11239_v10, %v11245_v35  ;;  %v1671_v4 = vcombine.high %v11164_v48, %v1667_v20  ;;  %9614 = vmatprep.subr.bf16.mxu0 %v10335_v7 }
 0x3d3   : > { %9578 = vmatprep.subr.bf16.mxu1 %v10335_v7  ;;  %v11279_v41 = vpack.c.bf16 %v1968_v50, %v1968_v50  ;;  %v2938_v1 = vpack.c.bf16 %v2934_v42, %v2866_v51  ;;  %v1979_v24 = vrot.slane %v1972_v43, %v10908_v52  ;;  %v1987_v39 = vrot.slane %v9218_v53, %v10908_v52 }
 0x3d4   : > { %v1995_v54 = vrot.slane %v1988_v0, %v10908_v52  ;;  %v2003_v37 = vrot.slane %v9219_v44, %v10908_v52  ;;  %v11286_v62 = vrot.slane %v1937_v40, %v10917_v2  ;;  %v11289_v48 = vrot.slane %v1953_v38, %v10917_v2 }
 0x3d5   : > { %v11291_v20 = vpack.c.bf16 %v1671_v4, %v1671_v4  ;;  %v1712_v11 = vrot.slane %v1704_v58, %v10917_v2  ;;  %v1728_v56 = vrot.slane %v1720_v21, %v10917_v2  ;;  %v3393_v59 = vsel %vm2940_vm1, %v2938_v1, 0  ;;  %v11373_v58 = vpop.f32.mrb[0].mxu1 }
 0x3d6   : > { %v2004_v55 = vcombine.low %v1979_v24, %v1987_v39  ;;  %v2020_v14 = vcombine.low %v1995_v54, %v2003_v37  ;;  %v1970_v31 = vcombine.low %v11286_v62, %v11289_v48  ;;  %v2005_v26 = vcombine.high %v1979_v24, %v1987_v39 }
 0x3d7   : > { %v1736_v47 = vcombine.low %v1712_v11, %v1728_v56  ;;  %v2021_v12 = vcombine.high %v1995_v54, %v2003_v37  ;;  %v1705_v19 = vcombine.high %v11227_v25, %v11233_v27  ;;  %v1721_v50 = vcombine.high %v11239_v10, %v11245_v35 }
 0x3d8   : > { %9605 = vmatmul.mubr.msk.bf16.vlgmr.msra.gmra.mrb[8].mxu0 %vm2940_vm1, %v11279_v41  ;;  %v11309_v36 = vpack.c.bf16 %v1970_v31, %v1970_v31  ;;  %v11312_v49 = vrot.slane %v2004_v55, %v10917_v2  ;;  %v2019_v51 = vrot.slane %v2005_v26, %v10917_v2  ;;  %v1072_v53 = vsub.s32 2, %v10805_v15 }
 0x3d9   : > { %9575 = vmatmul.mubr.msk.bf16.vlgmr.msra.gmra.mrb[16].mxu1 %vm2940_vm1, %v11291_v20  ;;  %9615 = vmatpush3.bf16.xpose.msra.mxu0 %v3393_v59  ;;  %v11317_v22 = vpack.c.bf16 %v1736_v47, %v1736_v47  ;;  %v2035_v42 = vrot.slane %v2021_v12, %v10917_v2  ;;  %v1719_v25 = vrot.slane %v1705_v19, %v10917_v2 }
 0x3da   : > { %9579 = vmatpush3.bf16.xpose.msra.mxu1 %v11060_v45  ;;  %9580 = vmatprep.mubr.msk.bf16.mxu1 %vm10339_vm0, %v10335_v7  ;;  %v11315_v45 = vrot.slane %v2020_v14, %v10917_v2  ;;  %v1735_v27 = vrot.slane %v1721_v50, %v10917_v2  ;;  %v2865_v38 = vcombine.high %v11181_v3, %v11186_v46 }
 0x3db   : > { %9616 = vmatprep.mubr.msk.bf16.mxu0 %vm10339_vm0, %v10335_v7  ;;  %9584 = vmatprep.subr.bf16.mxu1 %v10335_v7  ;;  %v2038_v10 = vcombine.low %v2019_v51, %v2035_v42  ;;  %v2933_v44 = vcombine.high %v11197_v60, %v11200_v33  ;;  %v2867_v1 = vcombine.high %v11212_v6, %v11215_v8 }
 0x3dc   : > { %9626 = vmatprep.subr.bf16.mxu0 %v10335_v7  ;;  %v2036_v5 = vcombine.low %v11312_v49, %v11315_v45  ;;  %v1738_v35 = vcombine.low %v1719_v25, %v1735_v27  ;;  %v1739_v21 = vcombine.high %v1719_v25, %v1735_v27  ;;  %v2935_v24 = vcombine.high %v11218_v16, %v11221_v17 }
 0x3dd   : > { %v11356_v0 = vpack.c.bf16 %v2038_v10, %v2038_v10  ;;  %v2937_v60 = vpack.c.bf16 %v2933_v44, %v2865_v38  ;;  %v1969_v39 = vcombine.high %v11206_v13, %v11209_v61  ;;  %v1971_v8 = vcombine.high %v11286_v62, %v11289_v48 }
 0x3de   : > { %v11358_v40 = vpack.c.bf16 %v1738_v35, %v1738_v35  ;;  %v11384_v33 = vpack.c.bf16 %v1739_v21, %v1739_v21  ;;  %v2939_v54 = vpack.c.bf16 %v2935_v24, %v2867_v1  ;;  %v2037_v61 = vcombine.high %v11312_v49, %v11315_v45 }
 0x3df   : > { %v11398_v37 = vpack.c.bf16 %v1969_v39, %v1969_v39  ;;  %v11408_v13 = vpack.c.bf16 %v1971_v8, %v1971_v8  ;;  %v2039_v17 = vcombine.high %v2019_v51, %v2035_v42 }
 0x3e0   : > { %9617 = vmatmul.mubr.msk.bf16.vlgmr.msra.gmra.mrb[12].mxu0 %vm2940_vm1, %v11309_v36  ;;  %v3439_v6 = vsel %vm2940_vm1, %v2939_v54, 0  ;;  %v11417_v16 = vpack.c.bf16 %v2037_v61, %v2037_v61 }
 0x3e1   : > { %9581 = vmatmul.mubr.msk.bf16.vlgmr.msra.gmra.mrb[20].mxu1 %vm2940_vm1, %v11317_v22  ;;  %9627 = vmatpush3.bf16.xpose.msra.mxu0 %v3301_v57  ;;  %v1737_v57 = vcombine.high %v1712_v11, %v1728_v56  ;;  %v11424_v62 = vpack.c.bf16 %v2039_v17, %v2039_v17 }
 0x3e2   : > { %9585 = vmatpush3.bf16.xpose.msra.mxu1 %v11092_v32  ;;  %9586 = vmatprep.mubr.msk.bf16.mxu1 %vm10339_vm0, %v10335_v7  ;;  %v11336_v32 = vpack.c.bf16 %v2036_v5, %v2036_v5 }
 0x3e3   : > { %9628 = vmatprep.mubr.msk.bf16.mxu0 %vm10339_vm0, %v10335_v7  ;;  %9590 = vmatprep.subr.bf16.mxu1 %v10335_v7  ;;  %v11340_v43 = vpack.c.bf16 %v1737_v57, %v1737_v57 }
 0x3e4   : > { %9638 = vmatprep.subr.bf16.mxu0 %v10335_v7 }
 0x3e8   : > { %9629 = vmatmul.mubr.msk.bf16.vlgmr.msra.gmra.mrb[16].mxu0 %vm2940_vm1, %v11336_v32 }
 0x3e9   : > { %9587 = vmatmul.mubr.msk.bf16.vlgmr.msra.gmra.mrb[24].mxu1 %vm2940_vm1, %v11340_v43  ;;  %9639 = vmatpush3.bf16.xpose.msra.mxu0 %v3393_v59 }
 0x3ea   : > { %9591 = vmatpush3.bf16.xpose.msra.mxu1 %v11190_v29  ;;  %9592 = vmatprep.mubr.msk.bf16.mxu1 %vm10339_vm0, %v10335_v7  ;;  %v11365_v29 = vrot.slane %v10828_v28, %v1072_v53  ;;  %v9552_v28 = vpop.f32.mrb[1].mxu1 }
 0x3eb   : > { %9640 = vmatprep.mubr.msk.bf16.mxu0 %vm10339_vm0, %v10335_v7  ;;  %9596 = vmatprep.subr.bf16.mxu1 %v10335_v7  ;;  %v1285_v4 = vpop.f32.mrb[2].mxu1 }
 0x3ec   : > { %9650 = vmatprep.subr.bf16.mxu0 %v10335_v7  ;;  %v11382_v3 = vadd.f32 %v1285_v4, %v11365_v29  ;;  %v9553_v46 = vpop.f32.mrb[3].mxu1 }
 0x3f0   : > { %9641 = vmatmul.mubr.msk.bf16.vlgmr.msra.gmra.mrb[20].mxu0 %vm2940_vm1, %v11356_v0 }
 0x3f1   : > { %9593 = vmatmul.mubr.msk.bf16.vlgmr.msra.gmra.mrb[28].mxu1 %vm2940_vm1, %v11358_v40  ;;  %9652 = vmatprep.mubr.msk.bf16.mxu0 %vm10339_vm0, %v10335_v7 }
 0x3f2   : > { %9597 = vmatpush3.bf16.xpose.msra.mxu1 %v11263_v63  ;;  %9598 = vmatprep.mubr.msk.bf16.mxu1 %vm10339_vm0, %v10335_v7  ;;  %v3347_v63 = vsel %vm2940_vm1, %v2937_v60, 0 }
 0x3f3   : > { %9608 = vmatprep.subr.bf16.mxu1 %v10335_v7 }
 0x3f9   : > { %9599 = vmatmul.mubr.msk.bf16.vlgmr.msra.gmra.mrb[32].mxu1 %vm2940_vm1, %v11384_v33 }
 0x3fa   : > { %9609 = vmatpush3.bf16.xpose.msra.mxu1 %v3347_v63  ;;  %9610 = vmatprep.mubr.msk.bf16.mxu1 %vm10339_vm0, %v10335_v7 }
 0x3fb   : > { %9620 = vmatprep.subr.bf16.mxu1 %v10335_v7 }
 0x401   : > { %9611 = vmatmul.mubr.msk.bf16.vlgmr.msra.gmra.mrb[36].mxu1 %vm2940_vm1, %v11398_v37 }
 0x402   : > { %9621 = vmatpush3.bf16.xpose.msra.mxu1 %v3439_v6  ;;  %9622 = vmatprep.mubr.msk.bf16.mxu1 %vm10339_vm0, %v10335_v7 }
 0x403   : > { %9632 = vmatprep.subr.bf16.mxu1 %v10335_v7 }
 0x409   : > { %9623 = vmatmul.mubr.msk.bf16.vlgmr.msra.gmra.mrb[40].mxu1 %vm2940_vm1, %v11408_v13 }
 0x40a   : > { %9633 = vmatpush3.bf16.xpose.msra.mxu1 %v3347_v63  ;;  %9634 = vmatprep.mubr.msk.bf16.mxu1 %vm10339_vm0, %v10335_v7 }
 0x40b   : > { %9644 = vmatprep.subr.bf16.mxu1 %v10335_v7 }
 0x411   : > { %9635 = vmatmul.mubr.msk.bf16.vlgmr.msra.gmra.mrb[44].mxu1 %vm2940_vm1, %v11417_v16 }
 0x412   : > { %9645 = vmatpush3.bf16.xpose.msra.mxu1 %v3439_v6  ;;  %9646 = vmatprep.mubr.msk.bf16.mxu1 %vm10339_vm0, %v10335_v7 }
 0x413   : > { %9656 = vmatprep.subr.bf16.mxu1 %v10335_v7 }
 0x419   : > { %9647 = vmatmul.mubr.msk.bf16.vlgmr.msra.gmra.mrb[48].mxu1 %vm2940_vm1, %v11424_v62 }
 0x41a   : > { %9658 = vmatprep.mubr.msk.bf16.mxu1 %vm10339_vm0, %v10335_v7 }
 0x48a   : > { %v2981_v48 = vpop.f32.mrb[4].mxu1 }
 0x48b   : > { %v3653_v11 = vpack.c.bf16 %v2981_v48, %v2981_v48  ;;  %v9558_v56 = vpop.f32.mrb[5].mxu1 }
 0x48c   : > { %v2984_v59 = vpop.f32.mrb[6].mxu1 }
 0x48d   : > { %3669 = vxpose.xlu0.c.b16.start.end [1/1] (short) (narrow) %v3653_v11, 16  ;;  %v9559_v55 = vpop.f32.mrb[7].mxu1 }
 0x496   : > { %v3027_v14 = vpop.f32.mrb[8].mxu1 }
 0x497   : > { %v3654_v31 = vpack.c.bf16 %v3027_v14, %v3027_v14  ;;  %v9564_v47 = vpop.f32.mrb[9].mxu1 }
 0x498   : > { %v3030_v49 = vpop.f32.mrb[10].mxu1 }
 0x499   : > { %3685 = vxpose.xlu1.c.b16.start.end [1/1] (short) (narrow) %v3654_v31, 16  ;;  %v9565_v45 = vpop.f32.mrb[11].mxu1 }
 0x4a3   : > { %v3073_v26 = vpop.f32.mrb[12].mxu1 }
 0x4a4   : > { %v3655_v12 = vpack.c.bf16 %v3073_v26, %v3073_v26  ;;  %v9570_v5 = vpop.f32.mrb[13].mxu1 }
 0x4a5   : > { %v3076_v19 = vpop.f32.mrb[14].mxu1 }
 0x4a6   : > { %3701 = vxpose.xlu0.c.b16.start.end [1/1] (short) (narrow) %v3655_v12, 16  ;;  %v9571_v50 = vpop.f32.mrb[15].mxu1 }
 0x4ab   : > { %v3337_v57 = vpop.f32.mrb[8].mxu0 }
 0x4ac   : > { %v3119_v51 = vpop.f32.mrb[16].mxu1  ;;  %v9606_v42 = vpop.f32.mrb[9].mxu0  ;;  %v5126_v19 = vpack.c.bf16 %v3337_v57, %v3337_v57 }
 0x4ad   : > { %v3656_v25 = vpack.c.bf16 %v3119_v51, %v3119_v51  ;;  %v9576_v27 = vpop.f32.mrb[17].mxu1  ;;  %v3340_v10 = vpop.f32.mrb[10].mxu0 }
 0x4ae   : > { %v3122_v35 = vpop.f32.mrb[18].mxu1  ;;  %v9607_v38 = vpop.f32.mrb[11].mxu0 }
 0x4af   : > { %3717 = vxpose.xlu0.c.b16.start.end [1/1] (short) (narrow) %v3656_v25, 16  ;;  %v9577_v44 = vpop.f32.mrb[19].mxu1 }
 0x4b3   : > { %v3429_v28 = vpop.f32.mrb[12].mxu0 }
 0x4b4   : > { %v3162_v21 = vpop.f32.mrb[20].mxu1  ;;  %v9618_v4 = vpop.f32.mrb[13].mxu0  ;;  %v5128_v51 = vpack.c.bf16 %v3429_v28, %v3429_v28 }
 0x4b5   : > { %v3657_v46 = vpack.c.bf16 %v3162_v21, %v3162_v21  ;;  %v9582_v60 = vpop.f32.mrb[21].mxu1  ;;  %v3432_v63 = vpop.f32.mrb[14].mxu0 }
 0x4b6   : > { %v3165_v1 = vpop.f32.mrb[22].mxu1  ;;  %v9619_v24 = vpop.f32.mrb[15].mxu0 }
 0x4b7   : > { %3733 = vxpose.xlu1.c.b16.start.end [1/1] (short) (narrow) %v3657_v46, 16  ;;  %v9583_v39 = vpop.f32.mrb[23].mxu1 }
 0x4bb   : > { %v3518_v54 = vpop.f32.mrb[16].mxu0 }
 0x4bc   : > { %v3205_v6 = vpop.f32.mrb[24].mxu1  ;;  %v9630_v8 = vpop.f32.mrb[17].mxu0  ;;  %v5130_v35 = vpack.c.bf16 %v3518_v54, %v3518_v54 }
 0x4bd   : > { %v3658_v61 = vpack.c.bf16 %v3205_v6, %v3205_v6  ;;  %v9588_v17 = vpop.f32.mrb[25].mxu1  ;;  %v3521_v48 = vpop.f32.mrb[18].mxu0 }
 0x4be   : > { %v3208_v11 = vpop.f32.mrb[26].mxu1  ;;  %v9631_v56 = vpop.f32.mrb[19].mxu0 }
 0x4bf   : > { %3749 = vxpose.xlu0.c.b16.start.end [1/1] (short) (narrow) %v3658_v61, 16  ;;  %v9589_v59 = vpop.f32.mrb[27].mxu1 }
 0x4c3   : > { %v3604_v55 = vpop.f32.mrb[20].mxu0 }
 0x4c4   : > { %v3248_v14 = vpop.f32.mrb[28].mxu1  ;;  %v9642_v31 = vpop.f32.mrb[21].mxu0  ;;  %v5132_v44 = vpack.c.bf16 %v3604_v55, %v3604_v55 }
 0x4c5   : > { %v3659_v47 = vpack.c.bf16 %v3248_v14, %v3248_v14  ;;  %v9594_v49 = vpop.f32.mrb[29].mxu1  ;;  %v3607_v45 = vpop.f32.mrb[22].mxu0 }
 0x4c6   : > { %v3251_v26 = vpop.f32.mrb[30].mxu1  ;;  %v9643_v12 = vpop.f32.mrb[23].mxu0 }
 0x4c7   : > { %3765 = vxpose.xlu1.c.b16.start.end [1/1] (short) (narrow) %v3659_v47, 16  ;;  %v9595_v5 = vpop.f32.mrb[31].mxu1 }
 0x4cb   : > { %5142 = vxpose.xlu1.c.b16.start.end [1/1] (short) (narrow) %v5126_v19, 16 }
 0x4cc   : > { %v3291_v50 = vpop.f32.mrb[32].mxu1 }
 0x4cd   : > { %v3660_v42 = vpack.c.bf16 %v3291_v50, %v3291_v50  ;;  %v9600_v25 = vpop.f32.mrb[33].mxu1 }
 0x4ce   : > { %v3294_v27 = vpop.f32.mrb[34].mxu1 }
 0x4cf   : > { %3781 = vxpose.xlu0.c.b16.start.end [1/1] (short) (narrow) %v3660_v42, 16  ;;  %v9601_v10 = vpop.f32.mrb[35].mxu1  ;;  %5174 = vxpose.xlu1.c.b16.start.end [1/1] (short) (narrow) %v5128_v51, 16 }
 0x4d3   : > { %5206 = vxpose.xlu1.c.b16.start.end [1/1] (short) (narrow) %v5130_v35, 16 }
 0x4d4   : > { %v3383_v38 = vpop.f32.mrb[36].mxu1 }
 0x4d5   : > { %v5127_v21 = vpack.c.bf16 %v3383_v38, %v3383_v38  ;;  %v9612_v4 = vpop.f32.mrb[37].mxu1 }
 0x4d6   : > { %v3386_v46 = vpop.f32.mrb[38].mxu1 }
 0x4d7   : > { %5158 = vxpose.xlu0.c.b16.start.end [1/1] (short) (narrow) %v5127_v21, 16  ;;  %v9613_v60 = vpop.f32.mrb[39].mxu1  ;;  %5238 = vxpose.xlu1.c.b16.start.end [1/1] (short) (narrow) %v5132_v44, 16 }
 0x4dc   : > { %v3475_v57 = vpop.f32.mrb[40].mxu1 }
 0x4dd   : > { %v5129_v63 = vpack.c.bf16 %v3475_v57, %v3475_v57  ;;  %v9624_v1 = vpop.f32.mrb[41].mxu1 }
 0x4de   : > { %v3478_v28 = vpop.f32.mrb[42].mxu1 }
 0x4df   : > { %5190 = vxpose.xlu0.c.b16.start.end [1/1] (short) (narrow) %v5129_v63, 16  ;;  %v9625_v24 = vpop.f32.mrb[43].mxu1 }
 0x4e4   : > { %v3561_v39 = vpop.f32.mrb[44].mxu1 }
 0x4e5   : > { %v5131_v6 = vpack.c.bf16 %v3561_v39, %v3561_v39  ;;  %v9636_v8 = vpop.f32.mrb[45].mxu1 }
 0x4e6   : > { %v3564_v61 = vpop.f32.mrb[46].mxu1 }
 0x4e7   : > { %5222 = vxpose.xlu0.c.b16.start.end [1/1] (short) (narrow) %v5131_v6, 16  ;;  %v9637_v54 = vpop.f32.mrb[47].mxu1 }
 0x4ec   : > { %v3647_v17 = vpop.f32.mrb[48].mxu1 }
 0x4ed   : > { %v5133_v48 = vpack.c.bf16 %v3647_v17, %v3647_v17  ;;  %v9648_v11 = vpop.f32.mrb[49].mxu1 }
 0x4ee   : > { %v3650_v56 = vpop.f32.mrb[50].mxu1 }
 0x4ef   : > { %5254 = vxpose.xlu0.c.b16.start.end [1/1] (short) (narrow) %v5133_v48, 16  ;;  %v9649_v59 = vpop.f32.mrb[51].mxu1 }
 0x4f3   : > { %v3677_v55 = vpop.trf.xlu0 }
 0x4f4   : > { %v3801_v26 = vshrl.u32 %v3677_v55, 16 }
 0x4ff   : > { %v3693_v31 = vpop.trf.xlu1 }
 0x500   : > { %v3802_v12 = vshrl.u32 %v3693_v31, 16  ;;  %v3799_v51 = vpack.i.b16 %v3693_v31, %v3677_v55 }
 0x502   : > { %v3803_v25 = vpack.i.b16 %v3802_v12, %v3801_v26 }
 0x50c   : > { %v3709_v14 = vpop.trf.xlu0 }
 0x50d   : > { %v3809_v27 = vshrl.u32 %v3709_v14, 16 }
 0x515   : > { %v3725_v47 = vpop.trf.xlu0 }
 0x516   : > { %v3810_v10 = vshrl.u32 %v3725_v47, 16  ;;  %v3807_v21 = vpack.i.b16 %v3725_v47, %v3709_v14 }
 0x518   : > { %v3811_v57 = vpack.i.b16 %v3810_v10, %v3809_v27 }
 0x51d   : > { %v3741_v49 = vpop.trf.xlu1 }
 0x51e   : > { %v3817_v5 = vshrl.u32 %v3741_v49, 16 }
 0x525   : > { %v3757_v45 = vpop.trf.xlu0 }
 0x526   : > { %v3818_v19 = vshrl.u32 %v3757_v45, 16  ;;  %v3815_v42 = vpack.i.b16 %v3757_v45, %v3741_v49 }
 0x528   : > { %v3819_v35 = vpack.i.b16 %v3818_v19, %v3817_v5  ;;  %v3829_v4 = vcombine.low %v3799_v51, %v3815_v42  ;;  %v3830_v61 = vcombine.high %v3799_v51, %v3815_v42 }
 0x52a   : > { %v3897_v28 = vcombine.low %v3803_v25, %v3819_v35  ;;  %v3837_v6 = vrot.slane %v3829_v4, %v10908_v52  ;;  %v3898_v56 = vcombine.high %v3803_v25, %v3819_v35  ;;  %v3844_v45 = vrot.slane %v3830_v61, %v10908_v52 }
 0x52c   : > { %v3905_v48 = vrot.slane %v3897_v28, %v10908_v52  ;;  %v3912_v51 = vrot.slane %v3898_v56, %v10908_v52 }
 0x52d   : > { %v3773_v50 = vpop.trf.xlu1 }
 0x52e   : > { %v3825_v38 = vshrl.u32 %v3773_v50, 16 }
 0x531   : > { %v5150_v12 = vpop.trf.xlu1 }
 0x535   : > { %v3789_v44 = vpop.trf.xlu0  ;;  %v5182_v35 = vpop.trf.xlu1 }
 0x536   : > { %v3823_v46 = vpack.i.b16 %v3789_v44, %v3773_v50  ;;  %v3826_v60 = vshrl.u32 %v3789_v44, 16 }
 0x538   : > { %v3827_v63 = vpack.i.b16 %v3826_v60, %v3825_v38  ;;  %v3845_v1 = vcombine.low %v3807_v21, %v3823_v46  ;;  %v3846_v24 = vcombine.high %v3807_v21, %v3823_v46 }
 0x539   : > { %v5214_v60 = vpop.trf.xlu1 }
 0x53a   : > { %v3913_v39 = vcombine.low %v3811_v57, %v3827_v63  ;;  %v3853_v8 = vrot.slane %v3845_v1, %v10908_v52  ;;  %v3914_v54 = vcombine.high %v3811_v57, %v3827_v63  ;;  %v3860_v31 = vrot.slane %v3846_v24, %v10908_v52 }
 0x53b   : > { %v12320_v63 = vmov 0   ;;  %v5290_v28 = vshrl.u32 %v5214_v60, 16 }
 0x53c   : > { %v3861_v17 = vcombine.low %v3837_v6, %v3853_v8  ;;  %v3921_v11 = vrot.slane %v3913_v39, %v10908_v52  ;;  %v3862_v14 = vcombine.high %v3837_v6, %v3853_v8  ;;  %v3928_v26 = vrot.slane %v3914_v54, %v10908_v52 }
 0x53d   : > { %v5166_v5 = vpop.trf.xlu0  ;;  %v3877_v50 = vcombine.low %v3844_v45, %v3860_v31  ;;  %v3878_v10 = vcombine.high %v3844_v45, %v3860_v31  ;;  %v5274_v6 = vshrl.u32 %v5150_v12, 16  ;;  %v5246_v61 = vpop.trf.xlu1 }
 0x53e   : > { %v3869_v59 = vrot.slane %v3861_v17, %v10917_v2  ;;  %v3929_v55 = vcombine.low %v3905_v48, %v3921_v11  ;;  %v3930_v49 = vcombine.high %v3905_v48, %v3921_v11  ;;  %v3876_v19 = vrot.slane %v3862_v14, %v10917_v2 }
 0x53f   : > { %v3945_v25 = vcombine.low %v3912_v51, %v3928_v26  ;;  %v3885_v27 = vrot.slane %v3877_v50, %v10917_v2  ;;  %v3946_v21 = vcombine.high %v3912_v51, %v3928_v26  ;;  %v3892_v4 = vrot.slane %v3878_v10, %v10917_v2 }
 0x540   : > { %3965 = vxpose.xlu1.c.b16.start.end [1/1] (short) (narrow) %v3869_v59, 16  ;;  %v3937_v47 = vrot.slane %v3929_v55, %v10917_v2  ;;  %v3944_v42 = vrot.slane %v3930_v49, %v10917_v2  ;;  %v3893_v1 = vcombine.high %v3869_v59, %v12320_v63  ;;  %v5275_v8 = vshrl.u32 %v5166_v5, 16 }
 0x541   : > { %v3953_v44 = vrot.slane %v3945_v25, %v10917_v2  ;;  %v3960_v46 = vrot.slane %v3946_v21, %v10917_v2  ;;  %v3894_v17 = vcombine.high %v3876_v19, %v12320_v63  ;;  %v5272_v48 = vpack.i.b16 %v5166_v5, %v5150_v12 }
 0x542   : > { %3981 = vxpose.xlu0.c.b16.start.end [1/1] (short) (narrow) %v3937_v47, 16  ;;  %v3961_v39 = vcombine.high %v3937_v47, %v12320_v63  ;;  %v5282_v11 = vshrl.u32 %v5182_v35, 16  ;;  %v5298_v14 = vshrl.u32 %v5246_v61, 16  ;;  %v3962_v59 = vcombine.high %v3944_v42, %v12320_v63 }
 0x543   : > { %v5276_v31 = vpack.i.b16 %v5275_v8, %v5274_v6  ;;  %v3895_v45 = vcombine.high %v3885_v27, %v12320_v63  ;;  %v3963_v25 = vcombine.high %v3953_v44, %v12320_v63  ;;  %v3896_v21 = vcombine.high %v3892_v4, %v12320_v63 }
 0x544   : > { %4029 = vxpose.xlu1.c.b16.start.end [1/1] (short) (narrow) %v3876_v19, 16 }
 0x545   : > { %v5198_v38 = vpop.trf.xlu0 }
 0x546   : > { %4045 = vxpose.xlu0.c.b16.start.end [1/1] (short) (narrow) %v3944_v42, 16  ;;  %v5283_v56 = vshrl.u32 %v5198_v38, 16  ;;  %v5280_v47 = vpack.i.b16 %v5198_v38, %v5182_v35  ;;  %v3964_v38 = vcombine.high %v3960_v46, %v12320_v63 }
 0x548   : > { %4093 = vxpose.xlu1.c.b16.start.end [1/1] (short) (narrow) %v3885_v27, 16  ;;  %v5284_v19 = vpack.i.b16 %v5283_v56, %v5282_v11 }
 0x54a   : > { %4109 = vxpose.xlu0.c.b16.start.end [1/1] (short) (narrow) %v3953_v44, 16 }
 0x54c   : > { %4157 = vxpose.xlu1.c.b16.start.end [1/1] (short) (narrow) %v3892_v4, 16 }
 0x54d   : > { %v5230_v57 = vpop.trf.xlu0 }
 0x54e   : > { %4173 = vxpose.xlu0.c.b16.start.end [1/1] (short) (narrow) %v3960_v46, 16  ;;  %v5291_v24 = vshrl.u32 %v5230_v57, 16  ;;  %v5288_v54 = vpack.i.b16 %v5230_v57, %v5214_v60 }
 0x550   : > { %3997 = vxpose.xlu1.c.b16.start.end [1/1] (short) (narrow) %v3893_v1, 16  ;;  %v5292_v55 = vpack.i.b16 %v5291_v24, %v5290_v28  ;;  %v5302_v26 = vcombine.low %v5272_v48, %v5288_v54  ;;  %v5303_v35 = vcombine.high %v5272_v48, %v5288_v54 }
 0x552   : > { %4013 = vxpose.xlu0.c.b16.start.end [1/1] (short) (narrow) %v3961_v39, 16  ;;  %v5370_v12 = vcombine.low %v5276_v31, %v5292_v55  ;;  %v5310_v57 = vrot.slane %v5302_v26, %v10908_v52  ;;  %v5371_v39 = vcombine.high %v5276_v31, %v5292_v55  ;;  %v5317_v46 = vrot.slane %v5303_v35, %v10908_v52 }
 0x554   : > { %4061 = vxpose.xlu1.c.b16.start.end [1/1] (short) (narrow) %v3894_v17, 16  ;;  %v5378_v28 = vrot.slane %v5370_v12, %v10908_v52  ;;  %v5385_v55 = vrot.slane %v5371_v39, %v10908_v52 }
 0x555   : > { %v5262_v49 = vpop.trf.xlu0 }
 0x556   : > { %v5296_v50 = vpack.i.b16 %v5262_v49, %v5246_v61  ;;  %v5299_v51 = vshrl.u32 %v5262_v49, 16  ;;  %4077 = vxpose.xlu0.c.b16.start.end [1/1] (short) (narrow) %v3962_v59, 16 }
 0x558   : > { %v5300_v5 = vpack.i.b16 %v5299_v51, %v5298_v14  ;;  %v5318_v10 = vcombine.low %v5280_v47, %v5296_v50  ;;  %4125 = vxpose.xlu1.c.b16.start.end [1/1] (short) (narrow) %v3895_v45, 16  ;;  %v5319_v60 = vcombine.high %v5280_v47, %v5296_v50 }
 0x55a   : > { %v5386_v42 = vcombine.low %v5284_v19, %v5300_v5  ;;  %4141 = vxpose.xlu0.c.b16.start.end [1/1] (short) (narrow) %v3963_v25, 16  ;;  %v5326_v27 = vrot.slane %v5318_v10, %v10908_v52  ;;  %v5387_v1 = vcombine.high %v5284_v19, %v5300_v5  ;;  %v5333_v61 = vrot.slane %v5319_v60, %v10908_v52 }
 0x55c   : > { %4189 = vxpose.xlu1.c.b16.start.end [1/1] (short) (narrow) %v3896_v21, 16  ;;  %v5334_v44 = vcombine.low %v5310_v57, %v5326_v27  ;;  %v5394_v24 = vrot.slane %v5386_v42, %v10908_v52  ;;  %v5335_v8 = vcombine.high %v5310_v57, %v5326_v27  ;;  %v5401_v48 = vrot.slane %v5387_v1, %v10908_v52 }
 0x55d   : > { %v5350_v56 = vcombine.low %v5317_v46, %v5333_v61  ;;  %v5351_v49 = vcombine.high %v5317_v46, %v5333_v61  ;;  %v11480_v42 = vadd.f32 %v11373_v58, %v11365_v29 }
 0x55e   : > { %4205 = vxpose.xlu0.c.b16.start.end [1/1] (short) (narrow) %v3964_v38, 16  ;;  %v5342_v4 = vrot.slane %v5334_v44, %v10917_v2  ;;  %v5402_v6 = vcombine.low %v5378_v28, %v5394_v24  ;;  %v5403_v17 = vcombine.high %v5378_v28, %v5394_v24  ;;  %v5349_v11 = vrot.slane %v5335_v8, %v10917_v2 }
 0x55f   : > { %v5418_v59 = vcombine.low %v5385_v55, %v5401_v48  ;;  %v5358_v31 = vrot.slane %v5350_v56, %v10917_v2  ;;  %v5419_v47 = vcombine.high %v5385_v55, %v5401_v48  ;;  %v5365_v26 = vrot.slane %v5351_v49, %v10917_v2 }
 0x560   : > { %5438 = vxpose.xlu1.c.b16.start.end [1/1] (short) (narrow) %v5342_v4, 16  ;;  %v5410_v54 = vrot.slane %v5402_v6, %v10917_v2  ;;  %v5417_v14 = vrot.slane %v5403_v17, %v10917_v2  ;;  %v5366_v51 = vcombine.high %v5342_v4, %v12320_v63  ;;  %v5367_v19 = vcombine.high %v5349_v11, %v12320_v63 }
 0x561   : > { %v5426_v45 = vrot.slane %v5418_v59, %v10917_v2  ;;  %v5433_v50 = vrot.slane %v5419_v47, %v10917_v2  ;;  %v5368_v5 = vcombine.high %v5358_v31, %v12320_v63  ;;  %v5369_v21 = vcombine.high %v5365_v26, %v12320_v63 }
 0x562   : > { %5454 = vxpose.xlu0.c.b16.start.end [1/1] (short) (narrow) %v5410_v54, 16  ;;  %v5434_v25 = vcombine.high %v5410_v54, %v12320_v63  ;;  %v5435_v12 = vcombine.high %v5417_v14, %v12320_v63 }
 0x563   : > { %v5436_v10 = vcombine.high %v5426_v45, %v12320_v63  ;;  %v5437_v60 = vcombine.high %v5433_v50, %v12320_v63 }
 0x564   : > { %5502 = vxpose.xlu1.c.b16.start.end [1/1] (short) (narrow) %v5349_v11, 16 }
 0x566   : > { %5518 = vxpose.xlu0.c.b16.start.end [1/1] (short) (narrow) %v5417_v14, 16 }
 0x568   : > { %5566 = vxpose.xlu1.c.b16.start.end [1/1] (short) (narrow) %v5358_v31, 16 }
 0x56a   : > { %5582 = vxpose.xlu0.c.b16.start.end [1/1] (short) (narrow) %v5426_v45, 16 }
 0x56c   : > { %5630 = vxpose.xlu1.c.b16.start.end [1/1] (short) (narrow) %v5365_v26, 16 }
 0x56e   : > { %5646 = vxpose.xlu0.c.b16.start.end [1/1] (short) (narrow) %v5433_v50, 16 }
 0x570   : > { %5470 = vxpose.xlu1.c.b16.start.end [1/1] (short) (narrow) %v5366_v51, 16 }
 0x572   : > { %5486 = vxpose.xlu0.c.b16.start.end [1/1] (short) (narrow) %v5434_v25, 16 }
 0x574   : > { %5534 = vxpose.xlu1.c.b16.start.end [1/1] (short) (narrow) %v5367_v19, 16 }
 0x576   : > { %5550 = vxpose.xlu0.c.b16.start.end [1/1] (short) (narrow) %v5435_v12, 16 }
 0x578   : > { %5598 = vxpose.xlu1.c.b16.start.end [1/1] (short) (narrow) %v5368_v5, 16 }
 0x57a   : > { %5614 = vxpose.xlu0.c.b16.start.end [1/1] (short) (narrow) %v5436_v10, 16 }
 0x57c   : > { %5662 = vxpose.xlu1.c.b16.start.end [1/1] (short) (narrow) %v5369_v21, 16 }
 0x57e   : > { %5678 = vxpose.xlu0.c.b16.start.end [1/1] (short) (narrow) %v5437_v60, 16 }
 0x580   : > { %2050 = vrot.lane.b32.xlu1 %v11480_v42, %s10337_s25 }
 0x5a6   : > { %v3973_v57 = vpop.trf.xlu1 }
 0x5a8   : > { %v3989_v27 = vpop.trf.xlu0 }
 0x5aa   : > { %v4037_v35 = vpop.trf.xlu1 }
 0x5ab   : > { %v4221_v29 = vcombine.low %v3973_v57, %v4037_v35 }
 0x5ac   : > { %v4053_v38 = vpop.trf.xlu0 }
 0x5ad   : > { %v4289_v48 = vcombine.low %v3989_v27, %v4053_v38  ;;  %v4228_v59 = vrot.slane %v4221_v29, %v10908_v52 }
 0x5ae   : > { %v4101_v1 = vpop.trf.xlu1 }
 0x5af   : > { %v4296_v50 = vrot.slane %v4289_v48, %v10908_v52 }
 0x5b0   : > { %v4117_v44 = vpop.trf.xlu0 }
 0x5b2   : > { %v4165_v28 = vpop.trf.xlu1 }
 0x5b3   : > { %v4237_v46 = vcombine.low %v4101_v1, %v4165_v28 }
 0x5b4   : > { %v4181_v24 = vpop.trf.xlu0 }
 0x5b5   : > { %v4305_v55 = vcombine.low %v4117_v44, %v4181_v24  ;;  %v4244_v45 = vrot.slane %v4237_v46, %v10908_v52 }
 0x5b6   : > { %v4005_v39 = vpop.trf.xlu1 }
 0x5b7   : > { %v4312_v19 = vrot.slane %v4305_v55, %v10908_v52 }
 0x5b8   : > { %v4021_v4 = vpop.trf.xlu0 }
 0x5ba   : > { %v4069_v6 = vpop.trf.xlu1 }
 0x5bb   : > { %v4229_v61 = vcombine.low %v4005_v39, %v4069_v6 }
 0x5bc   : > { %v4085_v8 = vpop.trf.xlu0 }
 0x5bd   : > { %v4297_v58 = vcombine.low %v4021_v4, %v4085_v8  ;;  %v4236_v11 = vrot.slane %v4229_v61, %v10908_v52 }
 0x5be   : > { %v4133_v54 = vpop.trf.xlu1 }
 0x5bf   : > { %v4304_v31 = vrot.slane %v4297_v58, %v10908_v52  ;;  %v4253_v51 = vcombine.low %v4228_v59, %v4236_v11  ;;  %v4254_v48 = vcombine.high %v4228_v59, %v4236_v11  ;;  %v3662_v59 = vld [vmem:[%s12322_s4 + $0x4] sm:$0xf] }
 0x5c0   : > { %v4149_v17 = vpop.trf.xlu0 }
 0x5c1   : > { %v4321_v10 = vcombine.low %v4296_v50, %v4304_v31  ;;  %v4261_v27 = vrot.slane %v4253_v51, %v10917_v2  ;;  %v4322_v8 = vcombine.high %v4296_v50, %v4304_v31  ;;  %v4268_v51 = vrot.slane %v4254_v48, %v10917_v2 }
 0x5c2   : > { %v4197_v56 = vpop.trf.xlu1 }
 0x5c3   : > { %v4245_v14 = vcombine.low %v4133_v54, %v4197_v56  ;;  %v4329_v38 = vrot.slane %v4321_v10, %v10917_v2 }
 0x5c4   : > { %v4213_v49 = vpop.trf.xlu0 }
 0x5c5   : > { %v4252_v47 = vrot.slane %v4245_v14, %v10908_v52  ;;  %v4313_v26 = vcombine.low %v4149_v17, %v4213_v49  ;;  %v3661_v49 = vld [vmem:[%s12321_s30] sm:$0xf] }
 0x5c6   : > { %v11490_v25 = vpop.trf.xlu1 }
 0x5c7   : > { %v4269_v12 = vcombine.low %v4244_v45, %v4252_v47  ;;  %v4320_v5 = vrot.slane %v4313_v26, %v10908_v52  ;;  %v4270_v61 = vcombine.high %v4244_v45, %v4252_v47  ;;  %v4336_v45 = vrot.slane %v4322_v8, %v10917_v2 }
 0x5c8   : > { %v11494_v21 = vpop.trf.xlu0 }
 0x5c9   : > { %v4277_v60 = vrot.slane %v4269_v12, %v10917_v2  ;;  %v4337_v57 = vcombine.low %v4312_v19, %v4320_v5  ;;  %v4338_v24 = vcombine.high %v4312_v19, %v4320_v5  ;;  %v4284_v47 = vrot.slane %v4270_v61, %v10917_v2 }
 0x5ca   : > { %v11498_v35 = vpop.trf.xlu1 }
 0x5cb   : > { %v4285_v1 = vcombine.low %v4261_v27, %v4277_v60  ;;  %v4345_v44 = vrot.slane %v4337_v57, %v10917_v2  ;;  %v4286_v54 = vcombine.high %v4261_v27, %v4277_v60  ;;  %v4352_v56 = vrot.slane %v4338_v24, %v10917_v2  ;;  %v3663_v27 = vld [vmem:[%s12322_s4 + $0x8] sm:$0xf]  ;;  %v3664_v24 = vld [vmem:[%s12322_s4 + $0xc] sm:$0xf] }
 0x5cc   : > { %v11502_v28 = vpop.trf.xlu0  ;;  %v4287_v10 = vcombine.low %v4268_v51, %v4284_v47 }
 0x5cd   : > { %v4353_v39 = vcombine.low %v4329_v38, %v4345_v44  ;;  %v4354_v4 = vcombine.high %v4329_v38, %v4345_v44  ;;  %v4361_v17 = vshrl.u32 %v4285_v1, 16  ;;  %v4369_v50 = vshrl.u32 %v4286_v54, 16 }
 0x5ce   : > { %v11504_v6 = vpop.trf.xlu1  ;;  %v4355_v19 = vcombine.low %v4336_v45, %v4352_v56 }
 0x5cf   : > { %v4359_v58 = vpack.i.b16 %v4353_v39, %v4285_v1  ;;  %v4362_v46 = vshrl.u32 %v4353_v39, 16  ;;  %v4370_v31 = vshrl.u32 %v4354_v4, 16  ;;  %v4367_v11 = vpack.i.b16 %v4354_v4, %v4286_v54 }
 0x5d0   : > { %v11506_v29 = vpop.trf.xlu0  ;;  %v4378_v38 = vshrl.u32 %v4355_v19, 16  ;;  %v4375_v1 = vpack.i.b16 %v4355_v19, %v4287_v10  ;;  %v4377_v39 = vshrl.u32 %v4287_v10, 16  ;;  %v4356_v4 = vcombine.high %v4336_v45, %v4352_v56 }
 0x5d1   : > { %9651 = vmatpush3.bf16.msra.mxu0 %v4359_v58  ;;  %v4363_v14 = vpack.i.b16 %v4362_v46, %v4361_v17  ;;  %v4371_v5 = vpack.i.b16 %v4370_v31, %v4369_v50  ;;  %v4288_v58 = vcombine.high %v4268_v51, %v4284_v47  ;;  %v5694_v17 = vcombine.low %v11490_v25, %v11498_v35  ;;  %v3665_v25 = vld [vmem:[%s12322_s4 + $0x10] sm:$0xf] }
 0x5d2   : > { %v11509_v55 = vpop.trf.xlu1  ;;  %9662 = vmatprep.subr.bf16.mxu0 %v10335_v7  ;;  %v4379_v54 = vpack.i.b16 %v4378_v38, %v4377_v39  ;;  %v4386_v35 = vshrl.u32 %v4356_v4, 16 }
 0x5d3   : > { %9657 = vmatpush3.bf16.msra.mxu1 %v4363_v14  ;;  %v5710_v56 = vcombine.low %v11504_v6, %v11509_v55  ;;  %v5762_v14 = vcombine.low %v11494_v21, %v11502_v28  ;;  %v5701_v6 = vrot.slane %v5694_v17, %v10908_v52  ;;  %v3666_v21 = vld [vmem:[%s12322_s4 + $0x14] sm:$0xf]  ;;  %v4385_v28 = vshrl.u32 %v4288_v58, 16 }
 0x5d4   : > { %v11517_v26 = vpop.trf.xlu0  ;;  %9653 = vmatmul.mubr.msk.bf16.vlgmr.msra.gmra.mrb[24].mxu0 %vm4389_vm2, %v3661_v49  ;;  %9668 = vmatprep.subr.bf16.mxu1 %v10335_v7 }
 0x5d5   : > { %9663 = vmatpush3.bf16.msra.mxu0 %v4367_v11  ;;  %9664 = vmatprep.mubr.msk.bf16.mxu0 %vm10339_vm0, %v10335_v7  ;;  %v5778_v45 = vcombine.low %v11506_v29, %v11517_v26  ;;  %v4383_v11 = vpack.i.b16 %v4356_v4, %v4288_v58  ;;  %v5717_v50 = vrot.slane %v5710_v56, %v10908_v52 }
 0x5d6   : > { %v5478_v12 = vpop.trf.xlu1  ;;  %9659 = vmatmul.mubr.msk.bf16.vlgmr.msra.gmra.mrb[52].mxu1 %vm4389_vm2, %v3662_v59  ;;  %9674 = vmatprep.subr.bf16.mxu0 %v10335_v7  ;;  %v5769_v29 = vrot.slane %v5762_v14, %v10908_v52 }
 0x5d7   : > { %9669 = vmatpush3.bf16.msra.mxu1 %v4371_v5  ;;  %9670 = vmatprep.mubr.msk.bf16.mxu1 %vm10339_vm0, %v10335_v7  ;;  %v5785_v5 = vrot.slane %v5778_v45, %v10908_v52 }
 0x5d8   : > { %v5494_v60 = vpop.trf.xlu0  ;;  %9680 = vmatprep.subr.bf16.mxu1 %v10335_v7 }
 0x5da   : > { %v5542_v57 = vpop.trf.xlu1 }
 0x5db   : > { %v5702_v8 = vcombine.low %v5478_v12, %v5542_v57  ;;  %v4387_v12 = vpack.i.b16 %v4386_v35, %v4385_v28 }
 0x5dc   : > { %v5558_v44 = vpop.trf.xlu0  ;;  %9665 = vmatmul.mubr.msk.bf16.vlgmr.msra.gmra.mrb[28].mxu0 %vm4389_vm2, %v3663_v27 }
 0x5dd   : > { %9675 = vmatpush3.bf16.msra.mxu0 %v4375_v1  ;;  %9676 = vmatprep.mubr.msk.bf16.mxu0 %vm10339_vm0, %v10335_v7  ;;  %v5770_v46 = vcombine.low %v5494_v60, %v5558_v44  ;;  %v11553_v49 = vrot.slane %v5702_v8, %v10908_v52  ;;  %v3667_v44 = vld [vmem:[%s12322_s4 + $0x18] sm:$0xf]  ;;  %v3668_v8 = vld [vmem:[%s12322_s4 + $0x1c] sm:$0xf] }
 0x5de   : > { %v5606_v61 = vpop.trf.xlu1  ;;  %9671 = vmatmul.mubr.msk.bf16.vlgmr.msra.gmra.mrb[56].mxu1 %vm4389_vm2, %v3664_v24  ;;  %9686 = vmatprep.subr.bf16.mxu0 %v10335_v7 }
 0x5df   : > { %9681 = vmatpush3.bf16.msra.mxu1 %v4379_v54  ;;  %9682 = vmatprep.mubr.msk.bf16.mxu1 %vm10339_vm0, %v10335_v7  ;;  %v5777_v55 = vrot.slane %v5770_v46, %v10908_v52  ;;  %v5726_v26 = vcombine.low %v5701_v6, %v11553_v49 }
 0x5e0   : > { %v5622_v48 = vpop.trf.xlu0  ;;  %9692 = vmatprep.subr.bf16.mxu1 %v10335_v7 }
 0x5e1   : > { %v5794_v57 = vcombine.low %v5769_v29, %v5777_v55  ;;  %v5734_v1 = vrot.slane %v5726_v26, %v10917_v2  ;;  %v5795_v17 = vcombine.high %v5769_v29, %v5777_v55  ;;  %v5136_v29 = vld [vmem:[%s12323_s16 + $0x8] sm:$0xf] }
 0x5e2   : > { %v5670_v31 = vpop.trf.xlu1 }
 0x5e3   : > { %v5718_v47 = vcombine.low %v5606_v61, %v5670_v31  ;;  %v5802_v24 = vrot.slane %v5794_v57, %v10917_v2 }
 0x5e4   : > { %v5686_v59 = vpop.trf.xlu0  ;;  %9677 = vmatmul.mubr.msk.bf16.vlgmr.msra.gmra.mrb[32].mxu0 %vm4389_vm2, %v3665_v25  ;;  %v5727_v25 = vcombine.high %v5701_v6, %v11553_v49  ;;  %v5135_v49 = vld [vmem:[%s12323_s16 + $0x4] sm:$0xf] }
 0x5e5   : > { %v5725_v51 = vrot.slane %v5718_v47, %v10908_v52  ;;  %v5786_v19 = vcombine.low %v5622_v48, %v5686_v59  ;;  %9687 = vmatpush3.bf16.msra.mxu0 %v4383_v11  ;;  %9688 = vmatprep.mubr.msk.bf16.mxu0 %vm10339_vm0, %v10335_v7  ;;  %v5134_v47 = vld [vmem:[%s12323_s16] sm:$0xf]  ;;  %v5809_v11 = vrot.slane %v5795_v17, %v10917_v2 }
 0x5e6   : > { %9683 = vmatmul.mubr.msk.bf16.vlgmr.msra.gmra.mrb[60].mxu1 %vm4389_vm2, %v3666_v21  ;;  %9698 = vmatprep.subr.bf16.mxu0 %v10335_v7  ;;  %v5741_v28 = vrot.slane %v5727_v25, %v10917_v2 }
 0x5e7   : > { %v5742_v10 = vcombine.low %v5717_v50, %v5725_v51  ;;  %v5793_v60 = vrot.slane %v5786_v19, %v10908_v52  ;;  %9693 = vmatpush3.bf16.msra.mxu1 %v4387_v12  ;;  %9694 = vmatprep.mubr.msk.bf16.mxu1 %vm10339_vm0, %v10335_v7  ;;  %v5743_v46 = vcombine.high %v5717_v50, %v5725_v51 }
 0x5e8   : > { %9704 = vmatprep.subr.bf16.mxu1 %v10335_v7 }
 0x5e9   : > { %v5750_v27 = vrot.slane %v5742_v10, %v10917_v2  ;;  %v5810_v38 = vcombine.low %v5785_v5, %v5793_v60  ;;  %v5811_v61 = vcombine.high %v5785_v5, %v5793_v60  ;;  %v5757_v59 = vrot.slane %v5743_v46, %v10917_v2  ;;  %v5137_v5 = vld [vmem:[%s12323_s16 + $0xc] sm:$0xf] }
 0x5eb   : > { %v5758_v39 = vcombine.low %v5734_v1, %v5750_v27  ;;  %v5818_v4 = vrot.slane %v5810_v38, %v10917_v2  ;;  %v5759_v48 = vcombine.high %v5734_v1, %v5750_v27  ;;  %v5825_v35 = vrot.slane %v5811_v61, %v10917_v2  ;;  %v5138_v38 = vld [vmem:[%s12323_s16 + $0x10] sm:$0xf]  ;;  %v5141_v61 = vld [vmem:[%s12323_s16 + $0x1c] sm:$0xf] }
 0x5ec   : > { %9689 = vmatmul.mubr.msk.bf16.vlgmr.msra.gmra.mrb[36].mxu0 %vm4389_vm2, %v3667_v44  ;;  %v5760_v19 = vcombine.low %v5741_v28, %v5757_v59  ;;  %v5761_v27 = vcombine.high %v5741_v28, %v5757_v59 }
 0x5ed   : > { %v5826_v54 = vcombine.low %v5802_v24, %v5818_v4  ;;  %v5827_v58 = vcombine.high %v5802_v24, %v5818_v4  ;;  %9700 = vmatprep.mubr.msk.bf16.mxu0 %vm10339_vm0, %v10335_v7  ;;  %v5834_v14 = vshrl.u32 %v5758_v39, 16  ;;  %v5842_v6 = vshrl.u32 %v5759_v48, 16  ;;  %v5139_v24 = vld [vmem:[%s12323_s16 + $0x14] sm:$0xf] }
 0x5ee   : > { %9695 = vmatmul.mubr.msk.bf16.vlgmr.msra.gmra.mrb[64].mxu1 %vm4389_vm2, %v3668_v8  ;;  %v5828_v50 = vcombine.low %v5809_v11, %v5825_v35  ;;  %v5850_v10 = vshrl.u32 %v5760_v19, 16  ;;  %v5829_v60 = vcombine.high %v5809_v11, %v5825_v35  ;;  %v5140_v8 = vld [vmem:[%s12323_s16 + $0x18] sm:$0xf] }
 0x5ef   : > { %v5832_v56 = vpack.i.b16 %v5826_v54, %v5758_v39  ;;  %v5835_v31 = vshrl.u32 %v5826_v54, 16  ;;  %9706 = vmatprep.mubr.msk.bf16.mxu1 %vm10339_vm0, %v10335_v7  ;;  %v5843_v55 = vshrl.u32 %v5827_v58, 16  ;;  %v5840_v21 = vpack.i.b16 %v5827_v58, %v5759_v48 }
 0x5f0   : > { %v5851_v26 = vshrl.u32 %v5828_v50, 16  ;;  %v5848_v12 = vpack.i.b16 %v5828_v50, %v5760_v19  ;;  %v5859_v1 = vshrl.u32 %v5829_v60, 16  ;;  %v5856_v44 = vpack.i.b16 %v5829_v60, %v5761_v27 }
 0x5f1   : > { %9699 = vmatpush3.bf16.msra.mxu0 %v5832_v56  ;;  %v5836_v45 = vpack.i.b16 %v5835_v31, %v5834_v14  ;;  %v5844_v51 = vpack.i.b16 %v5843_v55, %v5842_v6  ;;  %v5858_v39 = vshrl.u32 %v5761_v27, 16  ;;  %v3298_v54 = vsel %vm2940_vm1, %v11279_v41, 0 }
 0x5f2   : > { %9710 = vmatprep.subr.bf16.mxu0 %v10335_v7  ;;  %v5852_v57 = vpack.i.b16 %v5851_v26, %v5850_v10  ;;  %v3344_v58 = vsel %vm2940_vm1, %v11398_v37, 0  ;;  %v3390_v41 = vsel %vm2940_vm1, %v11309_v36, 0  ;;  %v3436_v37 = vsel %vm2940_vm1, %v11408_v13, 0 }
 0x5f3   : > { %9705 = vmatpush3.bf16.msra.mxu1 %v5836_v45  ;;  %v5860_v4 = vpack.i.b16 %v5859_v1, %v5858_v39 }
 0x5f4   : > { %9701 = vmatmul.mubr.msk.bf16.vlgmr.msra.gmra.mrb[40].mxu0 %vm4389_vm2, %v5134_v47  ;;  %9716 = vmatprep.subr.bf16.mxu1 %v10335_v7 }
 0x5f5   : > { %9711 = vmatpush3.bf16.msra.mxu0 %v5840_v21  ;;  %9712 = vmatprep.mubr.msk.bf16.mxu0 %vm10339_vm0, %v10335_v7 }
 0x5f6   : > { %9707 = vmatmul.mubr.msk.bf16.vlgmr.msra.gmra.mrb[68].mxu1 %vm4389_vm2, %v5135_v49  ;;  %9722 = vmatprep.subr.bf16.mxu0 %v10335_v7 }
 0x5f7   : > { %9717 = vmatpush3.bf16.msra.mxu1 %v5844_v51  ;;  %9718 = vmatprep.mubr.msk.bf16.mxu1 %vm10339_vm0, %v10335_v7 }
 0x5f8   : > { %9728 = vmatprep.subr.bf16.mxu1 %v10335_v7 }
 0x5fc   : > { %9713 = vmatmul.mubr.msk.bf16.vlgmr.msra.gmra.mrb[44].mxu0 %vm4389_vm2, %v5136_v29 }
 0x5fd   : > { %9723 = vmatpush3.bf16.msra.mxu0 %v5848_v12  ;;  %9724 = vmatprep.mubr.msk.bf16.mxu0 %vm10339_vm0, %v10335_v7 }
 0x5fe   : > { %9719 = vmatmul.mubr.msk.bf16.vlgmr.msra.gmra.mrb[72].mxu1 %vm4389_vm2, %v5137_v5  ;;  %9734 = vmatprep.subr.bf16.mxu0 %v10335_v7 }
 0x5ff   : > { %9729 = vmatpush3.bf16.msra.mxu1 %v5852_v57  ;;  %9730 = vmatprep.mubr.msk.bf16.mxu1 %vm10339_vm0, %v10335_v7 }
 0x600   : > { %9740 = vmatprep.subr.bf16.mxu1 %v10335_v7 }
 0x604   : > { %9725 = vmatmul.mubr.msk.bf16.vlgmr.msra.gmra.mrb[48].mxu0 %vm4389_vm2, %v5138_v38 }
 0x605   : > { %9735 = vmatpush3.bf16.msra.mxu0 %v5856_v44  ;;  %9736 = vmatprep.mubr.msk.bf16.mxu0 %vm10339_vm0, %v10335_v7 }
 0x606   : > { %9731 = vmatmul.mubr.msk.bf16.vlgmr.msra.gmra.mrb[76].mxu1 %vm4389_vm2, %v5139_v24  ;;  %9746 = vmatprep.subr.bf16.mxu0 %v10335_v7 }
 0x607   : > { %9741 = vmatpush3.bf16.msra.mxu1 %v5860_v4  ;;  %9742 = vmatprep.mubr.msk.bf16.mxu1 %vm10339_vm0, %v10335_v7 }
 0x608   : > { %9752 = vmatprep.subr.bf16.mxu1 %v10335_v7 }
 0x60c   : > { %9737 = vmatmul.mubr.msk.bf16.vlgmr.msra.gmra.mrb[52].mxu0 %vm4389_vm2, %v5140_v8 }
 0x60d   : > { %9748 = vmatprep.mubr.msk.bf16.mxu0 %vm10339_vm0, %v10335_v7 }
 0x60e   : > { %9747 = vmatpush3.bf16.xpose.msra.mxu0 %v3298_v54  ;;  %9743 = vmatmul.mubr.msk.bf16.vlgmr.msra.gmra.mrb[80].mxu1 %vm4389_vm2, %v5141_v61 }
 0x60f   : > { %9758 = vmatprep.subr.bf16.mxu0 %v10335_v7  ;;  %9754 = vmatprep.mubr.msk.bf16.mxu1 %vm10339_vm0, %v10335_v7 }
 0x610   : > { %9753 = vmatpush3.bf16.xpose.msra.mxu1 %v3344_v58 }
 0x611   : > { %9764 = vmatprep.subr.bf16.mxu1 %v10335_v7 }
 0x615   : > { %9749 = vmatmul.mubr.msk.bf16.vlgmr.msra.gmra.mrb[56].mxu0 %vm2940_vm1, %v11081_v30  ;;  %v3482_v30 = vsel %vm2940_vm1, %v11336_v32, 0 }
 0x616   : > { %9759 = vmatpush3.bf16.xpose.msra.mxu0 %v3390_v41  ;;  %9760 = vmatprep.mubr.msk.bf16.mxu0 %vm10339_vm0, %v10335_v7 }
 0x617   : > { %9755 = vmatmul.mubr.msk.bf16.vlgmr.msra.gmra.mrb[84].mxu1 %vm2940_vm1, %v11144_v9  ;;  %9770 = vmatprep.subr.bf16.mxu0 %v10335_v7  ;;  %v3525_v9 = vsel %vm2940_vm1, %v11417_v16, 0 }
 0x618   : > { %9765 = vmatpush3.bf16.xpose.msra.mxu1 %v3436_v37  ;;  %9766 = vmatprep.mubr.msk.bf16.mxu1 %vm10339_vm0, %v10335_v7 }
 0x619   : > { %9776 = vmatprep.subr.bf16.mxu1 %v10335_v7 }
 0x61d   : > { %9761 = vmatmul.mubr.msk.bf16.vlgmr.msra.gmra.mrb[60].mxu0 %vm2940_vm1, %v11247_v23  ;;  %v3568_v23 = vsel %vm2940_vm1, %v11356_v0, 0 }
 0x61e   : > { %9771 = vmatpush3.bf16.xpose.msra.mxu0 %v3482_v30  ;;  %9772 = vmatprep.mubr.msk.bf16.mxu0 %vm10339_vm0, %v10335_v7 }
 0x61f   : > { %9767 = vmatmul.mubr.msk.bf16.vlgmr.msra.gmra.mrb[88].mxu1 %vm2940_vm1, %v11291_v20  ;;  %9782 = vmatprep.subr.bf16.mxu0 %v10335_v7  ;;  %v3611_v20 = vsel %vm2940_vm1, %v11424_v62, 0 }
 0x620   : > { %9777 = vmatpush3.bf16.xpose.msra.mxu1 %v3525_v9  ;;  %9778 = vmatprep.mubr.msk.bf16.mxu1 %vm10339_vm0, %v10335_v7 }
 0x621   : > { %9788 = vmatprep.subr.bf16.mxu1 %v10335_v7 }
 0x625   : > { %9773 = vmatmul.mubr.msk.bf16.vlgmr.msra.gmra.mrb[64].mxu0 %vm2940_vm1, %v11317_v22 }
 0x626   : > { %9783 = vmatpush3.bf16.xpose.msra.mxu0 %v3568_v23  ;;  %9784 = vmatprep.mubr.msk.bf16.mxu0 %vm10339_vm0, %v10335_v7 }
 0x627   : > { %9779 = vmatmul.mubr.msk.bf16.vlgmr.msra.gmra.mrb[92].mxu1 %vm2940_vm1, %v11340_v43  ;;  %9794 = vmatprep.subr.bf16.mxu0 %v10335_v7 }
 0x628   : > { %9789 = vmatpush3.bf16.xpose.msra.mxu1 %v3611_v20  ;;  %9790 = vmatprep.mubr.msk.bf16.mxu1 %vm10339_vm0, %v10335_v7 }
 0x629   : > { %9800 = vmatprep.subr.bf16.mxu1 %v10335_v7 }
 0x62d   : > { %9785 = vmatmul.mubr.msk.bf16.vlgmr.msra.gmra.mrb[68].mxu0 %vm2940_vm1, %v11358_v40 }
 0x62e   : > { %9796 = vmatprep.mubr.msk.bf16.mxu0 %vm10339_vm0, %v10335_v7 }
 0x62f   : > { %9791 = vmatmul.mubr.msk.bf16.vlgmr.msra.gmra.mrb[96].mxu1 %vm2940_vm1, %v11384_v33 }
 0x630   : > { %9802 = vmatprep.mubr.msk.bf16.mxu1 %vm10339_vm0, %v10335_v7 }
 0x6a7   : > { %v4427_v36 = vpop.f32.mrb[24].mxu0 }
 0x6a8   : > { %v9654_v22 = vpop.f32.mrb[25].mxu0  ;;  %4734 = vxpose.xlu0.b32.start.end [1/1] (short) (narrow) %v4427_v36, 8 }
 0x6a9   : > { %v4470_v32 = vpop.f32.mrb[52].mxu1  ;;  %v4430_v43 = vpop.f32.mrb[26].mxu0 }
 0x6aa   : > { %v9660_v0 = vpop.f32.mrb[53].mxu1  ;;  %v9655_v13 = vpop.f32.mrb[27].mxu0 }
 0x6ab   : > { %v4473_v16 = vpop.f32.mrb[54].mxu1 }
 0x6ac   : > { %v9661_v62 = vpop.f32.mrb[55].mxu1 }
 0x6af   : > { %v11712_v17 = vpop.f32.mrb[28].mxu0 }
 0x6b0   : > { %v9666_v40 = vpop.f32.mrb[29].mxu0 }
 0x6b1   : > { %v4556_v46 = vpop.f32.mrb[56].mxu1  ;;  %v4516_v48 = vpop.f32.mrb[30].mxu0 }
 0x6b2   : > { %v9672_v56 = vpop.f32.mrb[57].mxu1  ;;  %v9667_v14 = vpop.f32.mrb[31].mxu0 }
 0x6b3   : > { %v4559_v33 = vpop.f32.mrb[58].mxu1 }
 0x6b4   : > { %v9673_v31 = vpop.f32.mrb[59].mxu1 }
 0x6b7   : > { %v4599_v25 = vpop.f32.mrb[32].mxu0 }
 0x6b8   : > { %v9678_v35 = vpop.f32.mrb[33].mxu0 }
 0x6b9   : > { %v4642_v45 = vpop.f32.mrb[60].mxu1  ;;  %v4602_v47 = vpop.f32.mrb[34].mxu0 }
 0x6ba   : > { %v9684_v55 = vpop.f32.mrb[61].mxu1  ;;  %v9679_v11 = vpop.f32.mrb[35].mxu0 }
 0x6bb   : > { %v4645_v59 = vpop.f32.mrb[62].mxu1 }
 0x6bc   : > { %v9685_v21 = vpop.f32.mrb[63].mxu1 }
 0x6bf   : > { %v4685_v49 = vpop.f32.mrb[36].mxu0 }
 0x6c0   : > { %v9690_v6 = vpop.f32.mrb[37].mxu0 }
 0x6c1   : > { %v4728_v28 = vpop.f32.mrb[64].mxu1  ;;  %v4688_v50 = vpop.f32.mrb[38].mxu0 }
 0x6c2   : > { %v9696_v51 = vpop.f32.mrb[65].mxu1  ;;  %v9691_v19 = vpop.f32.mrb[39].mxu0 }
 0x6c3   : > { %v4731_v29 = vpop.f32.mrb[66].mxu1 }
 0x6c4   : > { %v9697_v26 = vpop.f32.mrb[67].mxu1 }
 0x6c7   : > { %v5899_v12 = vpop.f32.mrb[40].mxu0 }
 0x6c8   : > { %6206 = vxpose.xlu1.b32.start.end [1/1] (short) (narrow) %v5899_v12, 8  ;;  %v9702_v5 = vpop.f32.mrb[41].mxu0 }
 0x6c9   : > { %v5942_v10 = vpop.f32.mrb[68].mxu1  ;;  %v5902_v60 = vpop.f32.mrb[42].mxu0 }
 0x6ca   : > { %v9708_v57 = vpop.f32.mrb[69].mxu1  ;;  %6238 = vxpose.xlu0.b32.start.end [1/1] (short) (narrow) %v5942_v10, 8  ;;  %v9703_v27 = vpop.f32.mrb[43].mxu0 }
 0x6cb   : > { %v5945_v38 = vpop.f32.mrb[70].mxu1 }
 0x6cc   : > { %v9709_v1 = vpop.f32.mrb[71].mxu1 }
 0x6cf   : > { %v5985_v44 = vpop.f32.mrb[44].mxu0 }
 0x6d0   : > { %6270 = vxpose.xlu0.b32.start.end [1/1] (short) (narrow) %v5985_v44, 8  ;;  %v9714_v24 = vpop.f32.mrb[45].mxu0 }
 0x6d1   : > { %v6028_v39 = vpop.f32.mrb[72].mxu1  ;;  %v5988_v4 = vpop.f32.mrb[46].mxu0 }
 0x6d2   : > { %v9720_v8 = vpop.f32.mrb[73].mxu1  ;;  %6302 = vxpose.xlu1.b32.start.end [1/1] (short) (narrow) %v6028_v39, 8  ;;  %v9715_v61 = vpop.f32.mrb[47].mxu0 }
 0x6d3   : > { %v6031_v54 = vpop.f32.mrb[74].mxu1  ;;  %v11731_v4 = vpop.permute.xlu1 %2050 }
 0x6d4   : > { %v9721_v58 = vpop.f32.mrb[75].mxu1 }
 0x6d7   : > { %v6071_v41 = vpop.f32.mrb[48].mxu0 }
 0x6d8   : > { %6334 = vxpose.xlu0.b32.start.end [1/1] (short) (narrow) %v6071_v41, 8  ;;  %v9726_v37 = vpop.f32.mrb[49].mxu0 }
 0x6d9   : > { %v6114_v30 = vpop.f32.mrb[76].mxu1  ;;  %v6074_v9 = vpop.f32.mrb[50].mxu0 }
 0x6da   : > { %6366 = vxpose.xlu1.b32.start.end [1/1] (short) (narrow) %v6114_v30, 8  ;;  %v9732_v23 = vpop.f32.mrb[77].mxu1  ;;  %v9727_v20 = vpop.f32.mrb[51].mxu0 }
 0x6db   : > { %v6117_v36 = vpop.f32.mrb[78].mxu1 }
 0x6dc   : > { %v9733_v22 = vpop.f32.mrb[79].mxu1 }
 0x6de   : > { %4766 = vxpose.xlu1.b32.start.end [1/1] (short) (narrow) %v4470_v32, 8 }
 0x6df   : > { %v6157_v43 = vpop.f32.mrb[52].mxu0 }
 0x6e0   : > { %6398 = vxpose.xlu0.b32.start.end [1/1] (short) (narrow) %v6157_v43, 8  ;;  %v9738_v0 = vpop.f32.mrb[53].mxu0 }
 0x6e1   : > { %v6160_v13 = vpop.f32.mrb[54].mxu0  ;;  %v6200_v16 = vpop.f32.mrb[80].mxu1 }
 0x6e2   : > { %4830 = vxpose.xlu1.b32.start.end [1/1] (short) (narrow) %v4556_v46, 8  ;;  %v9744_v62 = vpop.f32.mrb[81].mxu1  ;;  %v9739_v40 = vpop.f32.mrb[55].mxu0 }
 0x6e3   : > { %v6203_v48 = vpop.f32.mrb[82].mxu1 }
 0x6e4   : > { %4798 = vxpose.xlu0.b32.start.end [1/1] (short) (narrow) %v11712_v17, 8  ;;  %v9745_v56 = vpop.f32.mrb[83].mxu1 }
 0x6e6   : > { %4894 = vxpose.xlu1.b32.start.end [1/1] (short) (narrow) %v4642_v45, 8 }
 0x6e8   : > { %v11715_v14 = vpop.f32.mrb[56].mxu0  ;;  %4862 = vxpose.xlu0.b32.start.end [1/1] (short) (narrow) %v4599_v25, 8 }
 0x6e9   : > { %v9750_v33 = vpop.f32.mrb[57].mxu0 }
 0x6ea   : > { %v6635_v31 = vpop.f32.mrb[58].mxu0  ;;  %v11717_v35 = vpop.f32.mrb[84].mxu1  ;;  %4958 = vxpose.xlu1.b32.start.end [1/1] (short) (narrow) %v4728_v28, 8 }
 0x6eb   : > { %v9756_v32 = vpop.f32.mrb[85].mxu1  ;;  %v9751_v47 = vpop.f32.mrb[59].mxu0 }
 0x6ec   : > { %v6675_v55 = vpop.f32.mrb[86].mxu1  ;;  %4926 = vxpose.xlu0.b32.start.end [1/1] (short) (narrow) %v4685_v49, 8 }
 0x6ed   : > { %v9757_v46 = vpop.f32.mrb[87].mxu1 }
 0x6ee   : > { %6430 = vxpose.xlu1.b32.start.end [1/1] (short) (narrow) %v6200_v16, 8 }
 0x6f0   : > { %v11719_v11 = vpop.f32.mrb[60].mxu0 }
 0x6f1   : > { %v9762_v59 = vpop.f32.mrb[61].mxu0 }
 0x6f2   : > { %v6715_v17 = vpop.f32.mrb[62].mxu0  ;;  %v11721_v21 = vpop.f32.mrb[88].mxu1 }
 0x6f3   : > { %v9763_v45 = vpop.f32.mrb[63].mxu0  ;;  %v9768_v6 = vpop.f32.mrb[89].mxu1 }
 0x6f4   : > { %v6755_v25 = vpop.f32.mrb[90].mxu1 }
 0x6f5   : > { %v9769_v50 = vpop.f32.mrb[91].mxu1 }
 0x6f8   : > { %v11723_v51 = vpop.f32.mrb[64].mxu0 }
 0x6f9   : > { %v9774_v19 = vpop.f32.mrb[65].mxu0 }
 0x6fa   : > { %v6795_v28 = vpop.f32.mrb[66].mxu0  ;;  %v11725_v29 = vpop.f32.mrb[92].mxu1 }
 0x6fb   : > { %v9775_v26 = vpop.f32.mrb[67].mxu0  ;;  %v9780_v49 = vpop.f32.mrb[93].mxu1 }
 0x6fc   : > { %v6835_v12 = vpop.f32.mrb[94].mxu1 }
 0x6fd   : > { %v9781_v5 = vpop.f32.mrb[95].mxu1 }
 0x700   : > { %v11727_v10 = vpop.f32.mrb[68].mxu0 }
 0x701   : > { %v9786_v60 = vpop.f32.mrb[69].mxu0 }
 0x702   : > { %v6875_v57 = vpop.f32.mrb[70].mxu0  ;;  %v11729_v27 = vpop.f32.mrb[96].mxu1 }
 0x703   : > { %v9787_v38 = vpop.f32.mrb[71].mxu0  ;;  %v9792_v1 = vpop.f32.mrb[97].mxu1 }
 0x704   : > { %v6915_v44 = vpop.f32.mrb[98].mxu1 }
 0x705   : > { %v9793_v24 = vpop.f32.mrb[99].mxu1 }
 0x728   : > { %v4750_v39 = vpop.trf.xlu0 }
 0x748   : > { %v6222_v8 = vpop.trf.xlu1 }
 0x74a   : > { %v6254_v61 = vpop.trf.xlu0 }
 0x750   : > { %v6286_v58 = vpop.trf.xlu0 }
 0x751   : > { %v6462_v43 = vcombine.low %v6222_v8, %v6286_v58  ;;  %v6463_v19 = vcombine.high %v6222_v8, %v6286_v58 }
 0x752   : > { %v6318_v54 = vpop.trf.xlu1 }
 0x753   : > { %v6478_v22 = vcombine.low %v6254_v61, %v6318_v54  ;;  %v6470_v32 = vrot.slane %v6462_v43, %v10908_v52  ;;  %v6479_v50 = vcombine.high %v6254_v61, %v6318_v54  ;;  %v6477_v8 = vrot.slane %v6463_v19, %v10908_v52 }
 0x755   : > { %v6486_v31 = vrot.slane %v6478_v22, %v10908_v52 }
 0x757   : > { %v6526_v12 = vcombine.low %v6470_v32, %v6486_v31  ;;  %v6527_v54 = vcombine.high %v6470_v32, %v6486_v31 }
 0x758   : > { %v6350_v37 = vpop.trf.xlu0 }
 0x75a   : > { %v6382_v41 = vpop.trf.xlu1 }
 0x75e   : > { %v4782_v30 = vpop.trf.xlu1 }
 0x760   : > { %v6414_v9 = vpop.trf.xlu0 }
 0x761   : > { %v6494_v5 = vcombine.low %v6350_v37, %v6414_v9  ;;  %v6495_v61 = vcombine.high %v6350_v37, %v6414_v9 }
 0x762   : > { %v4846_v23 = vpop.trf.xlu1 }
 0x763   : > { %v5006_v20 = vcombine.low %v4782_v30, %v4846_v23  ;;  %v5007_v36 = vcombine.high %v4782_v30, %v4846_v23  ;;  %v6493_v30 = vrot.slane %v6479_v50, %v10908_v52  ;;  %v6502_v22 = vrot.slane %v6494_v5, %v10908_v52 }
 0x764   : > { %v4814_v0 = vpop.trf.xlu0  ;;  %v6509_v9 = vrot.slane %v6495_v61, %v10908_v52 }
 0x765   : > { %v4990_v13 = vcombine.low %v4750_v39, %v4814_v0  ;;  %v4991_v16 = vcombine.high %v4750_v39, %v4814_v0  ;;  %v5014_v40 = vrot.slane %v5006_v20, %v10908_v52  ;;  %v11735_v48 = vrot.slane %v5007_v36, %v10908_v52 }
 0x766   : > { %v4910_v62 = vpop.trf.xlu1  ;;  %v6534_v36 = vrot.slane %v6526_v12, %v10917_v2 }
 0x767   : > { %v4998_v56 = vrot.slane %v4990_v13, %v10908_v52  ;;  %v5005_v33 = vrot.slane %v4991_v16, %v10908_v52 }
 0x768   : > { %v4878_v47 = vpop.trf.xlu0 }
 0x769   : > { %v5054_v55 = vcombine.low %v4998_v56, %v5014_v40  ;;  %v5055_v46 = vcombine.high %v4998_v56, %v5014_v40  ;;  %v5070_v59 = vcombine.low %v5005_v33, %v11735_v48  ;;  %v5071_v17 = vcombine.high %v5005_v33, %v11735_v48 }
 0x76a   : > { %v4974_v45 = vpop.trf.xlu1 }
 0x76b   : > { %v5038_v6 = vcombine.low %v4910_v62, %v4974_v45  ;;  %v5039_v25 = vcombine.high %v4910_v62, %v4974_v45  ;;  %v5069_v62 = vrot.slane %v5055_v46, %v10917_v2  ;;  %v5078_v12 = vrot.slane %v5070_v59, %v10917_v2 }
 0x76c   : > { %v4942_v28 = vpop.trf.xlu0  ;;  %v5085_v5 = vrot.slane %v5071_v17, %v10917_v2 }
 0x76d   : > { %v5022_v26 = vcombine.low %v4878_v47, %v4942_v28  ;;  %v5023_v49 = vcombine.high %v4878_v47, %v4942_v28  ;;  %v5046_v60 = vrot.slane %v5038_v6, %v10908_v52  ;;  %v5053_v57 = vrot.slane %v5039_v25, %v10908_v52 }
 0x76e   : > { %v6446_v38 = vpop.trf.xlu1 }
 0x76f   : > { %v5030_v1 = vrot.slane %v5022_v26, %v10908_v52  ;;  %v5037_v44 = vrot.slane %v5023_v49, %v10908_v52  ;;  %v6510_v24 = vcombine.low %v6382_v41, %v6446_v38  ;;  %v6511_v39 = vcombine.high %v6382_v41, %v6446_v38 }
 0x770   : > { %v5062_v41 = vrot.slane %v5054_v55, %v10917_v2 }
 0x771   : > { %v5086_v58 = vcombine.low %v5030_v1, %v5046_v60  ;;  %v5087_v23 = vcombine.high %v5030_v1, %v5046_v60  ;;  %v5102_v20 = vcombine.low %v5037_v44, %v5053_v57  ;;  %v5103_v43 = vcombine.high %v5037_v44, %v5053_v57 }
 0x772   : > { %v6518_v0 = vrot.slane %v6510_v24, %v10908_v52  ;;  %v6525_v13 = vrot.slane %v6511_v39, %v10908_v52  ;;  %v6541_v60 = vrot.slane %v6527_v54, %v10917_v2  ;;  %v6542_v57 = vcombine.low %v6477_v8, %v6493_v30 }
 0x773   : > { %v5094_v16 = vrot.slane %v5086_v58, %v10917_v2  ;;  %v5101_v37 = vrot.slane %v5087_v23, %v10917_v2  ;;  %v5110_v56 = vrot.slane %v5102_v20, %v10917_v2  ;;  %v5117_v25 = vrot.slane %v5103_v43, %v10917_v2 }
 0x774   : > { %v6558_v40 = vcombine.low %v6502_v22, %v6518_v0  ;;  %v6559_v48 = vcombine.high %v6502_v22, %v6518_v0  ;;  %v6574_v6 = vcombine.low %v6509_v9, %v6525_v13  ;;  %v6550_v54 = vrot.slane %v6542_v57, %v10917_v2 }
 0x775   : > { %v5119_v33 = vcombine.high %v5062_v41, %v5094_v16  ;;  %v5118_v31 = vcombine.low %v5062_v41, %v5094_v16  ;;  %v5121_v32 = vcombine.high %v5069_v62, %v5101_v37  ;;  %v5120_v47 = vcombine.low %v5069_v62, %v5101_v37  ;;  %v9275_v16 = vld [vmem:[%s12324_s7 + $0x3] ss:$0 sm:$0xff]  ;;  %v9274_v37 = vld [vmem:[%s12324_s7 + $0x2] ss:$0 sm:$0xff] }
 0x776   : > { %v6566_v45 = vrot.slane %v6558_v40, %v10917_v2  ;;  %v6573_v55 = vrot.slane %v6559_v48, %v10917_v2  ;;  %v5123_v38 = vcombine.high %v5078_v12, %v5110_v56  ;;  %v5122_v1 = vcombine.low %v5078_v12, %v5110_v56 }
 0x777   : > { %v6673_v46 = vadd.f32 %v11717_v35, %v5119_v33  ;;  %v6633_v50 = vadd.f32 %v11715_v14, %v5118_v31  ;;  %v6753_v19 = vadd.f32 %v11721_v21, %v5121_v32  ;;  %v6713_v28 = vadd.f32 %v11719_v11, %v5120_v47  ;;  %v9277_v47 = vld [vmem:[%s12324_s7 + $0x5] ss:$0 sm:$0xff] }
 0x778   : > { %v6591_v26 = vcombine.high %v6534_v36, %v6566_v45  ;;  %v6590_v49 = vcombine.low %v6534_v36, %v6566_v45  ;;  %v5125_v35 = vcombine.high %v5085_v5, %v5117_v25  ;;  %v6593_v44 = vcombine.high %v6541_v60, %v6573_v55 }
 0x779   : > { %v6582_v14 = vrot.slane %v6574_v6, %v10917_v2  ;;  %v6575_v21 = vcombine.high %v6509_v9, %v6525_v13  ;;  %v5124_v24 = vcombine.low %v5085_v5, %v5117_v25  ;;  %v6592_v11 = vcombine.low %v6541_v60, %v6573_v55  ;;  %v9276_v55 = vld [vmem:[%s12324_s7 + $0x4] ss:$0 sm:$0xff]  ;;  %v9278_v5 = vld [vmem:[%s12324_s7 + $0x6] ss:$0 sm:$0xff] }
 0x77a   : > { %6950 = vxpose.xlu1.b32.start.end [1/1] (short) (narrow) %v6591_v26, 8  ;;  %6918 = vxpose.xlu0.b32.start.end [1/1] (short) (narrow) %v6590_v49, 8  ;;  %v6833_v39 = vadd.f32 %v11725_v29, %v5123_v38  ;;  %v6793_v59 = vadd.f32 %v11723_v51, %v5122_v1  ;;  %v6913_v17 = vadd.f32 %v11729_v27, %v5125_v35  ;;  %v9279_v49 = vld [vmem:[%s12324_s7 + $0x7] ss:$0 sm:$0xff] }
 0x77b   : > { %v6873_v61 = vadd.f32 %v11727_v10, %v5124_v24  ;;  %v6543_v58 = vcombine.high %v6477_v8, %v6493_v30  ;;  %v6595_v23 = vcombine.high %v6550_v54, %v6582_v14  ;;  %v6594_v20 = vcombine.low %v6550_v54, %v6582_v14  ;;  %v9272_v10 = vld [vmem:[%s12324_s7] ss:$0 sm:$0xff]  ;;  %v9273_v30 = vld [vmem:[%s12324_s7 + $0x1] ss:$0 sm:$0xff] }
 0x77c   : > { %v6589_v36 = vrot.slane %v6575_v21, %v10917_v2 }
 0x77d   : > { %v6557_v22 = vrot.slane %v6543_v58, %v10917_v2 }
 0x77e   : > { %7014 = vxpose.xlu1.b32.start.end [1/1] (short) (narrow) %v6593_v44, 8  ;;  %6982 = vxpose.xlu0.b32.start.end [1/1] (short) (narrow) %v6592_v11, 8 }
 0x77f   : > { %v6597_v29 = vcombine.high %v6557_v22, %v6589_v36  ;;  %v6596_v43 = vcombine.low %v6557_v22, %v6589_v36 }
 0x782   : > { %7078 = vxpose.xlu1.b32.start.end [1/1] (short) (narrow) %v6595_v23, 8  ;;  %7046 = vxpose.xlu0.b32.start.end [1/1] (short) (narrow) %v6594_v20, 8 }
 0x786   : > { %7142 = vxpose.xlu1.b32.start.end [1/1] (short) (narrow) %v6597_v29, 8  ;;  %7110 = vxpose.xlu0.b32.start.end [1/1] (short) (narrow) %v6596_v43, 8 }
 0x7fa   : > { %v6966_v51 = vpop.trf.xlu1  ;;  %v6934_v27 = vpop.trf.xlu0 }
 0x7fb   : > { %v7175_v8 = vadd.f32 %v6966_v51, %v6673_v46  ;;  %v7174_v0 = vadd.f32 %v6934_v27, %v6633_v50 }
 0x7fd   : > { %v7238_v13 = vadd.f32 %v9272_v10, %v7174_v0  ;;  %v7239_v41 = vadd.f32 %v9273_v30, %v7175_v8 }
 0x7fe   : > { %v7030_v62 = vpop.trf.xlu1  ;;  %v6998_v9 = vpop.trf.xlu0 }
 0x7ff   : > { %v7177_v40 = vadd.f32 %v7030_v62, %v6753_v19  ;;  %v7176_v48 = vadd.f32 %v6998_v9, %v6713_v28  ;;  %v7250_v56 = vsel %vm7246_vm3, %v7239_v41, -inf  ;;  %v7247_v33 = vsel %vm7246_vm3, %v7238_v13, -inf }
 0x800   : > { %7251 = vmax.xlane.f32.xlu1 %v7250_v56  ;;  %7248 = vmax.xlane.f32.xlu0 %v7247_v33 }
 0x801   : > { %v7241_v31 = vadd.f32 %v9275_v16, %v7177_v40  ;;  %v7240_v32 = vadd.f32 %v9274_v37, %v7176_v48 }
 0x802   : > { %v7094_v45 = vpop.trf.xlu1  ;;  %v7062_v6 = vpop.trf.xlu0 }
 0x803   : > { %v7179_v25 = vadd.f32 %v7094_v45, %v6833_v39  ;;  %v7178_v46 = vadd.f32 %v7062_v6, %v6793_v59  ;;  %v7256_v50 = vsel %vm7246_vm3, %v7241_v31, -inf  ;;  %v7253_v19 = vsel %vm7246_vm3, %v7240_v32, -inf }
 0x804   : > { %7257 = vmax.xlane.f32.xlu0 %v7256_v50  ;;  %7254 = vmax.xlane.f32.xlu1 %v7253_v19 }
 0x805   : > { %v11799_v28 = vadd.f32 %v9277_v47, %v7179_v25  ;;  %v7242_v26 = vadd.f32 %v9276_v55, %v7178_v46 }
 0x806   : > { %v7158_v12 = vpop.trf.xlu1  ;;  %v7126_v60 = vpop.trf.xlu0 }
 0x807   : > { %v7181_v57 = vadd.f32 %v7158_v12, %v6913_v17  ;;  %v7180_v38 = vadd.f32 %v7126_v60, %v6873_v61  ;;  %v7262_v1 = vsel %vm7246_vm3, %v11799_v28, -inf  ;;  %v7259_v35 = vsel %vm7246_vm3, %v7242_v26, -inf }
 0x808   : > { %7263 = vmax.xlane.f32.xlu0 %v7262_v1  ;;  %7260 = vmax.xlane.f32.xlu1 %v7259_v35 }
 0x809   : > { %v11810_v44 = vadd.f32 %v9279_v49, %v7181_v57  ;;  %v11812_v14 = vadd.f32 %v9278_v5, %v7180_v38 }
 0x80b   : > { %v7268_v21 = vsel %vm7246_vm3, %v11810_v44, -inf  ;;  %v7265_v24 = vsel %vm7246_vm3, %v11812_v14, -inf }
 0x80c   : > { %7269 = vmax.xlane.f32.xlu0 %v7268_v21  ;;  %7266 = vmax.xlane.f32.xlu1 %v7265_v24 }
 0x81d   : > { %2062 = vrot.lane.b32.xlu1 %v11480_v42, %s10338_s8 }
 0x822   : > { %2056 = vrot.lane.b32.xlu0 %v11480_v42, %s10336_s0 }
 0x88d   : > { %v7252_v11 = vpop.xlane.xlu1 %7251  ;;  %v7249_v39 = vpop.xlane.xlu0 %7248 }
 0x88e   : > { %v7272_v59 = vsub.f32 %v7239_v41, %v7252_v11  ;;  %v7271_v17 = vsub.f32 %v7238_v13, %v7249_v39 }
 0x890   : > { %v7281_v61 = vmul.f32 1.442695, %v7272_v59  ;;  %v7279_v54 = vmul.f32 1.442695, %v7271_v17 }
 0x891   : > { %v7255_v58 = vpop.xlane.xlu1 %7254  ;;  %v7258_v23 = vpop.xlane.xlu0 %7257 }
 0x892   : > { %10101 = vpow2.f32 %v7281_v61  ;;  %v7273_v20 = vsub.f32 %v7240_v32, %v7255_v58  ;;  %v7274_v36 = vsub.f32 %v7241_v31, %v7258_v23 }
 0x893   : > { %10103 = vpow2.f32 %v7279_v54 }
 0x894   : > { %v7283_v22 = vmul.f32 1.442695, %v7273_v20  ;;  %v7285_v29 = vmul.f32 1.442695, %v7274_v36 }
 0x895   : > { %v7261_v43 = vpop.xlane.xlu1 %7260  ;;  %v11822_v51 = vpop.xlane.xlu0 %7263 }
 0x896   : > { %10105 = vpow2.f32 %v7283_v22  ;;  %v7275_v10 = vsub.f32 %v7242_v26, %v7261_v43 }
 0x897   : > { %10107 = vpow2.f32 %v7285_v29 }
 0x898   : > { %v7287_v27 = vmul.f32 1.442695, %v7275_v10 }
 0x899   : > { %v11824_v30 = vpop.xlane.xlu1 %7266  ;;  %v11826_v8 = vpop.xlane.xlu0 %7269 }
 0x89a   : > { %10109 = vpow2.f32 %v7287_v27 }
 0x89c   : > { %v11828_v0 = vpop.eup %10101 }
 0x89d   : > { %v11830_v13 = vpop.eup %10103  ;;  %v2063_v41 = vpop.permute.xlu1 %2062  ;;  %v7298_v62 = vsel %vm7246_vm3, %v11828_v0, 0.0 }
 0x89e   : > { %v2057_v16 = vpop.permute.xlu0 %2056  ;;  %v2084_v37 = vcombine.low %v11731_v4, %v2063_v41  ;;  %v2085_v9 = vcombine.high %v11731_v4, %v2063_v41  ;;  %7299 = vadd.xlane.f32.xlu0 %v7298_v62  ;;  %v7295_v56 = vsel %vm7246_vm3, %v11830_v13, 0.0 }
 0x89f   : > { %v2068_v40 = vcombine.low %v11480_v42, %v2057_v16  ;;  %v2069_v48 = vcombine.high %v11480_v42, %v2057_v16  ;;  %7296 = vadd.xlane.f32.xlu1 %v7295_v56 }
 0x8a0   : > { %v11840_v33 = vpop.eup %10105  ;;  %v2092_v31 = vrot.slane %v2084_v37, %v10908_v52  ;;  %v2099_v32 = vrot.slane %v2085_v9, %v10908_v52  ;;  %v7276_v37 = vsub.f32 %v11799_v28, %v11822_v51  ;;  %v7277_v9 = vsub.f32 %v11812_v14, %v11824_v30 }
 0x8a1   : > { %v2076_v47 = vrot.slane %v2068_v40, %v10908_v52  ;;  %v11845_v45 = vpop.eup %10107  ;;  %v2083_v4 = vrot.slane %v2069_v48, %v10908_v52  ;;  %v7301_v55 = vsel %vm7246_vm3, %v11840_v33, 0.0  ;;  %v7278_v28 = vsub.f32 %v11810_v44, %v11826_v8 }
 0x8a2   : > { %v7304_v25 = vsel %vm7246_vm3, %v11845_v45, 0.0  ;;  %v7289_v40 = vmul.f32 1.442695, %v7276_v37  ;;  %v7291_v48 = vmul.f32 1.442695, %v7277_v9 }
 0x8a3   : > { %v2100_v42 = vcombine.low %v2076_v47, %v2092_v31  ;;  %v2101_v6 = vcombine.high %v2076_v47, %v2092_v31  ;;  %v2116_v46 = vcombine.low %v2083_v4, %v2099_v32  ;;  %v2117_v50 = vcombine.high %v2083_v4, %v2099_v32  ;;  %7305 = vadd.xlane.f32.xlu0 %v7304_v25 }
 0x8a4   : > { %v11852_v19 = vpop.eup %10109  ;;  %7302 = vadd.xlane.f32.xlu1 %v7301_v55  ;;  %10111 = vpow2.f32 %v7289_v40  ;;  %v7293_v14 = vmul.f32 1.442695, %v7278_v28 }
 0x8a5   : > { %v2108_v26 = vrot.slane %v2100_v42, %v10917_v2  ;;  %v2115_v49 = vrot.slane %v2101_v6, %v10917_v2  ;;  %v2124_v12 = vrot.slane %v2116_v46, %v10917_v2  ;;  %v2131_v5 = vrot.slane %v2117_v50, %v10917_v2 }
 0x8a6   : > { %v7307_v60 = vsel %vm7246_vm3, %v11852_v19, 0.0  ;;  %10113 = vpow2.f32 %v7291_v48 }
 0x8a7   : > { %v2204_v57 = vcombine.low %v2108_v26, %v2115_v49  ;;  %v9220_v38 = vcombine.high %v2108_v26, %v2115_v49  ;;  %v2220_v1 = vcombine.low %v2124_v12, %v2131_v5  ;;  %v9221_v35 = vcombine.high %v2124_v12, %v2131_v5  ;;  %7308 = vadd.xlane.f32.xlu0 %v7307_v60 }
 0x8a8   : > { %10115 = vpow2.f32 %v7293_v14 }
 0x8a9   : > { %v2211_v21 = vrot.slane %v2204_v57, %v10908_v52  ;;  %v2219_v24 = vrot.slane %v9220_v38, %v10908_v52  ;;  %v2227_v11 = vrot.slane %v2220_v1, %v10908_v52  ;;  %v2235_v39 = vrot.slane %v9221_v35, %v10908_v52 }
 0x8ab   : > { %v2236_v59 = vcombine.low %v2211_v21, %v2219_v24  ;;  %v2237_v17 = vcombine.high %v2211_v21, %v2219_v24  ;;  %v2252_v61 = vcombine.low %v2227_v11, %v2235_v39  ;;  %v2253_v54 = vcombine.high %v2227_v11, %v2235_v39 }
 0x8ad   : > { %v2244_v58 = vrot.slane %v2236_v59, %v10917_v2  ;;  %v2251_v23 = vrot.slane %v2237_v17, %v10917_v2  ;;  %v2260_v20 = vrot.slane %v2252_v61, %v10917_v2  ;;  %v2267_v36 = vrot.slane %v2253_v54, %v10917_v2 }
 0x8ae   : > { %v11880_v56 = vpop.eup %10111 }
 0x8af   : > { %v2268_v22 = vcombine.low %v2244_v58, %v2260_v20  ;;  %v2269_v29 = vcombine.high %v2244_v58, %v2260_v20  ;;  %v2270_v43 = vcombine.low %v2251_v23, %v2267_v36  ;;  %v2271_v10 = vcombine.high %v2251_v23, %v2267_v36 }
 0x8b0   : > { %v11882_v31 = vpop.eup %10113  ;;  %v7310_v32 = vsel %vm7246_vm3, %v11880_v56, 0.0 }
 0x8b1   : > { %v2340_v27 = vpack.c.bf16 %v2268_v22, %v2268_v22  ;;  %v2341_v41 = vpack.c.bf16 %v2269_v29, %v2269_v29  ;;  %v7313_v47 = vsel %vm7246_vm3, %v11882_v31, 0.0  ;;  %v2343_v44 = vpack.c.bf16 %v2271_v10, %v2271_v10 }
 0x8b2   : > { %v11892_v51 = vpop.eup %10115  ;;  %v2342_v49 = vpack.c.bf16 %v2270_v43, %v2270_v43 }
 0x8b3   : > { %v7348_v16 = vsel %vm7346_vm4, %v2340_v27, 0  ;;  %v7394_v62 = vsel %vm7346_vm4, %v2341_v41, 0  ;;  %v7316_v30 = vsel %vm7246_vm3, %v11892_v51, 0.0  ;;  %v7486_v60 = vsel %vm7346_vm4, %v2343_v44, 0 }
 0x8b4   : > { %9795 = vmatpush3.bf16.msra.mxu0 %v7348_v16  ;;  %9801 = vmatpush3.bf16.msra.mxu1 %v7394_v62 }
 0x8b5   : > { %2058 = vrot.lane.b32.xlu1 %v11382_v3, %s10336_s0  ;;  %9806 = vmatprep.subr.bf16.mxu0 %v10335_v7 }
 0x8b6   : > { %9812 = vmatprep.subr.bf16.mxu1 %v10335_v7 }
 0x8bd   : > { %2052 = vrot.lane.b32.xlu0 %v11382_v3, %s10337_s25 }
 0x8d9   : > { %7311 = vadd.xlane.f32.xlu1 %v7310_v32 }
 0x8dc   : > { %7314 = vadd.xlane.f32.xlu0 %v7313_v47 }
 0x8ea   : > { %2064 = vrot.lane.b32.xlu1 %v11382_v3, %s10338_s8 }
 0x90e   : > { %7317 = vadd.xlane.f32.xlu1 %v7316_v30 }
 0x92b   : > { %v7300_v4 = vpop.xlane.xlu0 %7299 }
 0x92c   : > { %10117 = vrcp.f32 %v7300_v4  ;;  %v7297_v55 = vpop.xlane.xlu1 %7296 }
 0x92d   : > { %10119 = vrcp.f32 %v7297_v55 }
 0x930   : > { %v7306_v42 = vpop.xlane.xlu0 %7305 }
 0x931   : > { %v7303_v6 = vpop.xlane.xlu1 %7302  ;;  %10121 = vrcp.f32 %v7306_v42 }
 0x932   : > { %10123 = vrcp.f32 %v7303_v6 }
 0x934   : > { %v7309_v21 = vpop.xlane.xlu0 %7308 }
 0x935   : > { %10125 = vrcp.f32 %v7309_v21 }
 0x936   : > { %v10118_v25 = vpop.eup %10117 }
 0x937   : > { %v7328_v46 = vmul.f32 %v10118_v25, %v11828_v0  ;;  %v10120_v8 = vpop.eup %10119  ;;  %v7440_v0 = vsel %vm7346_vm4, %v2342_v49, 0 }
 0x938   : > { %v7327_v50 = vmul.f32 %v10120_v8, %v11830_v13  ;;  %v2053_v39 = vpop.permute.xlu0 %2052 }
 0x939   : > { %v7336_v26 = vpack.c.bf16 %v7328_v46, %v7328_v46 }
 0x93a   : > { %v7335_v5 = vpack.c.bf16 %v7327_v50, %v7327_v50 }
 0x93b   : > { %v10122_v12 = vpop.eup %10121  ;;  %9803 = vmatmul.mubr.msk.bf16.vlgmr.msra.gmra.mrb[100].mxu1 %vm7246_vm3, %v7336_v26 }
 0x93c   : > { %v10124_v57 = vpop.eup %10123  ;;  %9813 = vmatpush3.bf16.msra.mxu1 %v7486_v60  ;;  %9814 = vmatprep.mubr.msk.bf16.mxu1 %vm10339_vm0, %v10335_v7  ;;  %v7330_v38 = vmul.f32 %v10122_v12, %v11845_v45  ;;  %v2059_v45 = vpop.permute.xlu1 %2058 }
 0x93d   : > { %9797 = vmatmul.mubr.msk.bf16.vlgmr.msra.gmra.mrb[72].mxu0 %vm7246_vm3, %v7335_v5  ;;  %9824 = vmatprep.subr.bf16.mxu1 %v10335_v7  ;;  %v7329_v13 = vmul.f32 %v10124_v57, %v11840_v33  ;;  %v2136_v11 = vcombine.low %v11382_v3, %v2059_v45  ;;  %v2137_v33 = vcombine.high %v11382_v3, %v2059_v45 }
 0x93e   : > { %9807 = vmatpush3.bf16.msra.mxu0 %v7440_v0  ;;  %9808 = vmatprep.mubr.msk.bf16.mxu0 %vm10339_vm0, %v10335_v7  ;;  %v7338_v1 = vpack.c.bf16 %v7330_v38, %v7330_v38 }
 0x93f   : > { %9818 = vmatprep.subr.bf16.mxu0 %v10335_v7  ;;  %v7337_v35 = vpack.c.bf16 %v7329_v13, %v7329_v13  ;;  %v2144_v54 = vrot.slane %v2136_v11, %v10908_v52  ;;  %v2151_v58 = vrot.slane %v2137_v33, %v10908_v52  ;;  %v10126_v42 = vpop.eup %10125 }
 0x940   : > { %v7331_v5 = vmul.f32 %v10126_v42, %v11852_v19 }
 0x942   : > { %v7339_v45 = vpack.c.bf16 %v7331_v5, %v7331_v5 }
 0x943   : > { %9815 = vmatmul.mubr.msk.bf16.vlgmr.msra.gmra.mrb[104].mxu1 %vm7246_vm3, %v7338_v1 }
 0x944   : > { %9826 = vmatprep.mubr.msk.bf16.mxu1 %vm10339_vm0, %v10335_v7 }
 0x945   : > { %9809 = vmatmul.mubr.msk.bf16.vlgmr.msra.gmra.mrb[76].mxu0 %vm7246_vm3, %v7337_v35 }
 0x946   : > { %9820 = vmatprep.mubr.msk.bf16.mxu0 %vm10339_vm0, %v10335_v7 }
 0x966   : > { %v7312_v24 = vpop.xlane.xlu1 %7311 }
 0x967   : > { %10127 = vrcp.f32 %v7312_v24 }
 0x969   : > { %v7315_v28 = vpop.xlane.xlu0 %7314 }
 0x96a   : > { %v2065_v59 = vpop.permute.xlu1 %2064  ;;  %10129 = vrcp.f32 %v7315_v28 }
 0x96b   : > { %v2152_v17 = vcombine.low %v2053_v39, %v2065_v59  ;;  %v2153_v61 = vcombine.high %v2053_v39, %v2065_v59 }
 0x96d   : > { %v2160_v23 = vrot.slane %v2152_v17, %v10908_v52  ;;  %v2167_v20 = vrot.slane %v2153_v61, %v10908_v52 }
 0x96f   : > { %v2168_v36 = vcombine.low %v2144_v54, %v2160_v23  ;;  %v2169_v22 = vcombine.high %v2144_v54, %v2160_v23  ;;  %v2184_v29 = vcombine.low %v2151_v58, %v2167_v20  ;;  %v2185_v43 = vcombine.high %v2151_v58, %v2167_v20 }
 0x971   : > { %v2176_v3 = vrot.slane %v2168_v36, %v10917_v2  ;;  %v2183_v10 = vrot.slane %v2169_v22, %v10917_v2  ;;  %v2192_v27 = vrot.slane %v2184_v29, %v10917_v2  ;;  %v2199_v41 = vrot.slane %v2185_v43, %v10917_v2  ;;  %v10128_v8 = vpop.eup %10127 }
 0x972   : > { %v7332_v60 = vmul.f32 %v10128_v8, %v11880_v56 }
 0x973   : > { %v2272_v16 = vcombine.low %v2176_v3, %v2183_v10  ;;  %v9222_v62 = vcombine.high %v2176_v3, %v2183_v10  ;;  %v2288_v37 = vcombine.low %v2192_v27, %v2199_v41  ;;  %v9223_v9 = vcombine.high %v2192_v27, %v2199_v41 }
 0x974   : > { %v7340_v21 = vpack.c.bf16 %v7332_v60, %v7332_v60  ;;  %v10130_v24 = vpop.eup %10129 }
 0x975   : > { %v2279_v40 = vrot.slane %v2272_v16, %v10908_v52  ;;  %v2287_v48 = vrot.slane %v9222_v62, %v10908_v52  ;;  %v2295_v32 = vrot.slane %v2288_v37, %v10908_v52  ;;  %v2303_v47 = vrot.slane %v9223_v9, %v10908_v52 }
 0x976   : > { %v7333_v11 = vmul.f32 %v10130_v24, %v11882_v31 }
 0x977   : > { %v2304_v14 = vcombine.low %v2279_v40, %v2287_v48  ;;  %v2320_v30 = vcombine.low %v2295_v32, %v2303_v47  ;;  %v2305_v4 = vcombine.high %v2279_v40, %v2287_v48  ;;  %v2321_v55 = vcombine.high %v2295_v32, %v2303_v47  ;;  %v10014_v47 = vld [vmem:[%s10669_s22 + $0x8] sm:$0xff]  }
 0x978   : > { %v7341_v33 = vpack.c.bf16 %v7333_v11, %v7333_v11 }
 0x979   : > { %v2312_v6 = vrot.slane %v2304_v14, %v10917_v2  ;;  %v2328_v25 = vrot.slane %v2320_v30, %v10917_v2  ;;  %v2319_v46 = vrot.slane %v2305_v4, %v10917_v2  ;;  %v2335_v44 = vrot.slane %v2321_v55, %v10917_v2 }
 0x97b   : > { %v2336_v50 = vcombine.low %v2312_v6, %v2328_v25  ;;  %v2337_v26 = vcombine.high %v2312_v6, %v2328_v25  ;;  %v2338_v49 = vcombine.low %v2319_v46, %v2335_v44  ;;  %v2339_v12 = vcombine.high %v2319_v46, %v2335_v44  ;;  %v10015_v46 = vld [vmem:[%s10669_s22 + $0x10] sm:$0xff]  }
 0x97d   : > { %v2344_v57 = vpack.c.bf16 %v2336_v50, %v2336_v50  ;;  %v2345_v38 = vpack.c.bf16 %v2337_v26, %v2337_v26  ;;  %v2346_v1 = vpack.c.bf16 %v2338_v49, %v2338_v49  ;;  %v2347_v35 = vpack.c.bf16 %v2339_v12, %v2339_v12 }
 0x97f   : > { %v7532_v0 = vsel %vm7346_vm4, %v2344_v57, 0  ;;  %v7578_v13 = vsel %vm7346_vm4, %v2345_v38, 0  ;;  %v7624_v19 = vsel %vm7346_vm4, %v2346_v1, 0  ;;  %v7670_v56 = vsel %vm7346_vm4, %v2347_v35, 0  ;;  %v10016_v57 = vld [vmem:[%s10669_s22 + $0x18] sm:$0xff]  }
 0x980   : > { %9819 = vmatpush3.bf16.msra.mxu0 %v7532_v0  ;;  %9825 = vmatpush3.bf16.msra.mxu1 %v7578_v13 }
 0x981   : > { %9830 = vmatprep.subr.bf16.mxu0 %v10335_v7  ;;  %9836 = vmatprep.subr.bf16.mxu1 %v10335_v7 }
 0x983   : > { %9821 = vmatmul.mubr.msk.bf16.vlgmr.msra.gmra.mrb[80].mxu0 %vm7246_vm3, %v7339_v45  ;;  %9827 = vmatmul.mubr.msk.bf16.vlgmr.msra.gmra.mrb[108].mxu1 %vm7246_vm3, %v7340_v21 }
 0x984   : > { %9831 = vmatpush3.bf16.msra.mxu0 %v7624_v19  ;;  %9837 = vmatpush3.bf16.msra.mxu1 %v7670_v56  ;;  %v10017_v19 = vld [vmem:[%s10669_s22 + $0x20] sm:$0xff]  }
 0x985   : > { %9832 = vmatprep.mubr.msk.bf16.mxu0 %vm10339_vm0, %v10335_v7  ;;  %9838 = vmatprep.mubr.msk.bf16.mxu1 %vm10339_vm0, %v10335_v7 }
 0x986   : > { %9842 = vmatprep.subr.bf16.mxu0 %v10335_v7 }
 0x98b   : > { %9833 = vmatmul.mubr.msk.bf16.vlgmr.msra.gmra.mrb[84].mxu0 %vm7246_vm3, %v7341_v33 }
 0x98c   : > { %9858 = vmatprep.mubr.msk.bf16.mxu0 %vm10339_vm0, %v10335_v7 }
 0x99b   : > { %v7318_v39 = vpop.xlane.xlu1 %7317 }
 0x99c   : > { %10131 = vrcp.f32 %v7318_v39 }
 0x9a6   : > { %v10132_v59 = vpop.eup %10131 }
 0x9a7   : > { %v7334_v17 = vmul.f32 %v10132_v59, %v11892_v51  ;;  %v10013_v51 = vld [vmem:[%s10669_s22] sm:$0xff]  }
 0x9a8   : > { %9843 = vmatpush3.bf16.msra.mxu0 %v10013_v51 }
 0x9a9   : > { %v7342_v31 = vpack.c.bf16 %v7334_v17, %v7334_v17  ;;  %9844 = vmatprep.subr.bf16.mxu0 %v10335_v7 }
 0x9ab   : > { %9839 = vmatmul.mubr.msk.bf16.vlgmr.msra.gmra.mrb[112].mxu1 %vm7246_vm3, %v7342_v31 }
 0x9ac   : > { %8419 = vmatprep.mubr.bf16.mxu1 %v12320_v63  ;;  %9845 = vmatpush3.bf16.msra.mxu0 %v10014_v47 }
 0x9ad   : > { %9846 = vmatprep.subr.bf16.mxu0 %v10335_v7 }
 0x9b0   : > { %9847 = vmatpush3.bf16.msra.mxu0 %v10015_v46 }
 0x9b1   : > { %9848 = vmatprep.subr.bf16.mxu0 %v10335_v7 }
 0x9b4   : > { %9849 = vmatpush3.bf16.msra.mxu0 %v10016_v57 }
 0x9b5   : > { %9850 = vmatprep.subr.bf16.mxu0 %v10335_v7 }
 0x9b8   : > { %9851 = vmatpush3.bf16.msra.mxu0 %v10017_v19 }
 0x9b9   : > { %9852 = vmatprep.subr.bf16.mxu0 %v10335_v7 }
 0xa0e   : > { %v7430_v61 = vpop.f32.mrb[100].mxu1 }
 0xa0f   : > { %v9804_v54 = vpop.f32.mrb[101].mxu1 }
 0xa10   : > { %v7384_v58 = vpop.f32.mrb[72].mxu0  ;;  %v7433_v23 = vpop.f32.mrb[102].mxu1 }
 0xa11   : > { %v9798_v20 = vpop.f32.mrb[73].mxu0  ;;  %v9805_v36 = vpop.f32.mrb[103].mxu1 }
 0xa12   : > { %v7387_v22 = vpop.f32.mrb[74].mxu0 }
 0xa13   : > { %v9799_v29 = vpop.f32.mrb[75].mxu0 }
 0xa16   : > { %v7522_v43 = vpop.f32.mrb[104].mxu1 }
 0xa17   : > { %v7728_v3 = vcombine.low %v7430_v61, %v7522_v43  ;;  %v7729_v10 = vcombine.high %v7430_v61, %v7522_v43  ;;  %v9816_v27 = vpop.f32.mrb[105].mxu1  ;;  %v10018_v61 = vld [vmem:[%s10669_s22 + $0x28] sm:$0xff]  }
 0xa18   : > { %v7476_v41 = vpop.f32.mrb[76].mxu0  ;;  %v7525_v16 = vpop.f32.mrb[106].mxu1  ;;  %9853 = vmatpush3.bf16.msra.mxu0 %v10018_v61 }
 0xa19   : > { %v7712_v62 = vcombine.low %v7384_v58, %v7476_v41  ;;  %v7713_v37 = vcombine.high %v7384_v58, %v7476_v41  ;;  %v7736_v9 = vrot.slane %v7728_v3, %v10908_v52  ;;  %v7743_v40 = vrot.slane %v7729_v10, %v10908_v52  ;;  %v9810_v48 = vpop.f32.mrb[77].mxu0  ;;  %v9817_v32 = vpop.f32.mrb[107].mxu1  ;;  %9854 = vmatprep.subr.bf16.mxu0 %v10335_v7 }
 0xa1a   : > { %v7479_v28 = vpop.f32.mrb[78].mxu0 }
 0xa1b   : > { %v7720_v14 = vrot.slane %v7712_v62, %v10908_v52  ;;  %v7727_v30 = vrot.slane %v7713_v37, %v10908_v52  ;;  %v9811_v4 = vpop.f32.mrb[79].mxu0 }
 0xa1d   : > { %v7744_v55 = vcombine.low %v7720_v14, %v7736_v9  ;;  %v7745_v42 = vcombine.high %v7720_v14, %v7736_v9  ;;  %v7760_v6 = vcombine.low %v7727_v30, %v7743_v40  ;;  %v7761_v25 = vcombine.high %v7727_v30, %v7743_v40 }
 0xa1f   : > { %v7752_v44 = vrot.slane %v7744_v55, %v10917_v2  ;;  %v7759_v8 = vrot.slane %v7745_v42, %v10917_v2  ;;  %v7768_v50 = vrot.slane %v7760_v6, %v10917_v2  ;;  %v7775_v26 = vrot.slane %v7761_v25, %v10917_v2 }
 0xa21   : > { %v7848_v49 = vcombine.low %v7752_v44, %v7759_v8  ;;  %v9288_v12 = vcombine.high %v7752_v44, %v7759_v8  ;;  %v7864_v5 = vcombine.low %v7768_v50, %v7775_v26  ;;  %v9289_v60 = vcombine.high %v7768_v50, %v7775_v26 }
 0xa23   : > { %v7855_v38 = vrot.slane %v7848_v49, %v10908_v52  ;;  %v7863_v0 = vrot.slane %v9288_v12, %v10908_v52  ;;  %v7871_v13 = vrot.slane %v7864_v5, %v10908_v52  ;;  %v7879_v1 = vrot.slane %v9289_v60, %v10908_v52  ;;  %v10019_v60 = vld [vmem:[%s10669_s22 + $0x30] sm:$0xff]  }
 0xa24   : > { %9855 = vmatpush3.bf16.msra.mxu0 %v10019_v60 }
 0xa25   : > { %v7881_v35 = vcombine.high %v7855_v38, %v7863_v0  ;;  %v7897_v45 = vcombine.high %v7871_v13, %v7879_v1  ;;  %v7880_v21 = vcombine.low %v7855_v38, %v7863_v0  ;;  %v7896_v24 = vcombine.low %v7871_v13, %v7879_v1  ;;  %9856 = vmatprep.subr.bf16.mxu0 %v10335_v7 }
 0xa27   : > { %v11978_v56 = vrot.slane %v7881_v35, %v10917_v2  ;;  %v11981_v11 = vrot.slane %v7897_v45, %v10917_v2  ;;  %v11984_v33 = vrot.slane %v7880_v21, %v10917_v2  ;;  %v11987_v39 = vrot.slane %v7896_v24, %v10917_v2 }
 0xa29   : > { %v7914_v59 = vcombine.low %v11978_v56, %v11981_v11  ;;  %v7913_v17 = vcombine.high %v11984_v33, %v11987_v39  ;;  %v7915_v31 = vcombine.high %v11978_v56, %v11981_v11  ;;  %v7912_v54 = vcombine.low %v11984_v33, %v11987_v39 }
 0xa56   : > { %v7568_v58 = vpop.f32.mrb[80].mxu0  ;;  %v7614_v23 = vpop.f32.mrb[108].mxu1 }
 0xa57   : > { %v9822_v20 = vpop.f32.mrb[81].mxu0  ;;  %v9828_v36 = vpop.f32.mrb[109].mxu1 }
 0xa58   : > { %v7571_v22 = vpop.f32.mrb[82].mxu0  ;;  %v7617_v29 = vpop.f32.mrb[110].mxu1 }
 0xa59   : > { %v9823_v43 = vpop.f32.mrb[83].mxu0  ;;  %v9829_v3 = vpop.f32.mrb[111].mxu1 }
 0xa5e   : > { %v7660_v10 = vpop.f32.mrb[84].mxu0 }
 0xa5f   : > { %v7780_v27 = vcombine.low %v7568_v58, %v7660_v10  ;;  %v7781_v51 = vcombine.high %v7568_v58, %v7660_v10  ;;  %v9834_v41 = vpop.f32.mrb[85].mxu0 }
 0xa60   : > { %v7663_v16 = vpop.f32.mrb[86].mxu0 }
 0xa61   : > { %v9835_v62 = vpop.f32.mrb[87].mxu0  ;;  %v7788_v47 = vrot.slane %v7780_v27, %v10908_v52  ;;  %v7795_v28 = vrot.slane %v7781_v51, %v10908_v52 }
 0xa7e   : > { %v7706_v37 = vpop.f32.mrb[112].mxu1 }
 0xa7f   : > { %v7796_v9 = vcombine.low %v7614_v23, %v7706_v37  ;;  %v7797_v40 = vcombine.high %v7614_v23, %v7706_v37  ;;  %v9840_v48 = vpop.f32.mrb[113].mxu1  ;;  %v10020_v23 = vld [vmem:[%s10669_s22 + $0x38] sm:$0xff]   ;;  %s12331_s22 = sld [smem:[#allocation36_spill]] }
 0xa80   : > { %v7709_v32 = vpop.f32.mrb[114].mxu1  ;;  %9857 = vmatpush3.bf16.msra.mxu0 %v10020_v23  ;;  %v10050_v23 = vld [vmem:[%s10675_s1 + $0x8c] ss:$16 sps:$4 sm:$0xff]  }
 0xa81   : > { %v7804_v14 = vrot.slane %v7796_v9, %v10908_v52  ;;  %v7811_v30 = vrot.slane %v7797_v40, %v10908_v52  ;;  %v9841_v4 = vpop.f32.mrb[115].mxu1 }
 0xa82   : > { %v10158_v4 = vld [vmem:[#allocation2 + $0x8] sm:$0xff] }
 0xa83   : > { %v7812_v55 = vcombine.low %v7788_v47, %v7804_v14  ;;  %v7813_v42 = vcombine.high %v7788_v47, %v7804_v14  ;;  %v7828_v6 = vcombine.low %v7795_v28, %v7811_v30  ;;  %v7829_v25 = vcombine.high %v7795_v28, %v7811_v30  ;;  %v10157_v47 = vld [vmem:[#allocation2] sm:$0xff] }
 0xa85   : > { %v7820_v46 = vrot.slane %v7812_v55, %v10917_v2  ;;  %v7827_v44 = vrot.slane %v7813_v42, %v10917_v2  ;;  %v7836_v8 = vrot.slane %v7828_v6, %v10917_v2  ;;  %v7843_v50 = vrot.slane %v7829_v25, %v10917_v2  ;;  %v10021_v55 = vld [vmem:[%s10675_s1] ss:$16 sps:$4 sm:$0xff]   ;;  %v10023_v42 = vld [vmem:[%s10675_s1 + $0x4] ss:$16 sps:$4 sm:$0xff]   ;;  %v10024_v6 = vld [vmem:[%s10675_s1 + $0x8] ss:$16 sps:$4 sm:$0xff]  }
 0xa86   : > { %v10026_v25 = vld [vmem:[%s10675_s1 + $0xc] ss:$16 sps:$4 sm:$0xff]   ;;  %8387 = vmatprep.subr.bf16.mxu1 %v10023_v42 }
 0xa87   : > { %v7916_v26 = vcombine.low %v7820_v46, %v7827_v44  ;;  %v9290_v49 = vcombine.high %v7820_v46, %v7827_v44  ;;  %v7932_v12 = vcombine.low %v7836_v8, %v7843_v50  ;;  %v9291_v5 = vcombine.high %v7836_v8, %v7843_v50  ;;  %v10029_v46 = vld [vmem:[%s10675_s1 + $0x24] ss:$16 sps:$4 sm:$0xff]   ;;  %v10032_v44 = vld [vmem:[%s10675_s1 + $0x2c] ss:$16 sps:$4 sm:$0xff]   ;;  %8430 = vmatprep.subr.bf16.mxu0 %v10026_v25  ;;  %v10027_v8 = vld [vmem:[%s10675_s1 + $0x20] ss:$16 sps:$4 sm:$0xff]  }
 0xa88   : > { %8388 = vmatpush1.bf16.msra.mxu1 %v10021_v55  ;;  %v10030_v50 = vld [vmem:[%s10675_s1 + $0x28] ss:$16 sps:$4 sm:$0xff]   ;;  %v10072_v55 = vld [vmem:[%s10677_s3 + $0x80] sm:$0xff]  }
 0xa89   : > { %v7923_v57 = vrot.slane %v7916_v26, %v10908_v52  ;;  %v7931_v38 = vrot.slane %v9290_v49, %v10908_v52  ;;  %v7939_v0 = vrot.slane %v7932_v12, %v10908_v52  ;;  %v7947_v13 = vrot.slane %v9291_v5, %v10908_v52  ;;  %8389 = vmatprep.subr.bf16.mxu1 %v10029_v46  ;;  %v10073_v42 = vld [vmem:[%s10677_s3 + $0x48] sm:$0xff]  }
 0xa8a   : > { %v10075_v25 = vld [vmem:[%s10677_s3 + $0x8] sm:$0xff]  }
 0xa8b   : > { %v7949_v1 = vcombine.high %v7923_v57, %v7931_v38  ;;  %v7965_v35 = vcombine.high %v7939_v0, %v7947_v13  ;;  %v7948_v45 = vcombine.low %v7923_v57, %v7931_v38  ;;  %v7964_v21 = vcombine.low %v7939_v0, %v7947_v13  ;;  %v10035_v13 = vld [vmem:[%s10675_s1 + $0x44] ss:$16 sps:$4 sm:$0xff]   ;;  %v10076_v46 = vld [vmem:[%s10677_s3 + $0x88] sm:$0xff]  }
 0xa8c   : > { %8390 = vmatpush1.bf16.msra.mxu1 %v10027_v8  ;;  %v10078_v8 = vld [vmem:[%s10677_s3 + $0xd0] sm:$0xff]  }
 0xa8d   : > { %v7963_v24 = vrot.slane %v7949_v1, %v10917_v2  ;;  %v7979_v19 = vrot.slane %v7965_v35, %v10917_v2  ;;  %v7956_v61 = vrot.slane %v7948_v45, %v10917_v2  ;;  %v7972_v58 = vrot.slane %v7964_v21, %v10917_v2  ;;  %v10038_v1 = vld [vmem:[%s10675_s1 + $0x4c] ss:$16 sps:$4 sm:$0xff]   ;;  %v10033_v35 = vld [vmem:[%s10675_s1 + $0x40] ss:$16 sps:$4 sm:$0xff]   ;;  %v10036_v45 = vld [vmem:[%s10675_s1 + $0x48] ss:$16 sps:$4 sm:$0xff]   ;;  %8391 = vmatprep.subr.bf16.mxu1 %v10035_v13 }
 0xa8e   : > { %v10039_v21 = vld [vmem:[%s10675_s1 + $0x60] ss:$16 sps:$4 sm:$0xff]  }
 0xa8f   : > { %v7982_v20 = vcombine.low %v7963_v24, %v7979_v19  ;;  %v7981_v36 = vcombine.high %v7956_v61, %v7972_v58  ;;  %v7983_v22 = vcombine.high %v7963_v24, %v7979_v19  ;;  %v7980_v52 = vcombine.low %v7956_v61, %v7972_v58  ;;  %v10041_v24 = vld [vmem:[%s10675_s1 + $0x64] ss:$16 sps:$4 sm:$0xff]   ;;  %v10042_v19 = vld [vmem:[%s10675_s1 + $0x68] ss:$16 sps:$4 sm:$0xff]   ;;  %v10044_v61 = vld [vmem:[%s10675_s1 + $0x6c] ss:$16 sps:$4 sm:$0xff]  }
 0xa90   : > { %8392 = vmatpush1.bf16.msra.mxu1 %v10033_v35  ;;  %v10047_v58 = vld [vmem:[%s10675_s1 + $0x84] ss:$16 sps:$4 sm:$0xff]   ;;  %v10090_v35 = vld [vmem:[%s10677_s3 + $0xe8] sm:$0xff]  }
 0xa91   : > { %v9946_v29 = vpack.i.bf16 %v7982_v20, %v7914_v59  ;;  %v9941_v7 = vpack.i.bf16 %v7981_v36, %v7913_v17  ;;  %v9951_v43 = vpack.i.bf16 %v7983_v22, %v7915_v31  ;;  %8393 = vmatprep.subr.bf16.mxu1 %v10041_v24  ;;  %v10045_v20 = vld [vmem:[%s10675_s1 + $0x80] ss:$16 sps:$4 sm:$0xff]   ;;  %v10048_v36 = vld [vmem:[%s10675_s1 + $0x88] ss:$16 sps:$4 sm:$0xff]   ;;  %v10053_v22 = vld [vmem:[%s10675_s1 + $0xa4] ss:$16 sps:$4 sm:$0xff]  }
 0xa92   : > { %v10088_v13 = vld [vmem:[%s10677_s3 + $0xa0] sm:$0xff]   ;;  %v10093_v24 = vld [vmem:[%s10677_s3 + $0x70] sm:$0xff]  }
 0xa93   : > { %9947 = vrot.lane.b32.xlu1 %v9946_v29, %s10336_s0  ;;  %9942 = vrot.lane.b32.xlu0 %v9941_v7, %s10338_s8  ;;  %v10051_v29 = vld [vmem:[%s10675_s1 + $0xa0] ss:$16 sps:$4 sm:$0xff]   ;;  %v10054_v7 = vld [vmem:[%s10675_s1 + $0xa8] ss:$16 sps:$4 sm:$0xff]  }
 0xa94   : > { %8394 = vmatpush1.bf16.msra.mxu1 %v10039_v21  ;;  %v10092_v21 = vld [vmem:[%s10677_s3 + $0xa8] sm:$0xff]  }
 0xa95   : > { %8395 = vmatprep.subr.bf16.mxu1 %v10047_v58  ;;  %v10096_v58 = vld [vmem:[%s10677_s3 + $0xb0] sm:$0xff]  }
 0xa97   : > { %9952 = vrot.lane.b32.xlu0 %v9951_v43, %s10337_s25  ;;  %s12325_s25 = scalar_lea.vmem %s12243_s13, %s10685_s27  ;;  %v10059_v43 = vld [vmem:[%s10675_s1 + $0xc4] ss:$16 sps:$4 sm:$0xff]  }
 0xa98   : > { %v9292_v33 = vld [vmem:[%s12325_s25] ss:$0 sm:$0xff]  ;;  %8396 = vmatpush1.bf16.msra.mxu1 %v10045_v20  ;;  %v10098_v20 = vld [vmem:[%s10677_s3 + $0xf8] sm:$0xff]  }
 0xa99   : > { %8397 = vmatprep.subr.bf16.mxu1 %v10053_v22  ;;  %v10100_v22 = vld [vmem:[%s10677_s3 + $0xb8] sm:$0xff]  }
 0xa9c   : > { %8398 = vmatpush1.bf16.msra.mxu1 %v10051_v29  ;;  %v8221_v29 = vsub.s32 3, %v10805_v15 }
 0xa9d   : > { %8399 = vmatprep.subr.bf16.mxu1 %v10059_v43 }
 0xb05   : > { %v9948_v2 = vpop.permute.xlu1 %9947  ;;  %v9943_v3 = vpop.permute.xlu0 %9942 }
 0xb06   : > { %v9945_v10 = vunpack.i.h.bf16 %v9943_v3  ;;  %v9944_v27 = vunpack.i.l.bf16 %v9943_v3  ;;  %v9950_v51 = vunpack.i.h.bf16 %v9948_v2  ;;  %v9949_v59 = vunpack.i.l.bf16 %v9948_v2  ;;  %v10062_v2 = vld [vmem:[%s10675_s1 + $0xcc] ss:$16 sps:$4 sm:$0xff]   ;;  %v10057_v3 = vld [vmem:[%s10675_s1 + $0xc0] ss:$16 sps:$4 sm:$0xff]  }
 0xb07   : > { %8400 = vmatpush1.bf16.msra.mxu1 %v10057_v3 }
 0xb08   : > { %v8008_v17 = vsel %vm2940_vm1, %v7912_v54, %v9944_v27  ;;  %v8009_v56 = vsel %vm2940_vm1, %v7980_v52, %v9945_v10  ;;  %v10056_v52 = vld [vmem:[%s10675_s1 + $0xac] ss:$16 sps:$4 sm:$0xff]   ;;  %v10060_v10 = vld [vmem:[%s10675_s1 + $0xc8] ss:$16 sps:$4 sm:$0xff]   ;;  %v10065_v27 = vld [vmem:[%s10675_s1 + $0xe4] ss:$16 sps:$4 sm:$0xff]  }
 0xb09   : > { %v9953_v11 = vpop.permute.xlu0 %9952  ;;  %v8011_v16 = vsel %vm8010_vm5, %v8008_v17, %v9949_v59  ;;  %v8012_v62 = vsel %vm8010_vm5, %v8009_v56, %v9950_v51  ;;  %v10068_v51 = vld [vmem:[%s10675_s1 + $0xec] ss:$16 sps:$4 sm:$0xff]   ;;  %v10063_v59 = vld [vmem:[%s10675_s1 + $0xe0] ss:$16 sps:$4 sm:$0xff]   ;;  %v10066_v17 = vld [vmem:[%s10675_s1 + $0xe8] ss:$16 sps:$4 sm:$0xff]   ;;  %8401 = vmatprep.subr.bf16.mxu1 %v10065_v27 }
 0xb0a   : > { %v9955_v31 = vunpack.i.h.bf16 %v9953_v11  ;;  %v9954_v41 = vunpack.i.l.bf16 %v9953_v11  ;;  %s12326_s1 = sld [smem:[#allocation30_spill]] }
 0xb0b   : > { %8402 = vmatpush1.bf16.msra.mxu1 %v10063_v59 }
 0xb0c   : > { %v8014_v37 = vsel %vm8013_vm6, %v8011_v16, %v9954_v41  ;;  %v8015_v9 = vsel %vm8013_vm6, %v8012_v62, %v9955_v31 }
 0xb0d   : > { %v8016_v40 = vpack.c.bf16 %v8015_v9, %v8014_v37 }
 0xb0f   : > { %9859 = vmatmul.mubr.bf16.vlgmr.msra.gmra.mrb[88].mxu0 %v8016_v40 }
 0xb10   : > { %8462 = vmatprep.mubr.bf16.mxu0 %v12320_v63  ;;  %8431 = vmatpush1.bf16.msra.mxu0 %v10024_v6  ;;  %s12327_s19 = scalar_lea.vmem %s12326_s1, %s10685_s27  ;;  %v10074_v6 = vld [vmem:[%s10677_s3 + $0xc8] sm:$0xff]  }
 0xb11   : > { %8432 = vmatprep.subr.bf16.mxu0 %v10032_v44  ;;  %v9301_v9 = vld [vmem:[%s12327_s19] ss:$0 sm:$0xff] }
 0xb12   : > { %v10077_v44 = vld [vmem:[%s10677_s3 + $0x50] sm:$0xff]  }
 0xb14   : > { %8433 = vmatpush1.bf16.msra.mxu0 %v10030_v50  ;;  %v10079_v50 = vld [vmem:[%s10677_s3 + $0x10] sm:$0xff]  }
 0xb15   : > { %8434 = vmatprep.subr.bf16.mxu0 %v10038_v1  ;;  %v10089_v1 = vld [vmem:[%s10677_s3 + $0x68] sm:$0xff]  }
 0xb18   : > { %8435 = vmatpush1.bf16.msra.mxu0 %v10036_v45  ;;  %v10091_v45 = vld [vmem:[%s10677_s3 + $0x28] sm:$0xff]  }
 0xb19   : > { %8436 = vmatprep.subr.bf16.mxu0 %v10044_v61  ;;  %v10095_v61 = vld [vmem:[%s10677_s3 + $0x30] sm:$0xff]  }
 0xb1c   : > { %8437 = vmatpush1.bf16.msra.mxu0 %v10042_v19  ;;  %v10094_v19 = vld [vmem:[%s10677_s3 + $0xf0] sm:$0xff]  }
 0xb1d   : > { %8438 = vmatprep.subr.bf16.mxu0 %v10050_v23  ;;  %v10097_v23 = vld [vmem:[%s10677_s3 + $0x78] sm:$0xff]  }
 0xb20   : > { %8439 = vmatpush1.bf16.msra.mxu0 %v10048_v36  ;;  %v10099_v36 = vld [vmem:[%s10677_s3 + $0x38] sm:$0xff]  }
 0xb21   : > { %8440 = vmatprep.subr.bf16.mxu0 %v10056_v52  ;;  %v8205_v52 = vld [vmem:[%s10721_s9] sm:$0xf] }
 0xb22   : > { %v8218_v43 = vrot.slane %v8205_v52, %v1072_v53  ;;  %v8222_v3 = vrot.slane %v8205_v52, %v8221_v29 }
 0xb24   : > { %8441 = vmatpush1.bf16.msra.mxu0 %v10054_v7  ;;  %v8210_v7 = vrot.slane %v8205_v52, %v10811_v18 }
 0xb25   : > { %8442 = vmatprep.subr.bf16.mxu0 %v10062_v2  ;;  %v8214_v2 = vrot.slane %v8205_v52, %v10860_v34 }
 0xb28   : > { %8443 = vmatpush1.bf16.msra.mxu0 %v10060_v10 }
 0xb29   : > { %8444 = vmatprep.subr.bf16.mxu0 %v10068_v51 }
 0xb2c   : > { %8445 = vmatpush1.bf16.msra.mxu0 %v10066_v17 }
 0xbe2   : > { %v8122_v39 = vpop.f32.mrb[88].mxu0 }
 0xbe3   : > { %v8123_v54 = vadd.f32 %v9292_v33, %v8122_v39  ;;  %v9860_v48 = vpop.f32.mrb[89].mxu0 }
 0xbe4   : > { %v8125_v32 = vpop.f32.mrb[90].mxu0  ;;  %v9302_v48 = vld [vmem:[%s947_s10] ss:$0 sm:$0xff] }
 0xbe5   : > { %v8129_v28 = vadd.f32 %v10157_v47, %v8123_v54  ;;  %v8126_v14 = vadd.f32 %v9292_v33, %v8125_v32  ;;  %v9861_v30 = vpop.f32.mrb[91].mxu0 }
 0xbe6   : > { %v10069_v30 = vld [vmem:[%s10677_s3 + $0x40] sm:$0xff]  }
 0xbe7   : > { %v8130_v63 = vadd.f32 %v10158_v4, %v8126_v14  ;;  %8133 = vadd.xlane.f32.xlu1 %v8129_v28  ;;  %v10070_v4 = vld [vmem:[%s10677_s3 + $0xc0] sm:$0xff]   ;;  %9490 = vmatprep.subr.bf16.mxu1 %v10069_v30 }
 0xbe8   : > { %9512 = vmatprep.subr.bf16.mxu0 %v10070_v4 }
 0xbe9   : > { %8135 = vadd.xlane.f32.xlu0 %v8130_v63 }
 0xc74   : > { %v8134_v26 = vpop.xlane.xlu1 %8133 }
 0xc75   : > { %v8138_v49 = vmul.f32 0.0078125, %v8134_v26  ;;  %v10080_v26 = vld [vmem:[%s10677_s3 + $0x90] sm:$0xff]  }
 0xc76   : > { %v8136_v12 = vpop.xlane.xlu0 %8135 }
 0xc77   : > { %v12050_v5 = vsub.f32 %v8129_v28, %v8138_v49  ;;  %v8139_v60 = vmul.f32 0.0078125, %v8136_v12  ;;  %v10081_v49 = vld [vmem:[%s10677_s3 + $0x58] sm:$0xff]  }
 0xc78   : > { %v10082_v12 = vld [vmem:[%s10677_s3 + $0xd8] sm:$0xff]  }
 0xc79   : > { %v12052_v57 = vsub.f32 %v8130_v63, %v8139_v60  ;;  %v8142_v38 = vmul.f32 %v12050_v5, %v12050_v5  ;;  %v10071_v63 = vld [vmem:[%s10677_s3] sm:$0xff]   ;;  %v10084_v60 = vld [vmem:[%s10677_s3 + $0x98] sm:$0xff]  }
 0xc7b   : > { %8144 = vadd.xlane.f32.xlu0 %v8142_v38  ;;  %v8143_v0 = vmul.f32 %v12052_v57, %v12052_v57  ;;  %v10086_v38 = vld [vmem:[%s10677_s3 + $0xe0] sm:$0xff]  }
 0xc7d   : > { %8146 = vadd.xlane.f32.xlu1 %v8143_v0  ;;  %v10087_v0 = vld [vmem:[%s10677_s3 + $0x20] sm:$0xff]  }
 0xd08   : > { %v8145_v56 = vpop.xlane.xlu0 %8144 }
 0xd09   : > { %v8148_v11 = vmul.f32 0.0078125, %v8145_v56 }
 0xd0a   : > { %v8147_v31 = vpop.xlane.xlu1 %8146 }
 0xd0b   : > { %v8150_v41 = vadd.f32 1e-07, %v8148_v11  ;;  %v8149_v16 = vmul.f32 0.0078125, %v8147_v31 }
 0xd0d   : > { %10133 = vrsqrt.f32 %v8150_v41  ;;  %v8151_v62 = vadd.f32 1e-07, %v8149_v16 }
 0xd0f   : > { %10135 = vrsqrt.f32 %v8151_v62 }
 0xd17   : > { %v10134_v37 = vpop.eup %10133 }
 0xd18   : > { %v8154_v40 = vmul.f32 %v10134_v37, %v12050_v5  ;;  %v10083_v5 = vld [vmem:[%s10677_s3 + $0x18] sm:$0xff]  }
 0xd19   : > { %v10136_v33 = vpop.eup %10135 }
 0xd1a   : > { %v8155_v39 = vmul.f32 %v10136_v33, %v12052_v57  ;;  %v8162_v54 = vmul.f32 %v9301_v9, %v8154_v40  ;;  %v10085_v57 = vld [vmem:[%s10677_s3 + $0x60] sm:$0xff]  }
 0xd1c   : > { %v8163_v32 = vmul.f32 %v9301_v9, %v8155_v39  ;;  %v12094_v47 = vadd.f32 %v9302_v48, %v8162_v54 }
 0xd1e   : > { %v12096_v28 = vadd.f32 %v9302_v48, %v8163_v32 }
 0xd20   : > { %v8172_v14 = vpack.c.bf16 %v12096_v28, %v12094_v47 }
 0xd22   : > { %8420 = vmatmul.mubr.bf16.vlgmr.msra.gmra.mrb[116].mxu1 %v8172_v14  ;;  %8463 = vmatmul.mubr.bf16.vlgmr.msra.gmra.mrb[92].mxu0 %v8172_v14 }
 0xd23   : > { %9491 = vmatpush3.bf16.msra.mxu1 %v10071_v63  ;;  %9513 = vmatpush3.bf16.msra.mxu0 %v10072_v55 }
 0xd24   : > { %9492 = vmatprep.subr.bf16.mxu1 %v10073_v42  ;;  %9514 = vmatprep.subr.bf16.mxu0 %v10074_v6 }
 0xd27   : > { %9493 = vmatpush3.bf16.msra.mxu1 %v10075_v25  ;;  %9515 = vmatpush3.bf16.msra.mxu0 %v10076_v46 }
 0xd28   : > { %9494 = vmatprep.subr.bf16.mxu1 %v10077_v44  ;;  %9516 = vmatprep.subr.bf16.mxu0 %v10078_v8 }
 0xd2b   : > { %9495 = vmatpush3.bf16.msra.mxu1 %v10079_v50  ;;  %9517 = vmatpush3.bf16.msra.mxu0 %v10080_v26 }
 0xd2c   : > { %9496 = vmatprep.subr.bf16.mxu1 %v10081_v49  ;;  %9518 = vmatprep.subr.bf16.mxu0 %v10082_v12 }
 0xd2f   : > { %9497 = vmatpush3.bf16.msra.mxu1 %v10083_v5  ;;  %9519 = vmatpush3.bf16.msra.mxu0 %v10084_v60 }
 0xd30   : > { %9498 = vmatprep.subr.bf16.mxu1 %v10085_v57  ;;  %9520 = vmatprep.subr.bf16.mxu0 %v10086_v38 }
 0xd33   : > { %9499 = vmatpush3.bf16.msra.mxu1 %v10087_v0  ;;  %9521 = vmatpush3.bf16.msra.mxu0 %v10088_v13 }
 0xd34   : > { %9500 = vmatprep.subr.bf16.mxu1 %v10089_v1  ;;  %9522 = vmatprep.subr.bf16.mxu0 %v10090_v35 }
 0xd37   : > { %9501 = vmatpush3.bf16.msra.mxu1 %v10091_v45  ;;  %9523 = vmatpush3.bf16.msra.mxu0 %v10092_v21 }
 0xd38   : > { %9502 = vmatprep.subr.bf16.mxu1 %v10093_v24  ;;  %9524 = vmatprep.subr.bf16.mxu0 %v10094_v19 }
 0xd3b   : > { %9503 = vmatpush3.bf16.msra.mxu1 %v10095_v61  ;;  %9525 = vmatpush3.bf16.msra.mxu0 %v10096_v58 }
 0xd3c   : > { %9504 = vmatprep.subr.bf16.mxu1 %v10097_v23  ;;  %9526 = vmatprep.subr.bf16.mxu0 %v10098_v20 }
 0xd3f   : > { %9505 = vmatpush3.bf16.msra.mxu1 %v10099_v36  ;;  %9527 = vmatpush3.bf16.msra.mxu0 %v10100_v22 }
 0xdf5   : > { %v8421_v10 = vpop.f32.mrb[116].mxu1  ;;  %v8464_v27 = vpop.f32.mrb[92].mxu0 }
 0xdf6   : > { %v12138_v51 = vadd.f32 %v8421_v10, %v8210_v7  ;;  %v12140_v59 = vadd.f32 %v8464_v27, %v8218_v43  ;;  %v8423_v17 = vpop.f32.mrb[117].mxu1  ;;  %v8466_v56 = vpop.f32.mrb[93].mxu0 }
 0xdf7   : > { %v12142_v11 = vadd.f32 %v8423_v17, %v8214_v2  ;;  %v12144_v31 = vadd.f32 %v8466_v56, %v8222_v3  ;;  %v8425_v41 = vpop.f32.mrb[118].mxu1  ;;  %v8468_v18 = vpop.f32.mrb[94].mxu0 }
 0xdf8   : > { %v8473_v15 = vmul.f32 %v12138_v51, %v12138_v51  ;;  %v8475_v34 = vmul.f32 %v12140_v59, %v12140_v59  ;;  %v12150_v53 = vadd.f32 %v8425_v41, %v8210_v7  ;;  %v12152_v16 = vadd.f32 %v8468_v18, %v8218_v43  ;;  %v8427_v62 = vpop.f32.mrb[119].mxu1  ;;  %v8470_v37 = vpop.f32.mrb[95].mxu0 }
 0xdf9   : > { %v8474_v9 = vmul.f32 %v12142_v11, %v12142_v11  ;;  %v8476_v40 = vmul.f32 %v12144_v31, %v12144_v31  ;;  %v12158_v33 = vadd.f32 %v8427_v62, %v8214_v2  ;;  %v12160_v39 = vadd.f32 %v8470_v37, %v8222_v3 }
 0xdfa   : > { %v8481_v54 = vmul.f32 %v8473_v15, %v12138_v51  ;;  %v8483_v48 = vmul.f32 %v8475_v34, %v12140_v59  ;;  %v8477_v32 = vmul.f32 %v12150_v53, %v12150_v53  ;;  %v8479_v14 = vmul.f32 %v12152_v16, %v12152_v16 }
 0xdfb   : > { %v8482_v30 = vmul.f32 %v8474_v9, %v12142_v11  ;;  %v8484_v4 = vmul.f32 %v8476_v40, %v12144_v31  ;;  %v8478_v63 = vmul.f32 %v12158_v33, %v12158_v33  ;;  %v8480_v55 = vmul.f32 %v12160_v39, %v12160_v39 }
 0xdfc   : > { %v8489_v42 = vmul.f32 0.044715, %v8481_v54  ;;  %v8491_v6 = vmul.f32 0.044715, %v8483_v48  ;;  %v8485_v25 = vmul.f32 %v8477_v32, %v12150_v53  ;;  %v8487_v46 = vmul.f32 %v8479_v14, %v12152_v16 }
 0xdfd   : > { %v8490_v44 = vmul.f32 0.044715, %v8482_v30  ;;  %v8492_v8 = vmul.f32 0.044715, %v8484_v4  ;;  %v8486_v50 = vmul.f32 %v8478_v63, %v12158_v33  ;;  %v8488_v26 = vmul.f32 %v8480_v55, %v12160_v39 }
 0xdfe   : > { %v8497_v49 = vadd.f32 %v8489_v42, %v12138_v51  ;;  %v8499_v12 = vadd.f32 %v8491_v6, %v12140_v59  ;;  %v8493_v5 = vmul.f32 0.044715, %v8485_v25  ;;  %v8495_v60 = vmul.f32 0.044715, %v8487_v46 }
 0xdff   : > { %v8498_v57 = vadd.f32 %v8490_v44, %v12142_v11  ;;  %v8500_v38 = vadd.f32 %v8492_v8, %v12144_v31  ;;  %v8494_v0 = vmul.f32 0.044715, %v8486_v50  ;;  %v8496_v13 = vmul.f32 0.044715, %v8488_v26 }
 0xe00   : > { %v8505_v1 = vmul.f32 0.7978846, %v8497_v49  ;;  %v8507_v35 = vmul.f32 0.7978846, %v8499_v12  ;;  %v8501_v45 = vadd.f32 %v8493_v5, %v12150_v53  ;;  %v8503_v21 = vadd.f32 %v8495_v60, %v12152_v16 }
 0xe01   : > { %v8506_v24 = vmul.f32 0.7978846, %v8498_v57  ;;  %v8508_v19 = vmul.f32 0.7978846, %v8500_v38  ;;  %v8502_v61 = vadd.f32 %v8494_v0, %v12158_v33  ;;  %v8504_v58 = vadd.f32 %v8496_v13, %v12160_v39 }
 0xe02   : > { %10137 = vtanh.f32 %v8505_v1  ;;  %v8509_v23 = vmul.f32 0.7978846, %v8501_v45  ;;  %v8511_v20 = vmul.f32 0.7978846, %v8503_v21 }
 0xe03   : > { %10139 = vtanh.f32 %v8507_v35  ;;  %v8510_v36 = vmul.f32 0.7978846, %v8502_v61  ;;  %v8512_v22 = vmul.f32 0.7978846, %v8504_v58 }
 0xe04   : > { %10141 = vtanh.f32 %v8506_v24 }
 0xe05   : > { %10143 = vtanh.f32 %v8508_v19 }
 0xe06   : > { %10145 = vtanh.f32 %v8509_v23 }
 0xe07   : > { %10147 = vtanh.f32 %v8511_v20 }
 0xe08   : > { %10149 = vtanh.f32 %v8510_v36 }
 0xe09   : > { %10151 = vtanh.f32 %v8512_v22 }
 0xe0c   : > { %v10138_v52 = vpop.eup %10137 }
 0xe0d   : > { %v10140_v29 = vpop.eup %10139  ;;  %v8521_v7 = vadd.f32 1.0, %v10138_v52 }
 0xe0e   : > { %v10142_v43 = vpop.eup %10141  ;;  %v8523_v2 = vadd.f32 1.0, %v10140_v29 }
 0xe0f   : > { %v10144_v3 = vpop.eup %10143  ;;  %v8522_v10 = vadd.f32 1.0, %v10142_v43  ;;  %v8529_v41 = vmul.f32 0.5, %v8521_v7 }
 0xe10   : > { %v10146_v27 = vpop.eup %10145  ;;  %v8524_v17 = vadd.f32 1.0, %v10144_v3  ;;  %v8531_v34 = vmul.f32 0.5, %v8523_v2 }
 0xe11   : > { %v10148_v56 = vpop.eup %10147  ;;  %v8525_v18 = vadd.f32 1.0, %v10146_v27  ;;  %v8530_v54 = vmul.f32 0.5, %v8522_v10  ;;  %v8537_v30 = vmul.f32 %v8529_v41, %v12138_v51  ;;  %v9368_v10 = vld [vmem:[%s957_s28] ss:$0 sm:$0xff] }
 0xe12   : > { %v10150_v15 = vpop.eup %10149  ;;  %v8527_v62 = vadd.f32 1.0, %v10148_v56  ;;  %v8532_v14 = vmul.f32 0.5, %v8524_v17  ;;  %v8539_v55 = vmul.f32 %v8531_v34, %v12140_v59  ;;  %v9369_v56 = vld [vmem:[%s960_s14] ss:$0 sm:$0xff] }
 0xe13   : > { %v10152_v37 = vpop.eup %10151  ;;  %v8533_v9 = vmul.f32 0.5, %v8525_v18  ;;  %v8526_v40 = vadd.f32 1.0, %v10150_v15  ;;  %v8538_v25 = vmul.f32 %v8530_v54, %v12142_v11  ;;  %v9335_v11 = vld [vmem:[%s954_s11] ss:$0 sm:$0xff] }
 0xe14   : > { %v8535_v48 = vmul.f32 0.5, %v8527_v62  ;;  %v8528_v32 = vadd.f32 1.0, %v10152_v37  ;;  %v8540_v8 = vmul.f32 %v8532_v14, %v12144_v31 }
 0xe15   : > { %v8541_v4 = vmul.f32 %v8533_v9, %v12150_v53  ;;  %v8534_v63 = vmul.f32 0.5, %v8526_v40 }
 0xe16   : > { %v8543_v42 = vmul.f32 %v8535_v48, %v12152_v16  ;;  %v8536_v6 = vmul.f32 0.5, %v8528_v32 }
 0xe17   : > { %v8542_v46 = vmul.f32 %v8534_v63, %v12158_v33  ;;  %v8545_v44 = vpack.c.bf16 %v8541_v4, %v8537_v30 }
 0xe18   : > { %v8544_v50 = vmul.f32 %v8536_v6, %v12160_v39  ;;  %v8547_v26 = vpack.c.bf16 %v8543_v42, %v8539_v55 }
 0xe19   : > { %v8546_v51 = vpack.c.bf16 %v8542_v46, %v8538_v25 }
 0xe1a   : > { %v8548_v49 = vpack.c.bf16 %v8544_v50, %v8540_v8 }
 0xe1b   : > { %8844 = vmatprep.mubr.bf16.mxu1 %v8546_v51 }
 0xe1c   : > { %8885 = vmatprep.mubr.bf16.mxu0 %v8548_v49  ;;  %8845 = vmatmul.mubr.bf16.vlgmr.msra.gmra.mrb[120].mxu1 %v8545_v44 }
 0xe1d   : > { %8886 = vmatmul.mubr.bf16.vlgmr.msra.gmra.mrb[96].mxu0 %v8547_v26 }
 0xeef   : > { %v9506_v59 = vpop.f32.mrb[120].mxu1 }
 0xef0   : > { %v9528_v53 = vpop.f32.mrb[96].mxu0  ;;  %v9507_v16 = vpop.f32.mrb[121].mxu1 }
 0xef1   : > { %v9508_v33 = vadd.f32 %v9507_v16, %v9506_v59  ;;  %v9529_v12 = vpop.f32.mrb[97].mxu0  ;;  %v9509_v31 = vpop.f32.mrb[122].mxu1 }
 0xef2   : > { %v9530_v5 = vadd.f32 %v9529_v12, %v9528_v53  ;;  %v9531_v39 = vpop.f32.mrb[98].mxu0  ;;  %v9510_v60 = vpop.f32.mrb[123].mxu1 }
 0xef3   : > { %v8847_v57 = vadd.f32 %v9508_v33, %v9335_v11  ;;  %v9511_v38 = vadd.f32 %v9510_v60, %v9509_v31  ;;  %v9532_v0 = vpop.f32.mrb[99].mxu0 }
 0xef4   : > { %v9533_v13 = vadd.f32 %v9532_v0, %v9531_v39 }
 0xef5   : > { %v8888_v1 = vadd.f32 %v9530_v5, %v8847_v57  ;;  %v8850_v35 = vadd.f32 %v9511_v38, %v9335_v11 }
 0xef7   : > { %v8891_v45 = vadd.f32 %v9533_v13, %v8850_v35  ;;  %v8894_v21 = vadd.f32 %v8888_v1, %v12094_v47 }
 0xef9   : > { %8898 = vadd.xlane.f32.xlu0 %v8894_v21  ;;  %v8895_v24 = vadd.f32 %v8891_v45, %v12096_v28 }
 0xefb   : > { %8900 = vadd.xlane.f32.xlu1 %v8895_v24 }
 0xf86   : > { %v8899_v19 = vpop.xlane.xlu0 %8898 }
 0xf87   : > { %v8902_v61 = vmul.f32 0.0078125, %v8899_v19 }
 0xf88   : > { %v8901_v58 = vpop.xlane.xlu1 %8900 }
 0xf89   : > { %v8904_v23 = vsub.f32 %v8894_v21, %v8902_v61  ;;  %v8903_v20 = vmul.f32 0.0078125, %v8901_v58 }
 0xf8b   : > { %v8905_v36 = vsub.f32 %v8895_v24, %v8903_v20  ;;  %v8906_v22 = vmul.f32 %v8904_v23, %v8904_v23 }
 0xf8d   : > { %8908 = vadd.xlane.f32.xlu0 %v8906_v22  ;;  %v8907_v52 = vmul.f32 %v8905_v36, %v8905_v36 }
 0xf8f   : > { %8910 = vadd.xlane.f32.xlu1 %v8907_v52 }
0x101a   : > { %v8909_v29 = vpop.xlane.xlu0 %8908 }
0x101b   : > { %v8912_v7 = vmul.f32 0.0078125, %v8909_v29 }
0x101c   : > { %v8911_v43 = vpop.xlane.xlu1 %8910 }
0x101d   : > { %v8914_v47 = vadd.f32 1e-07, %v8912_v7  ;;  %v8913_v2 = vmul.f32 0.0078125, %v8911_v43 }
0x101f   : > { %10153 = vrsqrt.f32 %v8914_v47  ;;  %v8915_v28 = vadd.f32 1e-07, %v8913_v2 }
0x1021   : > { %10155 = vrsqrt.f32 %v8915_v28 }
0x1029   : > { %v10154_v3 = vpop.eup %10153 }
0x102a   : > { %v8918_v27 = vmul.f32 %v10154_v3, %v8904_v23 }
0x102b   : > { %v10156_v17 = vpop.eup %10155 }
0x102c   : > { %v8926_v41 = vmul.f32 %v9368_v10, %v8918_v27  ;;  %v8919_v18 = vmul.f32 %v10156_v17, %v8905_v36 }
0x102e   : > { %v8934_v15 = vadd.f32 %v9369_v56, %v8926_v41  ;;  %v8927_v34 = vmul.f32 %v9368_v10, %v8919_v18 }
0x1030   : > { %8936 = vst [vmem:[#allocation2] sm:$0xff] %v8934_v15  ;;  %8938 = vst [vmem:[%s12331_s22] sm:$0xff] %v8934_v15  ;;  %v8935_v62 = vadd.f32 %v9369_v56, %v8927_v34 }
0x1032   : > { %8937 = vst [vmem:[#allocation2 + $0x8] sm:$0xff] %v8935_v62  ;;  %8939 = vst [vmem:[%s12331_s22 + $0x8] sm:$0xff] %v8935_v62 }
0x1033 PF: > { %s12332_s30 = sld [smem:[#allocation15_spill]]  ;;  %s12333_s3 = sld [smem:[#allocation13_spill]] }
0x1034   : > { %s12334_s28 = sld [smem:[#allocation14_spill]]  ;;  %s12335_s29 = sld [smem:[#allocation16_spill]] }
0x1039   : > { %p38_p5 = scmp.ge.s32.totalorder %s12332_s30, 4  }
0x103b   :  { %40 = sbr.rel (!%p38_p5) target bundleno = 28 (0x1c), region = 215 }
0x1042   :  { %8951 = vsyncpa [#allocation4], 1 }
0x1043   :  { %8953 = vsyncpa [#allocation4 + $0x1], 1 }
0x1044   :  { %8954 = vsyncpa [#allocation6], 1 }
0x1045   :  { %8956 = vsyncpa [#allocation6 + $0x1], 1 }
0x1046   :  { %8957 = vsyncpa [#allocation9], 1 }
0x1047   :  { %8959 = vsyncpa [#allocation9 + $0x1], 1 }

</bundles_post_ra>
